<compile_context>
chip_gen: v5e
topology: v5e:2x2
jax: 0.10.0
libtpu: 0.0.40
codegen_flags: <defaults>
</compile_context>

<pallas_src>
import functools

import jax
import jax.numpy as jnp
from jax.experimental import pallas as pl
from jax.experimental.pallas import tpu as pltpu

EPS = 1e-5


# ---------------------------------------------------------------------------
# Small helpers (wrapper-side layout plumbing).
# ---------------------------------------------------------------------------
def _rup(x, m=128):
    return ((x + m - 1) // m) * m


def _pad_last(a, c):
    p = c - a.shape[-1]
    return a if p == 0 else jnp.pad(a, [(0, 0)] * (a.ndim - 1) + [(0, p)])


def _pad2(a, r, c):
    pr, pc = r - a.shape[-2], c - a.shape[-1]
    if pr == 0 and pc == 0:
        return a
    return jnp.pad(a, [(0, 0)] * (a.ndim - 2) + [(0, pr), (0, pc)])


def _pad_vec(v, c):
    return _pad_last(v.astype(jnp.float32).reshape(1, -1), c)


def _pick_row_tile(m, target=256):
    """Largest multiple of 8 that divides m and is <= target (256-1024 rows is the
    HBM-roofline sweet spot; 256 keeps double-buffered tiles small enough for v7x)."""
    start = min(target, m)
    start -= start % 8
    for cand in range(start, 7, -8):
        if m % cand == 0:
            return cand
    return m


def _bn_scale_shift(ssum, ssq, gamma, beta, count):
    """Fold training-mode batch stats into a per-channel affine (scale, shift)."""
    mean = ssum / count
    var = ssq / count - mean * mean
    scale = gamma * jax.lax.rsqrt(var + EPS)
    return scale, beta - mean * scale


# ---------------------------------------------------------------------------
# Kernel A: conv1 (1x1) as a row-tiled bf16 matmul + per-channel sum/sumsq for bn1.
# ---------------------------------------------------------------------------
def _k_conv1(x_ref, w1_ref, y1_ref, ssum_ref, ssq_ref):
    i = pl.program_id(0)

    @pl.when(i == 0)
    def _():
        ssum_ref[...] = jnp.zeros_like(ssum_ref)
        ssq_ref[...] = jnp.zeros_like(ssq_ref)

    y = jnp.dot(x_ref[...], w1_ref[...], preferred_element_type=jnp.float32)
    y1_ref[...] = y.astype(y1_ref.dtype)
    ssum_ref[...] += jnp.sum(y, axis=0, keepdims=True)
    ssq_ref[...] += jnp.sum(y * y, axis=0, keepdims=True)


# ---------------------------------------------------------------------------
# Kernel B: bn1 + ReLU + conv2 (3x3, stride s, pad 1) for one sample.
# The input is the phase-split (s*s planes) of conv1's raw output; the kernel writes a
# zero-padded BN+ReLU'd copy into VMEM scratch (the zeros implement the conv's spatial
# padding) and accumulates 9 shifted matmuls.  Also accumulates bn1-reuse stats.
# ---------------------------------------------------------------------------
def _k_conv2(stride, hs, ws, ph_ref, w2_ref, sc_ref, sh_ref,
             y2_ref, ssum_ref, ssq_ref, hp_ref, acc_ref):
    n = pl.program_id(0)

    @pl.when(n == 0)
    def _():
        ssum_ref[...] = jnp.zeros_like(ssum_ref)
        ssq_ref[...] = jnp.zeros_like(ssq_ref)

    # BN1 + ReLU into the zero-padded phase scratch.
    hp_ref[...] = jnp.zeros_like(hp_ref)
    h = ph_ref[...].astype(jnp.float32) * sc_ref[0] + sh_ref[0]
    hp_ref[:, 1:1 + hs, 1:1 + ws, :] = jnp.maximum(h, 0.0)

    # 9-tap accumulation (fully unrolled; offsets/phases are static Python ints).
    acc_ref[...] = jnp.zeros_like(acc_ref)
    for ky in range(3):
        for kx in range(3):
            dy, dx = ky - 1, kx - 1
            py, px = dy % stride, dx % stride
            oy, ox = (dy - py) // stride, (dx - px) // stride
            q = py * stride + px
            slab = hp_ref[q, 1 + oy:1 + oy + hs, 1 + ox:1 + ox + ws, :]
            slab2 = slab.reshape(hs * ws, slab.shape[2]).astype(jnp.bfloat16)
            acc_ref[...] += jnp.dot(slab2, w2_ref[ky * 3 + kx],
                                    preferred_element_type=jnp.float32)

    y2 = acc_ref[...]
    y2_ref[...] = y2.astype(y2_ref.dtype)
    ssum_ref[...] += jnp.sum(y2, axis=0, keepdims=True)
    ssq_ref[...] += jnp.sum(y2 * y2, axis=0, keepdims=True)


# ---------------------------------------------------------------------------
# Kernel C: bn1(reuse) + ReLU + conv3 (1x1) + shortcut conv (1x1, already strided rows),
# plus bn2 / bn_sc stats and per-sample spatial sums for SE (no pool matrices).
# ---------------------------------------------------------------------------
def _k_conv3_sc(y2_ref, w3_ref, sc_ref, sh_ref, xsc_ref, wsc_ref,
                y3_ref, ysc_ref, sesum_ref,
                s3sum_ref, s3sq_ref, scsum_ref, scsq_ref):
    n = pl.program_id(0)

    @pl.when(n == 0)
    def _():
        s3sum_ref[...] = jnp.zeros_like(s3sum_ref)
        s3sq_ref[...] = jnp.zeros_like(s3sq_ref)
        scsum_ref[...] = jnp.zeros_like(scsum_ref)
        scsq_ref[...] = jnp.zeros_like(scsq_ref)

    h = jnp.maximum(y2_ref[...].astype(jnp.float32) * sc_ref[...] + sh_ref[...], 0.0)
    y3 = jnp.dot(h.astype(jnp.bfloat16), w3_ref[...],
                 preferred_element_type=jnp.float32)
    ysc = jnp.dot(xsc_ref[...], wsc_ref[...], preferred_element_type=jnp.float32)

    y3_ref[...] = y3.astype(y3_ref.dtype)
    ysc_ref[...] = ysc.astype(ysc_ref.dtype)
    sesum_ref[0] = jnp.sum(y3, axis=0, keepdims=True)
    s3sum_ref[...] += jnp.sum(y3, axis=0, keepdims=True)
    s3sq_ref[...] += jnp.sum(y3 * y3, axis=0, keepdims=True)
    scsum_ref[...] += jnp.sum(ysc, axis=0, keepdims=True)
    scsq_ref[...] += jnp.sum(ysc * ysc, axis=0, keepdims=True)


# ---------------------------------------------------------------------------
# Kernel D: bn2 + SE gate (in-kernel squeeze-excitation, broadcast multiply)
#           + bn_sc + residual add + ReLU.  Grid axis is fully parallel.
# ---------------------------------------------------------------------------
def _k_finish(is_se, inv_hw,
              y3_ref, ysc_ref, sesum_ref,
              sc2_ref, sh2_ref, scs_ref, shs_ref,
              sew1_ref, seb1_ref, sew2_ref, seb2_ref, o_ref):
    h = y3_ref[...].astype(jnp.float32) * sc2_ref[...] + sh2_ref[...]
    if is_se:
        m = sesum_ref[0] * inv_hw * sc2_ref[...] + sh2_ref[...]          # bn2(spatial mean)
        s = jnp.dot(m, sew1_ref[...], preferred_element_type=jnp.float32) + seb1_ref[...]
        s = jnp.maximum(s, 0.0)
        s = jnp.dot(s, sew2_ref[...], preferred_element_type=jnp.float32) + seb2_ref[...]
        coeff = pl.reciprocal(1.0 + jnp.exp(-s), approx=True)            # sigmoid via EUP
        h = h * coeff
    sc = ysc_ref[...].astype(jnp.float32) * scs_ref[...] + shs_ref[...]
    o_ref[...] = jnp.maximum(h + sc, 0.0)


# ---------------------------------------------------------------------------
# Wrapper: layout plumbing (NCHW->NHWC, 128-lane channel padding, bf16 casts,
# phase split of conv1's output) + the four tiled pallas_calls + BN stat folds.
# ---------------------------------------------------------------------------
def bottleneck_forward(x_nchw, params, strides, is_se):
    n, cin, H, W = x_nchw.shape
    cmid = params["w1"].shape[1]
    c4 = 4 * cmid
    cse = params["se_w1"].shape[1]

    # TODO(synk): generalize to spatial sizes not divisible by the stride / 8.
    assert H % strides == 0 and W % strides == 0
    hs, ws = H // strides, W // strides
    assert ws % 8 == 0

    hw2 = hs * ws
    M = n * H * W
    M2 = n * hw2
    ss = strides * strides
    cin_p, cm_p, c4_p, cse_p = _rup(cin), _rup(cmid), _rup(c4), _rup(cse)
    f32, bf16 = jnp.float32, jnp.bfloat16

    # --- lane-dense, bf16 operands ---------------------------------------
    x = _pad_last(jnp.transpose(x_nchw, (0, 2, 3, 1)).astype(f32), cin_p)
    x2d = x.reshape(M, cin_p).astype(bf16)
    xsc2d = x[:, ::strides, ::strides, :].reshape(M2, cin_p).astype(bf16)

    w1p = _pad2(params["w1"], cin_p, cm_p).astype(bf16)
    w2p = _pad2(params["w2"].reshape(9, cmid, cmid), cm_p, cm_p).astype(bf16)
    w3p = _pad2(params["w3"], cm_p, c4_p).astype(bf16)
    wscp = _pad2(params["wsc"], cin_p, c4_p).astype(bf16)
    g1p, b1p = _pad_vec(params["g1"], cm_p), _pad_vec(params["b1"], cm_p)
    g2p, b2p = _pad_vec(params["g2"], c4_p), _pad_vec(params["b2"], c4_p)
    gscp, bscp = _pad_vec(params["gsc"], c4_p), _pad_vec(params["bsc"], c4_p)
    sew1p = _pad2(params["se_w1"], c4_p, cse_p).astype(f32)
    seb1p = _pad_vec(params["se_b1"], cse_p)
    sew2p = _pad2(params["se_w2"], cse_p, c4_p).astype(f32)
    seb2p = _pad_vec(params["se_b2"], c4_p)

    # --- Kernel A: conv1 + bn1 stats (row-tiled, pipelined) ---------------
    tm = _pick_row_tile(M)
    y1, s1sum, s1sq = pl.pallas_call(
        _k_conv1,
        grid=(M // tm,),
        in_specs=[pl.BlockSpec((tm, cin_p), lambda i: (i, 0)),
                  pl.BlockSpec((cin_p, cm_p), lambda i: (0, 0))],
        out_specs=[pl.BlockSpec((tm, cm_p), lambda i: (i, 0)),
                   pl.BlockSpec((1, cm_p), lambda i: (0, 0)),
                   pl.BlockSpec((1, cm_p), lambda i: (0, 0))],
        out_shape=[jax.ShapeDtypeStruct((M, cm_p), bf16),
                   jax.ShapeDtypeStruct((1, cm_p), f32),
                   jax.ShapeDtypeStruct((1, cm_p), f32)],
        compiler_params=pltpu.CompilerParams(dimension_semantics=("arbitrary",)),
    )(x2d, w1p)
    scale1, shift1 = _bn_scale_shift(s1sum, s1sq, g1p, b1p, M)

    # --- phase split of conv1's raw output (1x permutation, no 9x im2col) -
    phases = (y1.reshape(n, hs, strides, ws, strides, cm_p)
                .transpose(0, 2, 4, 1, 3, 5)
                .reshape(n * ss, hs, ws, cm_p))

    # --- Kernel B: bn1+relu+conv2 per sample + bn1-reuse stats ------------
    y2, s2sum, s2sq = pl.pallas_call(
        functools.partial(_k_conv2, strides, hs, ws),
        grid=(n,),
        in_specs=[pl.BlockSpec((ss, hs, ws, cm_p), lambda i: (i, 0, 0, 0)),
                  pl.BlockSpec((9, cm_p, cm_p), lambda i: (0, 0, 0)),
                  pl.BlockSpec((1, cm_p), lambda i: (0, 0)),
                  pl.BlockSpec((1, cm_p), lambda i: (0, 0))],
        out_specs=[pl.BlockSpec((hw2, cm_p), lambda i: (i, 0)),
                   pl.BlockSpec((1, cm_p), lambda i: (0, 0)),
                   pl.BlockSpec((1, cm_p), lambda i: (0, 0))],
        out_shape=[jax.ShapeDtypeStruct((M2, cm_p), bf16),
                   jax.ShapeDtypeStruct((1, cm_p), f32),
                   jax.ShapeDtypeStruct((1, cm_p), f32)],
        scratch_shapes=[pltpu.VMEM((ss, hs + 2, ws + 2, cm_p), f32),
                        pltpu.VMEM((hw2, cm_p), f32)],
        compiler_params=pltpu.CompilerParams(dimension_semantics=("arbitrary",)),
    )(phases, w2p, scale1, shift1)
    scale1b, shift1b = _bn_scale_shift(s2sum, s2sq, g1p, b1p, M2)

    # --- Kernel C: bn1+relu+conv3 + shortcut conv + stats + SE sums -------
    (y3, ysc, sesum, s3sum, s3sq, scsum, scsq) = pl.pallas_call(
        _k_conv3_sc,
        grid=(n,),
        in_specs=[pl.BlockSpec((hw2, cm_p), lambda i: (i, 0)),
                  pl.BlockSpec((cm_p, c4_p), lambda i: (0, 0)),
                  pl.BlockSpec((1, cm_p), lambda i: (0, 0)),
                  pl.BlockSpec((1, cm_p), lambda i: (0, 0)),
                  pl.BlockSpec((hw2, cin_p), lambda i: (i, 0)),
                  pl.BlockSpec((cin_p, c4_p), lambda i: (0, 0))],
        out_specs=[pl.BlockSpec((hw2, c4_p), lambda i: (i, 0)),
                   pl.BlockSpec((hw2, c4_p), lambda i: (i, 0)),
                   pl.BlockSpec((1, 1, c4_p), lambda i: (i, 0, 0)),
                   pl.BlockSpec((1, c4_p), lambda i: (0, 0)),
                   pl.BlockSpec((1, c4_p), lambda i: (0, 0)),
                   pl.BlockSpec((1, c4_p), lambda i: (0, 0)),
                   pl.BlockSpec((1, c4_p), lambda i: (0, 0))],
        out_shape=[jax.ShapeDtypeStruct((M2, c4_p), bf16),
                   jax.ShapeDtypeStruct((M2, c4_p), bf16),
                   jax.ShapeDtypeStruct((n, 1, c4_p), f32),
                   jax.ShapeDtypeStruct((1, c4_p), f32),
                   jax.ShapeDtypeStruct((1, c4_p), f32),
                   jax.ShapeDtypeStruct((1, c4_p), f32),
                   jax.ShapeDtypeStruct((1, c4_p), f32)],
        compiler_params=pltpu.CompilerParams(dimension_semantics=("arbitrary",)),
    )(y2, w3p, scale1b, shift1b, xsc2d, wscp)
    scale2, shift2 = _bn_scale_shift(s3sum, s3sq, g2p, b2p, M2)
    scale_sc, shift_sc = _bn_scale_shift(scsum, scsq, gscp, bscp, M2)

    # --- Kernel D: bn2 + SE gate + bn_sc + residual + relu (parallel) -----
    out2d = pl.pallas_call(
        functools.partial(_k_finish, is_se, 1.0 / hw2),
        grid=(n,),
        in_specs=[pl.BlockSpec((hw2, c4_p), lambda i: (i, 0)),
                  pl.BlockSpec((hw2, c4_p), lambda i: (i, 0)),
                  pl.BlockSpec((1, 1, c4_p), lambda i: (i, 0, 0)),
                  pl.BlockSpec((1, c4_p), lambda i: (0, 0)),
                  pl.BlockSpec((1, c4_p), lambda i: (0, 0)),
                  pl.BlockSpec((1, c4_p), lambda i: (0, 0)),
                  pl.BlockSpec((1, c4_p), lambda i: (0, 0)),
                  pl.BlockSpec((c4_p, cse_p), lambda i: (0, 0)),
                  pl.BlockSpec((1, cse_p), lambda i: (0, 0)),
                  pl.BlockSpec((cse_p, c4_p), lambda i: (0, 0)),
                  pl.BlockSpec((1, c4_p), lambda i: (0, 0))],
        out_specs=pl.BlockSpec((hw2, c4_p), lambda i: (i, 0)),
        out_shape=jax.ShapeDtypeStruct((M2, c4_p), f32),
        compiler_params=pltpu.CompilerParams(dimension_semantics=("parallel",)),
    )(y3, ysc, sesum, scale2, shift2, scale_sc, shift_sc,
      sew1p, seb1p, sew2p, seb2p)

    out = out2d.reshape(n, hs, ws, c4_p)[..., :c4]
    return jnp.transpose(out, (0, 3, 1, 2))                              # NHWC -> NCHW


# ---------------------------------------------------------------------------
# Deterministic parameter initialization (shapes follow the PyTorch module,
# conv weights stored in matmul layout: (Cin, Cout), and (ky, kx, Cin, Cout) for conv2).
# ---------------------------------------------------------------------------
def init_params(key, in_channels, out_channels):
    cmid = out_channels
    c4 = 4 * out_channels
    cse = c4 // 16
    ks = jax.random.split(key, 14)

    def nrm(k, shape, scale):
        return (scale * jax.random.normal(k, shape)).astype(jnp.float32)

    return {
        "w1": nrm(ks[0], (in_channels, cmid), 0.3),
        "w2": nrm(ks[1], (3, 3, cmid, cmid), 0.2),
        "w3": nrm(ks[2], (cmid, c4), 0.3),
        "wsc": nrm(ks[3], (in_channels, c4), 0.3),
        "g1": 1.0 + 0.1 * jax.random.normal(ks[4], (cmid,), jnp.float32),
        "b1": 0.1 * jax.random.normal(ks[5], (cmid,), jnp.float32),
        "g2": 1.0 + 0.1 * jax.random.normal(ks[6], (c4,), jnp.float32),
        "b2": 0.1 * jax.random.normal(ks[7], (c4,), jnp.float32),
        "gsc": 1.0 + 0.1 * jax.random.normal(ks[8], (c4,), jnp.float32),
        "bsc": 0.1 * jax.random.normal(ks[9], (c4,), jnp.float32),
        "se_w1": nrm(ks[10], (c4, cse), 0.3),
        "se_b1": nrm(ks[11], (cse,), 0.1),
        "se_w2": nrm(ks[12], (cse, c4), 0.3),
        "se_b2": nrm(ks[13], (c4,), 0.1),
    }


# ---------------------------------------------------------------------------
# Pure-JAX f32 reference (PyTorch training-mode semantics) used to verify the kernels.
# ---------------------------------------------------------------------------
def reference_forward(x_nchw, params, strides, is_se):
    n, cin, H, W = x_nchw.shape
    x = jnp.transpose(x_nchw, (0, 2, 3, 1)).astype(jnp.float32)
    cmid = params["w1"].shape[1]
    c4 = 4 * cmid

    def bn(h, g, b):
        mean = jnp.mean(h, axis=0, keepdims=True)
        var = jnp.mean((h - mean) ** 2, axis=0, keepdims=True)
        return (h - mean) * jax.lax.rsqrt(var + EPS) * g + b

    h = x.reshape(-1, cin) @ params["w1"]
    h = jnp.maximum(bn(h, params["g1"], params["b1"]), 0.0).reshape(n, H, W, cmid)
    hp = jnp.pad(h, ((0, 0), (1, 1), (1, 1), (0, 0)))
    ho = (H - 1) // strides + 1
    wo = (W - 1) // strides + 1
    cols = [hp[:, ky::strides, kx::strides, :][:, :ho, :wo, :]
            for ky in range(3) for kx in range(3)]
    patches = jnp.concatenate(cols, axis=-1).reshape(n * ho * wo, 9 * cmid)
    h = patches @ params["w2"].reshape(9 * cmid, cmid)
    h = jnp.maximum(bn(h, params["g1"], params["b1"]), 0.0)
    h = bn(h @ params["w3"], params["g2"], params["b2"])
    if is_se:
        h4 = h.reshape(n, ho, wo, c4)
        s = jnp.mean(h4, axis=(1, 2))
        s = jnp.maximum(s @ params["se_w1"] + params["se_b1"], 0.0)
        s = s @ params["se_w2"] + params["se_b2"]
        h = (h4 * jax.nn.sigmoid(s)[:, None, None, :]).reshape(-1, c4)
    xsc = x[:, ::strides, ::strides, :][:, :ho, :wo, :].reshape(-1, cin)
    sc = bn(xsc @ params["wsc"], params["gsc"], params["bsc"])
    out = jnp.maximum(h + sc, 0.0).reshape(n, ho, wo, c4)
    return jnp.transpose(out, (0, 3, 1, 2))


if __name__ == "__main__":
    key = jax.random.PRNGKey(0)
    kx_, kp_ = jax.random.split(key)

    N, Cin, H, W = 2, 4, 16, 16
    out_channels, strides, is_se = 8, 2, True

    x = jax.random.normal(kx_, (N, Cin, H, W), jnp.float32)
    params = init_params(kp_, Cin, out_channels)

    fwd = jax.jit(bottleneck_forward, static_argnames=("strides", "is_se"))
    out = jax.block_until_ready(fwd(x, params, strides=strides, is_se=is_se))

    assert out.shape == (N, 4 * out_channels, H // strides, W // strides), out.shape
    ref = reference_forward(x, params, strides, is_se)
    max_err = float(jnp.max(jnp.abs(out - ref)))
    assert jnp.allclose(out, ref, atol=5e-2, rtol=5e-2), f"max_err={max_err}"

    print("KERNEL_OK")
</pallas_src>

<mosaic_0001>
module attributes {stable_mosaic.version = 11 : i64} {
  func.func @_k_conv1(%arg0: i32, %arg1: memref<256x128xbf16, #tpu.memory_space<vmem>>, %arg2: memref<128x128xbf16, #tpu.memory_space<vmem>>, %arg3: memref<256x128xbf16, #tpu.memory_space<vmem>>, %arg4: memref<1x128xf32, #tpu.memory_space<vmem>>, %arg5: memref<1x128xf32, #tpu.memory_space<vmem>>) attributes {dimension_semantics = [#tpu.dimension_semantics<arbitrary>], iteration_bounds = array<i64: 2>, scalar_prefetch = 0 : i64, scratch_operands = 0 : i64, tpu.core_type = #tpu.core_type<tc>, window_params = [{transform_indices = @transform_0, window_bounds = array<i64: 256, 128>}, {pipeline_mode = #tpu.pipeline_mode<synchronous>, transform_indices = @transform_1, window_bounds = array<i64: 128, 128>}, {transform_indices = @transform_2, window_bounds = array<i64: 256, 128>}, {pipeline_mode = #tpu.pipeline_mode<synchronous>, transform_indices = @transform_3, window_bounds = array<i64: 1, 128>}, {pipeline_mode = #tpu.pipeline_mode<synchronous>, transform_indices = @transform_4, window_bounds = array<i64: 1, 128>}]} {
    %c0_i32 = arith.constant 0 : i32
    %0 = arith.cmpi eq, %arg0, %c0_i32 : i32
    %1 = arith.extui %0 : i1 to i32
    %c0_i32_0 = arith.constant 0 : i32
    %2 = arith.cmpi ne, %1, %c0_i32_0 : i32
    scf.if %2 {
      %cst_16 = arith.constant 0.000000e+00 : f32
      %19 = vector.broadcast %cst_16 : f32 to vector<1x128xf32>
      %c0_17 = arith.constant 0 : index
      %c0_18 = arith.constant 0 : index
      %20 = vector.load %arg4[%c0_17, %c0_18] : memref<1x128xf32, #tpu.memory_space<vmem>>, vector<1x128xf32>
      tpu.vector_store %arg4[%c0_17, %c0_18], %19 {strides = array<i32>} : memref<1x128xf32, #tpu.memory_space<vmem>>, vector<1x128xf32>,
      %cst_19 = arith.constant 0.000000e+00 : f32
      %21 = vector.broadcast %cst_19 : f32 to vector<1x128xf32>
      %c0_20 = arith.constant 0 : index
      %c0_21 = arith.constant 0 : index
      %22 = vector.load %arg5[%c0_20, %c0_21] : memref<1x128xf32, #tpu.memory_space<vmem>>, vector<1x128xf32>
      tpu.vector_store %arg5[%c0_20, %c0_21], %21 {strides = array<i32>} : memref<1x128xf32, #tpu.memory_space<vmem>>, vector<1x128xf32>,
    } else {
    }
    %c0 = arith.constant 0 : index
    %c0_1 = arith.constant 0 : index
    %3 = vector.load %arg1[%c0, %c0_1] : memref<256x128xbf16, #tpu.memory_space<vmem>>, vector<256x128xbf16>
    %c0_2 = arith.constant 0 : index
    %c0_3 = arith.constant 0 : index
    %4 = vector.load %arg2[%c0_2, %c0_3] : memref<128x128xbf16, #tpu.memory_space<vmem>>, vector<128x128xbf16>
    %cst = arith.constant dense<0.000000e+00> : vector<256x128xf32>
    %5 = tpu.matmul %3, %4, %cst {dimension_numbers = #tpu.dot_dimension_numbers<[1], [0], [0], [1], [0, 0, 1, 1], [], []>} : vector<256x128xbf16>, vector<128x128xbf16>, vector<256x128xf32> -> vector<256x128xf32>
    %6 = arith.truncf %5 : vector<256x128xf32> to vector<256x128xbf16>
    %c0_4 = arith.constant 0 : index
    %c0_5 = arith.constant 0 : index
    %7 = vector.load %arg3[%c0_4, %c0_5] : memref<256x128xbf16, #tpu.memory_space<vmem>>, vector<256x128xbf16>
    tpu.vector_store %arg3[%c0_4, %c0_5], %6 {strides = array<i32>} : memref<256x128xbf16, #tpu.memory_space<vmem>>, vector<256x128xbf16>,
    %c0_6 = arith.constant 0 : index
    %c0_7 = arith.constant 0 : index
    %8 = vector.load %arg4[%c0_6, %c0_7] : memref<1x128xf32, #tpu.memory_space<vmem>>, vector<1x128xf32>
    %cst_8 = arith.constant dense<0.000000e+00> : vector<128xf32>
    %9 = vector.multi_reduction <add>, %5, %cst_8 [0] : vector<256x128xf32> to vector<128xf32>
    %10 = vector.shape_cast %9 : vector<128xf32> to vector<1x128xf32>
    %11 = arith.addf %8, %10 : vector<1x128xf32>
    %c0_9 = arith.constant 0 : index
    %c0_10 = arith.constant 0 : index
    %12 = vector.load %arg4[%c0_9, %c0_10] : memref<1x128xf32, #tpu.memory_space<vmem>>, vector<1x128xf32>
    tpu.vector_store %arg4[%c0_9, %c0_10], %11 {strides = array<i32>} : memref<1x128xf32, #tpu.memory_space<vmem>>, vector<1x128xf32>,
    %c0_11 = arith.constant 0 : index
    %c0_12 = arith.constant 0 : index
    %13 = vector.load %arg5[%c0_11, %c0_12] : memref<1x128xf32, #tpu.memory_space<vmem>>, vector<1x128xf32>
    %14 = arith.mulf %5, %5 : vector<256x128xf32>
    %cst_13 = arith.constant dense<0.000000e+00> : vector<128xf32>
    %15 = vector.multi_reduction <add>, %14, %cst_13 [0] : vector<256x128xf32> to vector<128xf32>
    %16 = vector.shape_cast %15 : vector<128xf32> to vector<1x128xf32>
    %17 = arith.addf %13, %16 : vector<1x128xf32>
    %c0_14 = arith.constant 0 : index
    %c0_15 = arith.constant 0 : index
    %18 = vector.load %arg5[%c0_14, %c0_15] : memref<1x128xf32, #tpu.memory_space<vmem>>, vector<1x128xf32>
    tpu.vector_store %arg5[%c0_14, %c0_15], %17 {strides = array<i32>} : memref<1x128xf32, #tpu.memory_space<vmem>>, vector<1x128xf32>,
    return
  }
  func.func @transform_0(%arg0: i32) -> (i32, i32) {
    %c0_i32 = arith.constant 0 : i32
    %c0_i32_0 = arith.constant 0 : i32
    return %arg0, %c0_i32 : i32, i32
  }
  func.func @transform_1(%arg0: i32) -> (i32, i32) {
    %c0_i32 = arith.constant 0 : i32
    %c0_i32_0 = arith.constant 0 : i32
    %c0_i32_1 = arith.constant 0 : i32
    return %c0_i32, %c0_i32_0 : i32, i32
  }
  func.func @transform_2(%arg0: i32) -> (i32, i32) {
    %c0_i32 = arith.constant 0 : i32
    %c0_i32_0 = arith.constant 0 : i32
    return %arg0, %c0_i32 : i32, i32
  }
  func.func @transform_3(%arg0: i32) -> (i32, i32) {
    %c0_i32 = arith.constant 0 : i32
    %c0_i32_0 = arith.constant 0 : i32
    %c0_i32_1 = arith.constant 0 : i32
    return %c0_i32, %c0_i32_0 : i32, i32
  }
  func.func @transform_4(%arg0: i32) -> (i32, i32) {
    %c0_i32 = arith.constant 0 : i32
    %c0_i32_0 = arith.constant 0 : i32
    %c0_i32_1 = arith.constant 0 : i32
    return %c0_i32, %c0_i32_0 : i32, i32
  }
}

module attributes {stable_mosaic.version = 11 : i64} {
  func.func @_k_conv2(%arg0: i32, %arg1: memref<4x8x8x128xbf16, #tpu.memory_space<vmem>>, %arg2: memref<9x128x128xbf16, #tpu.memory_space<vmem>>, %arg3: memref<1x128xf32, #tpu.memory_space<vmem>>, %arg4: memref<1x128xf32, #tpu.memory_space<vmem>>, %arg5: memref<64x128xbf16, #tpu.memory_space<vmem>>, %arg6: memref<1x128xf32, #tpu.memory_space<vmem>>, %arg7: memref<1x128xf32, #tpu.memory_space<vmem>>, %arg8: memref<4x10x10x128xf32, #tpu.memory_space<vmem>>, %arg9: memref<64x128xf32, #tpu.memory_space<vmem>>) attributes {dimension_semantics = [#tpu.dimension_semantics<arbitrary>], iteration_bounds = array<i64: 2>, scalar_prefetch = 0 : i64, scratch_operands = 2 : i64, tpu.core_type = #tpu.core_type<tc>, window_params = [{transform_indices = @transform_0, window_bounds = array<i64: 4, 8, 8, 128>}, {pipeline_mode = #tpu.pipeline_mode<synchronous>, transform_indices = @transform_1, window_bounds = array<i64: 9, 128, 128>}, {pipeline_mode = #tpu.pipeline_mode<synchronous>, transform_indices = @transform_2, window_bounds = array<i64: 1, 128>}, {pipeline_mode = #tpu.pipeline_mode<synchronous>, transform_indices = @transform_3, window_bounds = array<i64: 1, 128>}, {transform_indices = @transform_4, window_bounds = array<i64: 64, 128>}, {pipeline_mode = #tpu.pipeline_mode<synchronous>, transform_indices = @transform_5, window_bounds = array<i64: 1, 128>}, {pipeline_mode = #tpu.pipeline_mode<synchronous>, transform_indices = @transform_6, window_bounds = array<i64: 1, 128>}]} {
    %c0_i32 = arith.constant 0 : i32
    %0 = arith.cmpi eq, %arg0, %c0_i32 : i32
    %1 = arith.extui %0 : i1 to i32
    %c0_i32_0 = arith.constant 0 : i32
    %2 = arith.cmpi ne, %1, %c0_i32_0 : i32
    scf.if %2 {
      %cst_134 = arith.constant 0.000000e+00 : f32
      %126 = vector.broadcast %cst_134 : f32 to vector<1x128xf32>
      %c0_135 = arith.constant 0 : index
      %c0_136 = arith.constant 0 : index
      %127 = vector.load %arg6[%c0_135, %c0_136] : memref<1x128xf32, #tpu.memory_space<vmem>>, vector<1x128xf32>
      tpu.vector_store %arg6[%c0_135, %c0_136], %126 {strides = array<i32>} : memref<1x128xf32, #tpu.memory_space<vmem>>, vector<1x128xf32>,
      %cst_137 = arith.constant 0.000000e+00 : f32
      %128 = vector.broadcast %cst_137 : f32 to vector<1x128xf32>
      %c0_138 = arith.constant 0 : index
      %c0_139 = arith.constant 0 : index
      %129 = vector.load %arg7[%c0_138, %c0_139] : memref<1x128xf32, #tpu.memory_space<vmem>>, vector<1x128xf32>
      tpu.vector_store %arg7[%c0_138, %c0_139], %128 {strides = array<i32>} : memref<1x128xf32, #tpu.memory_space<vmem>>, vector<1x128xf32>,
    } else {
    }
    %cst = arith.constant 0.000000e+00 : f32
    %3 = vector.broadcast %cst : f32 to vector<4x10x10x128xf32>
    %c0 = arith.constant 0 : index
    %c0_1 = arith.constant 0 : index
    %c0_2 = arith.constant 0 : index
    %c0_3 = arith.constant 0 : index
    %4 = vector.load %arg8[%c0, %c0_1, %c0_2, %c0_3] : memref<4x10x10x128xf32, #tpu.memory_space<vmem>>, vector<4x10x10x128xf32>
    tpu.vector_store %arg8[%c0, %c0_1, %c0_2, %c0_3], %3 {strides = array<i32>} : memref<4x10x10x128xf32, #tpu.memory_space<vmem>>, vector<4x10x10x128xf32>,
    %c0_4 = arith.constant 0 : index
    %c0_5 = arith.constant 0 : index
    %c0_6 = arith.constant 0 : index
    %c0_7 = arith.constant 0 : index
    %5 = vector.load %arg1[%c0_4, %c0_5, %c0_6, %c0_7] : memref<4x8x8x128xbf16, #tpu.memory_space<vmem>>, vector<4x8x8x128xbf16>
    %6 = arith.extf %5 : vector<4x8x8x128xbf16> to vector<4x8x8x128xf32>
    %c0_8 = arith.constant 0 : index
    %c0_9 = arith.constant 0 : index
    %7 = vector.load %arg3[%c0_8, %c0_9] : memref<1x128xf32, #tpu.memory_space<vmem>>, vector<1x128xf32>
    %8 = vector.shape_cast %7 : vector<1x128xf32> to vector<128xf32>
    %9 = vector.shape_cast %8 : vector<128xf32> to vector<1x1x1x128xf32>
    %10 = vector.broadcast %9 : vector<1x1x1x128xf32> to vector<4x8x8x128xf32>
    %11 = arith.mulf %6, %10 : vector<4x8x8x128xf32>
    %c0_10 = arith.constant 0 : index
    %c0_11 = arith.constant 0 : index
    %12 = vector.load %arg4[%c0_10, %c0_11] : memref<1x128xf32, #tpu.memory_space<vmem>>, vector<1x128xf32>
    %13 = vector.shape_cast %12 : vector<1x128xf32> to vector<128xf32>
    %14 = vector.shape_cast %13 : vector<128xf32> to vector<1x1x1x128xf32>
    %15 = vector.broadcast %14 : vector<1x1x1x128xf32> to vector<4x8x8x128xf32>
    %16 = arith.addf %11, %15 : vector<4x8x8x128xf32>
    %cst_12 = arith.constant 0.000000e+00 : f32
    %17 = vector.broadcast %cst_12 : f32 to vector<4x8x8x128xf32>
    %18 = arith.maximumf %16, %17 : vector<4x8x8x128xf32>
    %c0_13 = arith.constant 0 : index
    %c1 = arith.constant 1 : index
    %c1_14 = arith.constant 1 : index
    %c0_15 = arith.constant 0 : index
    %19 = vector.load %arg8[%c0_13, %c1, %c1_14, %c0_15] : memref<4x10x10x128xf32, #tpu.memory_space<vmem>>, vector<4x8x8x128xf32>
    tpu.vector_store %arg8[%c0_13, %c1, %c1_14, %c0_15], %18 {strides = array<i32>} : memref<4x10x10x128xf32, #tpu.memory_space<vmem>>, vector<4x8x8x128xf32>,
    %cst_16 = arith.constant 0.000000e+00 : f32
    %20 = vector.broadcast %cst_16 : f32 to vector<64x128xf32>
    %c0_17 = arith.constant 0 : index
    %c0_18 = arith.constant 0 : index
    %21 = vector.load %arg9[%c0_17, %c0_18] : memref<64x128xf32, #tpu.memory_space<vmem>>, vector<64x128xf32>
    tpu.vector_store %arg9[%c0_17, %c0_18], %20 {strides = array<i32>} : memref<64x128xf32, #tpu.memory_space<vmem>>, vector<64x128xf32>,
    %c3 = arith.constant 3 : index
    %c0_19 = arith.constant 0 : index
    %c0_20 = arith.constant 0 : index
    %c0_21 = arith.constant 0 : index
    %22 = vector.load %arg8[%c3, %c0_19, %c0_20, %c0_21] : memref<4x10x10x128xf32, #tpu.memory_space<vmem>>, vector<1x8x8x128xf32>
    %23 = vector.shape_cast %22 : vector<1x8x8x128xf32> to vector<8x8x128xf32>
    %24 = vector.shape_cast %23 : vector<8x8x128xf32> to vector<64x128xf32>
    %25 = arith.truncf %24 : vector<64x128xf32> to vector<64x128xbf16>
    %c0_22 = arith.constant 0 : index
    %c0_23 = arith.constant 0 : index
    %26 = vector.load %arg9[%c0_22, %c0_23] : memref<64x128xf32, #tpu.memory_space<vmem>>, vector<64x128xf32>
    %c0_24 = arith.constant 0 : index
    %c0_25 = arith.constant 0 : index
    %c0_26 = arith.constant 0 : index
    %27 = vector.load %arg2[%c0_24, %c0_25, %c0_26] : memref<9x128x128xbf16, #tpu.memory_space<vmem>>, vector<1x128x128xbf16>
    %28 = vector.shape_cast %27 : vector<1x128x128xbf16> to vector<128x128xbf16>
    %cst_27 = arith.constant dense<0.000000e+00> : vector<64x128xf32>
    %29 = tpu.matmul %25, %28, %cst_27 {dimension_numbers = #tpu.dot_dimension_numbers<[1], [0], [0], [1], [0, 0, 1, 1], [], []>} : vector<64x128xbf16>, vector<128x128xbf16>, vector<64x128xf32> -> vector<64x128xf32>
    %30 = arith.addf %26, %29 : vector<64x128xf32>
    %c0_28 = arith.constant 0 : index
    %c0_29 = arith.constant 0 : index
    %31 = vector.load %arg9[%c0_28, %c0_29] : memref<64x128xf32, #tpu.memory_space<vmem>>, vector<64x128xf32>
    tpu.vector_store %arg9[%c0_28, %c0_29], %30 {strides = array<i32>} : memref<64x128xf32, #tpu.memory_space<vmem>>, vector<64x128xf32>,
    %c2 = arith.constant 2 : index
    %c0_30 = arith.constant 0 : index
    %c1_31 = arith.constant 1 : index
    %c0_32 = arith.constant 0 : index
    %32 = vector.load %arg8[%c2, %c0_30, %c1_31, %c0_32] : memref<4x10x10x128xf32, #tpu.memory_space<vmem>>, vector<1x8x8x128xf32>
    %33 = vector.shape_cast %32 : vector<1x8x8x128xf32> to vector<8x8x128xf32>
    %34 = vector.shape_cast %33 : vector<8x8x128xf32> to vector<64x128xf32>
    %35 = arith.truncf %34 : vector<64x128xf32> to vector<64x128xbf16>
    %c0_33 = arith.constant 0 : index
    %c0_34 = arith.constant 0 : index
    %36 = vector.load %arg9[%c0_33, %c0_34] : memref<64x128xf32, #tpu.memory_space<vmem>>, vector<64x128xf32>
    %c1_35 = arith.constant 1 : index
    %c0_36 = arith.constant 0 : index
    %c0_37 = arith.constant 0 : index
    %37 = vector.load %arg2[%c1_35, %c0_36, %c0_37] : memref<9x128x128xbf16, #tpu.memory_space<vmem>>, vector<1x128x128xbf16>
    %38 = vector.shape_cast %37 : vector<1x128x128xbf16> to vector<128x128xbf16>
    %cst_38 = arith.constant dense<0.000000e+00> : vector<64x128xf32>
    %39 = tpu.matmul %35, %38, %cst_38 {dimension_numbers = #tpu.dot_dimension_numbers<[1], [0], [0], [1], [0, 0, 1, 1], [], []>} : vector<64x128xbf16>, vector<128x128xbf16>, vector<64x128xf32> -> vector<64x128xf32>
    %40 = arith.addf %36, %39 : vector<64x128xf32>
    %c0_39 = arith.constant 0 : index
    %c0_40 = arith.constant 0 : index
    %41 = vector.load %arg9[%c0_39, %c0_40] : memref<64x128xf32, #tpu.memory_space<vmem>>, vector<64x128xf32>
    tpu.vector_store %arg9[%c0_39, %c0_40], %40 {strides = array<i32>} : memref<64x128xf32, #tpu.memory_space<vmem>>, vector<64x128xf32>,
    %c3_41 = arith.constant 3 : index
    %c0_42 = arith.constant 0 : index
    %c1_43 = arith.constant 1 : index
    %c0_44 = arith.constant 0 : index
    %42 = vector.load %arg8[%c3_41, %c0_42, %c1_43, %c0_44] : memref<4x10x10x128xf32, #tpu.memory_space<vmem>>, vector<1x8x8x128xf32>
    %43 = vector.shape_cast %42 : vector<1x8x8x128xf32> to vector<8x8x128xf32>
    %44 = vector.shape_cast %43 : vector<8x8x128xf32> to vector<64x128xf32>
    %45 = arith.truncf %44 : vector<64x128xf32> to vector<64x128xbf16>
    %c0_45 = arith.constant 0 : index
    %c0_46 = arith.constant 0 : index
    %46 = vector.load %arg9[%c0_45, %c0_46] : memref<64x128xf32, #tpu.memory_space<vmem>>, vector<64x128xf32>
    %c2_47 = arith.constant 2 : index
    %c0_48 = arith.constant 0 : index
    %c0_49 = arith.constant 0 : index
    %47 = vector.load %arg2[%c2_47, %c0_48, %c0_49] : memref<9x128x128xbf16, #tpu.memory_space<vmem>>, vector<1x128x128xbf16>
    %48 = vector.shape_cast %47 : vector<1x128x128xbf16> to vector<128x128xbf16>
    %cst_50 = arith.constant dense<0.000000e+00> : vector<64x128xf32>
    %49 = tpu.matmul %45, %48, %cst_50 {dimension_numbers = #tpu.dot_dimension_numbers<[1], [0], [0], [1], [0, 0, 1, 1], [], []>} : vector<64x128xbf16>, vector<128x128xbf16>, vector<64x128xf32> -> vector<64x128xf32>
    %50 = arith.addf %46, %49 : vector<64x128xf32>
    %c0_51 = arith.constant 0 : index
    %c0_52 = arith.constant 0 : index
    %51 = vector.load %arg9[%c0_51, %c0_52] : memref<64x128xf32, #tpu.memory_space<vmem>>, vector<64x128xf32>
    tpu.vector_store %arg9[%c0_51, %c0_52], %50 {strides = array<i32>} : memref<64x128xf32, #tpu.memory_space<vmem>>, vector<64x128xf32>,
    %c1_53 = arith.constant 1 : index
    %c1_54 = arith.constant 1 : index
    %c0_55 = arith.constant 0 : index
    %c0_56 = arith.constant 0 : index
    %52 = vector.load %arg8[%c1_53, %c1_54, %c0_55, %c0_56] : memref<4x10x10x128xf32, #tpu.memory_space<vmem>>, vector<1x8x8x128xf32>
    %53 = vector.shape_cast %52 : vector<1x8x8x128xf32> to vector<8x8x128xf32>
    %54 = vector.shape_cast %53 : vector<8x8x128xf32> to vector<64x128xf32>
    %55 = arith.truncf %54 : vector<64x128xf32> to vector<64x128xbf16>
    %c0_57 = arith.constant 0 : index
    %c0_58 = arith.constant 0 : index
    %56 = vector.load %arg9[%c0_57, %c0_58] : memref<64x128xf32, #tpu.memory_space<vmem>>, vector<64x128xf32>
    %c3_59 = arith.constant 3 : index
    %c0_60 = arith.constant 0 : index
    %c0_61 = arith.constant 0 : index
    %57 = vector.load %arg2[%c3_59, %c0_60, %c0_61] : memref<9x128x128xbf16, #tpu.memory_space<vmem>>, vector<1x128x128xbf16>
    %58 = vector.shape_cast %57 : vector<1x128x128xbf16> to vector<128x128xbf16>
    %cst_62 = arith.constant dense<0.000000e+00> : vector<64x128xf32>
    %59 = tpu.matmul %55, %58, %cst_62 {dimension_numbers = #tpu.dot_dimension_numbers<[1], [0], [0], [1], [0, 0, 1, 1], [], []>} : vector<64x128xbf16>, vector<128x128xbf16>, vector<64x128xf32> -> vector<64x128xf32>
    %60 = arith.addf %56, %59 : vector<64x128xf32>
    %c0_63 = arith.constant 0 : index
    %c0_64 = arith.constant 0 : index
    %61 = vector.load %arg9[%c0_63, %c0_64] : memref<64x128xf32, #tpu.memory_space<vmem>>, vector<64x128xf32>
    tpu.vector_store %arg9[%c0_63, %c0_64], %60 {strides = array<i32>} : memref<64x128xf32, #tpu.memory_space<vmem>>, vector<64x128xf32>,
    %c0_65 = arith.constant 0 : index
    %c1_66 = arith.constant 1 : index
    %c1_67 = arith.constant 1 : index
    %c0_68 = arith.constant 0 : index
    %62 = vector.load %arg8[%c0_65, %c1_66, %c1_67, %c0_68] : memref<4x10x10x128xf32, #tpu.memory_space<vmem>>, vector<1x8x8x128xf32>
    %63 = vector.shape_cast %62 : vector<1x8x8x128xf32> to vector<8x8x128xf32>
    %64 = vector.shape_cast %63 : vector<8x8x128xf32> to vector<64x128xf32>
    %65 = arith.truncf %64 : vector<64x128xf32> to vector<64x128xbf16>
    %c0_69 = arith.constant 0 : index
    %c0_70 = arith.constant 0 : index
    %66 = vector.load %arg9[%c0_69, %c0_70] : memref<64x128xf32, #tpu.memory_space<vmem>>, vector<64x128xf32>
    %c4 = arith.constant 4 : index
    %c0_71 = arith.constant 0 : index
    %c0_72 = arith.constant 0 : index
    %67 = vector.load %arg2[%c4, %c0_71, %c0_72] : memref<9x128x128xbf16, #tpu.memory_space<vmem>>, vector<1x128x128xbf16>
    %68 = vector.shape_cast %67 : vector<1x128x128xbf16> to vector<128x128xbf16>
    %cst_73 = arith.constant dense<0.000000e+00> : vector<64x128xf32>
    %69 = tpu.matmul %65, %68, %cst_73 {dimension_numbers = #tpu.dot_dimension_numbers<[1], [0], [0], [1], [0, 0, 1, 1], [], []>} : vector<64x128xbf16>, vector<128x128xbf16>, vector<64x128xf32> -> vector<64x128xf32>
    %70 = arith.addf %66, %69 : vector<64x128xf32>
    %c0_74 = arith.constant 0 : index
    %c0_75 = arith.constant 0 : index
    %71 = vector.load %arg9[%c0_74, %c0_75] : memref<64x128xf32, #tpu.memory_space<vmem>>, vector<64x128xf32>
    tpu.vector_store %arg9[%c0_74, %c0_75], %70 {strides = array<i32>} : memref<64x128xf32, #tpu.memory_space<vmem>>, vector<64x128xf32>,
    %c1_76 = arith.constant 1 : index
    %c1_77 = arith.constant 1 : index
    %c1_78 = arith.constant 1 : index
    %c0_79 = arith.constant 0 : index
    %72 = vector.load %arg8[%c1_76, %c1_77, %c1_78, %c0_79] : memref<4x10x10x128xf32, #tpu.memory_space<vmem>>, vector<1x8x8x128xf32>
    %73 = vector.shape_cast %72 : vector<1x8x8x128xf32> to vector<8x8x128xf32>
    %74 = vector.shape_cast %73 : vector<8x8x128xf32> to vector<64x128xf32>
    %75 = arith.truncf %74 : vector<64x128xf32> to vector<64x128xbf16>
    %c0_80 = arith.constant 0 : index
    %c0_81 = arith.constant 0 : index
    %76 = vector.load %arg9[%c0_80, %c0_81] : memref<64x128xf32, #tpu.memory_space<vmem>>, vector<64x128xf32>
    %c5 = arith.constant 5 : index
    %c0_82 = arith.constant 0 : index
    %c0_83 = arith.constant 0 : index
    %77 = vector.load %arg2[%c5, %c0_82, %c0_83] : memref<9x128x128xbf16, #tpu.memory_space<vmem>>, vector<1x128x128xbf16>
    %78 = vector.shape_cast %77 : vector<1x128x128xbf16> to vector<128x128xbf16>
    %cst_84 = arith.constant dense<0.000000e+00> : vector<64x128xf32>
    %79 = tpu.matmul %75, %78, %cst_84 {dimension_numbers = #tpu.dot_dimension_numbers<[1], [0], [0], [1], [0, 0, 1, 1], [], []>} : vector<64x128xbf16>, vector<128x128xbf16>, vector<64x128xf32> -> vector<64x128xf32>
    %80 = arith.addf %76, %79 : vector<64x128xf32>
    %c0_85 = arith.constant 0 : index
    %c0_86 = arith.constant 0 : index
    %81 = vector.load %arg9[%c0_85, %c0_86] : memref<64x128xf32, #tpu.memory_space<vmem>>, vector<64x128xf32>
    tpu.vector_store %arg9[%c0_85, %c0_86], %80 {strides = array<i32>} : memref<64x128xf32, #tpu.memory_space<vmem>>, vector<64x128xf32>,
    %c3_87 = arith.constant 3 : index
    %c1_88 = arith.constant 1 : index
    %c0_89 = arith.constant 0 : index
    %c0_90 = arith.constant 0 : index
    %82 = vector.load %arg8[%c3_87, %c1_88, %c0_89, %c0_90] : memref<4x10x10x128xf32, #tpu.memory_space<vmem>>, vector<1x8x8x128xf32>
    %83 = vector.shape_cast %82 : vector<1x8x8x128xf32> to vector<8x8x128xf32>
    %84 = vector.shape_cast %83 : vector<8x8x128xf32> to vector<64x128xf32>
    %85 = arith.truncf %84 : vector<64x128xf32> to vector<64x128xbf16>
    %c0_91 = arith.constant 0 : index
    %c0_92 = arith.constant 0 : index
    %86 = vector.load %arg9[%c0_91, %c0_92] : memref<64x128xf32, #tpu.memory_space<vmem>>, vector<64x128xf32>
    %c6 = arith.constant 6 : index
    %c0_93 = arith.constant 0 : index
    %c0_94 = arith.constant 0 : index
    %87 = vector.load %arg2[%c6, %c0_93, %c0_94] : memref<9x128x128xbf16, #tpu.memory_space<vmem>>, vector<1x128x128xbf16>
    %88 = vector.shape_cast %87 : vector<1x128x128xbf16> to vector<128x128xbf16>
    %cst_95 = arith.constant dense<0.000000e+00> : vector<64x128xf32>
    %89 = tpu.matmul %85, %88, %cst_95 {dimension_numbers = #tpu.dot_dimension_numbers<[1], [0], [0], [1], [0, 0, 1, 1], [], []>} : vector<64x128xbf16>, vector<128x128xbf16>, vector<64x128xf32> -> vector<64x128xf32>
    %90 = arith.addf %86, %89 : vector<64x128xf32>
    %c0_96 = arith.constant 0 : index
    %c0_97 = arith.constant 0 : index
    %91 = vector.load %arg9[%c0_96, %c0_97] : memref<64x128xf32, #tpu.memory_space<vmem>>, vector<64x128xf32>
    tpu.vector_store %arg9[%c0_96, %c0_97], %90 {strides = array<i32>} : memref<64x128xf32, #tpu.memory_space<vmem>>, vector<64x128xf32>,
    %c2_98 = arith.constant 2 : index
    %c1_99 = arith.constant 1 : index
    %c1_100 = arith.constant 1 : index
    %c0_101 = arith.constant 0 : index
    %92 = vector.load %arg8[%c2_98, %c1_99, %c1_100, %c0_101] : memref<4x10x10x128xf32, #tpu.memory_space<vmem>>, vector<1x8x8x128xf32>
    %93 = vector.shape_cast %92 : vector<1x8x8x128xf32> to vector<8x8x128xf32>
    %94 = vector.shape_cast %93 : vector<8x8x128xf32> to vector<64x128xf32>
    %95 = arith.truncf %94 : vector<64x128xf32> to vector<64x128xbf16>
    %c0_102 = arith.constant 0 : index
    %c0_103 = arith.constant 0 : index
    %96 = vector.load %arg9[%c0_102, %c0_103] : memref<64x128xf32, #tpu.memory_space<vmem>>, vector<64x128xf32>
    %c7 = arith.constant 7 : index
    %c0_104 = arith.constant 0 : index
    %c0_105 = arith.constant 0 : index
    %97 = vector.load %arg2[%c7, %c0_104, %c0_105] : memref<9x128x128xbf16, #tpu.memory_space<vmem>>, vector<1x128x128xbf16>
    %98 = vector.shape_cast %97 : vector<1x128x128xbf16> to vector<128x128xbf16>
    %cst_106 = arith.constant dense<0.000000e+00> : vector<64x128xf32>
    %99 = tpu.matmul %95, %98, %cst_106 {dimension_numbers = #tpu.dot_dimension_numbers<[1], [0], [0], [1], [0, 0, 1, 1], [], []>} : vector<64x128xbf16>, vector<128x128xbf16>, vector<64x128xf32> -> vector<64x128xf32>
    %100 = arith.addf %96, %99 : vector<64x128xf32>
    %c0_107 = arith.constant 0 : index
    %c0_108 = arith.constant 0 : index
    %101 = vector.load %arg9[%c0_107, %c0_108] : memref<64x128xf32, #tpu.memory_space<vmem>>, vector<64x128xf32>
    tpu.vector_store %arg9[%c0_107, %c0_108], %100 {strides = array<i32>} : memref<64x128xf32, #tpu.memory_space<vmem>>, vector<64x128xf32>,
    %c3_109 = arith.constant 3 : index
    %c1_110 = arith.constant 1 : index
    %c1_111 = arith.constant 1 : index
    %c0_112 = arith.constant 0 : index
    %102 = vector.load %arg8[%c3_109, %c1_110, %c1_111, %c0_112] : memref<4x10x10x128xf32, #tpu.memory_space<vmem>>, vector<1x8x8x128xf32>
    %103 = vector.shape_cast %102 : vector<1x8x8x128xf32> to vector<8x8x128xf32>
    %104 = vector.shape_cast %103 : vector<8x8x128xf32> to vector<64x128xf32>
    %105 = arith.truncf %104 : vector<64x128xf32> to vector<64x128xbf16>
    %c0_113 = arith.constant 0 : index
    %c0_114 = arith.constant 0 : index
    %106 = vector.load %arg9[%c0_113, %c0_114] : memref<64x128xf32, #tpu.memory_space<vmem>>, vector<64x128xf32>
    %c8 = arith.constant 8 : index
    %c0_115 = arith.constant 0 : index
    %c0_116 = arith.constant 0 : index
    %107 = vector.load %arg2[%c8, %c0_115, %c0_116] : memref<9x128x128xbf16, #tpu.memory_space<vmem>>, vector<1x128x128xbf16>
    %108 = vector.shape_cast %107 : vector<1x128x128xbf16> to vector<128x128xbf16>
    %cst_117 = arith.constant dense<0.000000e+00> : vector<64x128xf32>
    %109 = tpu.matmul %105, %108, %cst_117 {dimension_numbers = #tpu.dot_dimension_numbers<[1], [0], [0], [1], [0, 0, 1, 1], [], []>} : vector<64x128xbf16>, vector<128x128xbf16>, vector<64x128xf32> -> vector<64x128xf32>
    %110 = arith.addf %106, %109 : vector<64x128xf32>
    %c0_118 = arith.constant 0 : index
    %c0_119 = arith.constant 0 : index
    %111 = vector.load %arg9[%c0_118, %c0_119] : memref<64x128xf32, #tpu.memory_space<vmem>>, vector<64x128xf32>
    tpu.vector_store %arg9[%c0_118, %c0_119], %110 {strides = array<i32>} : memref<64x128xf32, #tpu.memory_space<vmem>>, vector<64x128xf32>,
    %c0_120 = arith.constant 0 : index
    %c0_121 = arith.constant 0 : index
    %112 = vector.load %arg9[%c0_120, %c0_121] : memref<64x128xf32, #tpu.memory_space<vmem>>, vector<64x128xf32>
    %113 = arith.truncf %112 : vector<64x128xf32> to vector<64x128xbf16>
    %c0_122 = arith.constant 0 : index
    %c0_123 = arith.constant 0 : index
    %114 = vector.load %arg5[%c0_122, %c0_123] : memref<64x128xbf16, #tpu.memory_space<vmem>>, vector<64x128xbf16>
    tpu.vector_store %arg5[%c0_122, %c0_123], %113 {strides = array<i32>} : memref<64x128xbf16, #tpu.memory_space<vmem>>, vector<64x128xbf16>,
    %c0_124 = arith.constant 0 : index
    %c0_125 = arith.constant 0 : index
    %115 = vector.load %arg6[%c0_124, %c0_125] : memref<1x128xf32, #tpu.memory_space<vmem>>, vector<1x128xf32>
    %cst_126 = arith.constant dense<0.000000e+00> : vector<128xf32>
    %116 = vector.multi_reduction <add>, %112, %cst_126 [0] : vector<64x128xf32> to vector<128xf32>
    %117 = vector.shape_cast %116 : vector<128xf32> to vector<1x128xf32>
    %118 = arith.addf %115, %117 : vector<1x128xf32>
    %c0_127 = arith.constant 0 : index
    %c0_128 = arith.constant 0 : index
    %119 = vector.load %arg6[%c0_127, %c0_128] : memref<1x128xf32, #tpu.memory_space<vmem>>, vector<1x128xf32>
    tpu.vector_store %arg6[%c0_127, %c0_128], %118 {strides = array<i32>} : memref<1x128xf32, #tpu.memory_space<vmem>>, vector<1x128xf32>,
    %c0_129 = arith.constant 0 : index
    %c0_130 = arith.constant 0 : index
    %120 = vector.load %arg7[%c0_129, %c0_130] : memref<1x128xf32, #tpu.memory_space<vmem>>, vector<1x128xf32>
    %121 = arith.mulf %112, %112 : vector<64x128xf32>
    %cst_131 = arith.constant dense<0.000000e+00> : vector<128xf32>
    %122 = vector.multi_reduction <add>, %121, %cst_131 [0] : vector<64x128xf32> to vector<128xf32>
    %123 = vector.shape_cast %122 : vector<128xf32> to vector<1x128xf32>
    %124 = arith.addf %120, %123 : vector<1x128xf32>
    %c0_132 = arith.constant 0 : index
    %c0_133 = arith.constant 0 : index
    %125 = vector.load %arg7[%c0_132, %c0_133] : memref<1x128xf32, #tpu.memory_space<vmem>>, vector<1x128xf32>
    tpu.vector_store %arg7[%c0_132, %c0_133], %124 {strides = array<i32>} : memref<1x128xf32, #tpu.memory_space<vmem>>, vector<1x128xf32>,
    return
  }
  func.func @transform_0(%arg0: i32) -> (i32, i32, i32, i32) {
    %c0_i32 = arith.constant 0 : i32
    %c0_i32_0 = arith.constant 0 : i32
    %c0_i32_1 = arith.constant 0 : i32
    %c0_i32_2 = arith.constant 0 : i32
    return %arg0, %c0_i32, %c0_i32_0, %c0_i32_1 : i32, i32, i32, i32
  }
  func.func @transform_1(%arg0: i32) -> (i32, i32, i32) {
    %c0_i32 = arith.constant 0 : i32
    %c0_i32_0 = arith.constant 0 : i32
    %c0_i32_1 = arith.constant 0 : i32
    %c0_i32_2 = arith.constant 0 : i32
    return %c0_i32, %c0_i32_0, %c0_i32_1 : i32, i32, i32
  }
  func.func @transform_2(%arg0: i32) -> (i32, i32) {
    %c0_i32 = arith.constant 0 : i32
    %c0_i32_0 = arith.constant 0 : i32
    %c0_i32_1 = arith.constant 0 : i32
    return %c0_i32, %c0_i32_0 : i32, i32
  }
  func.func @transform_3(%arg0: i32) -> (i32, i32) {
    %c0_i32 = arith.constant 0 : i32
    %c0_i32_0 = arith.constant 0 : i32
    %c0_i32_1 = arith.constant 0 : i32
    return %c0_i32, %c0_i32_0 : i32, i32
  }
  func.func @transform_4(%arg0: i32) -> (i32, i32) {
    %c0_i32 = arith.constant 0 : i32
    %c0_i32_0 = arith.constant 0 : i32
    return %arg0, %c0_i32 : i32, i32
  }
  func.func @transform_5(%arg0: i32) -> (i32, i32) {
    %c0_i32 = arith.constant 0 : i32
    %c0_i32_0 = arith.constant 0 : i32
    %c0_i32_1 = arith.constant 0 : i32
    return %c0_i32, %c0_i32_0 : i32, i32
  }
  func.func @transform_6(%arg0: i32) -> (i32, i32) {
    %c0_i32 = arith.constant 0 : i32
    %c0_i32_0 = arith.constant 0 : i32
    %c0_i32_1 = arith.constant 0 : i32
    return %c0_i32, %c0_i32_0 : i32, i32
  }
}

module attributes {stable_mosaic.version = 11 : i64} {
  func.func @_k_conv3_sc(%arg0: i32, %arg1: memref<64x128xbf16, #tpu.memory_space<vmem>>, %arg2: memref<128x128xbf16, #tpu.memory_space<vmem>>, %arg3: memref<1x128xf32, #tpu.memory_space<vmem>>, %arg4: memref<1x128xf32, #tpu.memory_space<vmem>>, %arg5: memref<64x128xbf16, #tpu.memory_space<vmem>>, %arg6: memref<128x128xbf16, #tpu.memory_space<vmem>>, %arg7: memref<64x128xbf16, #tpu.memory_space<vmem>>, %arg8: memref<64x128xbf16, #tpu.memory_space<vmem>>, %arg9: memref<1x1x128xf32, #tpu.memory_space<vmem>>, %arg10: memref<1x128xf32, #tpu.memory_space<vmem>>, %arg11: memref<1x128xf32, #tpu.memory_space<vmem>>, %arg12: memref<1x128xf32, #tpu.memory_space<vmem>>, %arg13: memref<1x128xf32, #tpu.memory_space<vmem>>) attributes {dimension_semantics = [#tpu.dimension_semantics<arbitrary>], iteration_bounds = array<i64: 2>, scalar_prefetch = 0 : i64, scratch_operands = 0 : i64, tpu.core_type = #tpu.core_type<tc>, window_params = [{transform_indices = @transform_0, window_bounds = array<i64: 64, 128>}, {pipeline_mode = #tpu.pipeline_mode<synchronous>, transform_indices = @transform_1, window_bounds = array<i64: 128, 128>}, {pipeline_mode = #tpu.pipeline_mode<synchronous>, transform_indices = @transform_2, window_bounds = array<i64: 1, 128>}, {pipeline_mode = #tpu.pipeline_mode<synchronous>, transform_indices = @transform_3, window_bounds = array<i64: 1, 128>}, {transform_indices = @transform_4, window_bounds = array<i64: 64, 128>}, {pipeline_mode = #tpu.pipeline_mode<synchronous>, transform_indices = @transform_5, window_bounds = array<i64: 128, 128>}, {transform_indices = @transform_6, window_bounds = array<i64: 64, 128>}, {transform_indices = @transform_7, window_bounds = array<i64: 64, 128>}, {transform_indices = @transform_8, window_bounds = array<i64: 1, 1, 128>}, {pipeline_mode = #tpu.pipeline_mode<synchronous>, transform_indices = @transform_9, window_bounds = array<i64: 1, 128>}, {pipeline_mode = #tpu.pipeline_mode<synchronous>, transform_indices = @transform_10, window_bounds = array<i64: 1, 128>}, {pipeline_mode = #tpu.pipeline_mode<synchronous>, transform_indices = @transform_11, window_bounds = array<i64: 1, 128>}, {pipeline_mode = #tpu.pipeline_mode<synchronous>, transform_indices = @transform_12, window_bounds = array<i64: 1, 128>}]} {
    %c0_i32 = arith.constant 0 : i32
    %0 = arith.cmpi eq, %arg0, %c0_i32 : i32
    %1 = arith.extui %0 : i1 to i32
    %c0_i32_0 = arith.constant 0 : i32
    %2 = arith.cmpi ne, %1, %c0_i32_0 : i32
    scf.if %2 {
      %cst_42 = arith.constant 0.000000e+00 : f32
      %50 = vector.broadcast %cst_42 : f32 to vector<1x128xf32>
      %c0_43 = arith.constant 0 : index
      %c0_44 = arith.constant 0 : index
      %51 = vector.load %arg10[%c0_43, %c0_44] : memref<1x128xf32, #tpu.memory_space<vmem>>, vector<1x128xf32>
      tpu.vector_store %arg10[%c0_43, %c0_44], %50 {strides = array<i32>} : memref<1x128xf32, #tpu.memory_space<vmem>>, vector<1x128xf32>,
      %cst_45 = arith.constant 0.000000e+00 : f32
      %52 = vector.broadcast %cst_45 : f32 to vector<1x128xf32>
      %c0_46 = arith.constant 0 : index
      %c0_47 = arith.constant 0 : index
      %53 = vector.load %arg11[%c0_46, %c0_47] : memref<1x128xf32, #tpu.memory_space<vmem>>, vector<1x128xf32>
      tpu.vector_store %arg11[%c0_46, %c0_47], %52 {strides = array<i32>} : memref<1x128xf32, #tpu.memory_space<vmem>>, vector<1x128xf32>,
      %cst_48 = arith.constant 0.000000e+00 : f32
      %54 = vector.broadcast %cst_48 : f32 to vector<1x128xf32>
      %c0_49 = arith.constant 0 : index
      %c0_50 = arith.constant 0 : index
      %55 = vector.load %arg12[%c0_49, %c0_50] : memref<1x128xf32, #tpu.memory_space<vmem>>, vector<1x128xf32>
      tpu.vector_store %arg12[%c0_49, %c0_50], %54 {strides = array<i32>} : memref<1x128xf32, #tpu.memory_space<vmem>>, vector<1x128xf32>,
      %cst_51 = arith.constant 0.000000e+00 : f32
      %56 = vector.broadcast %cst_51 : f32 to vector<1x128xf32>
      %c0_52 = arith.constant 0 : index
      %c0_53 = arith.constant 0 : index
      %57 = vector.load %arg13[%c0_52, %c0_53] : memref<1x128xf32, #tpu.memory_space<vmem>>, vector<1x128xf32>
      tpu.vector_store %arg13[%c0_52, %c0_53], %56 {strides = array<i32>} : memref<1x128xf32, #tpu.memory_space<vmem>>, vector<1x128xf32>,
    } else {
    }
    %c0 = arith.constant 0 : index
    %c0_1 = arith.constant 0 : index
    %3 = vector.load %arg1[%c0, %c0_1] : memref<64x128xbf16, #tpu.memory_space<vmem>>, vector<64x128xbf16>
    %4 = arith.extf %3 : vector<64x128xbf16> to vector<64x128xf32>
    %c0_2 = arith.constant 0 : index
    %c0_3 = arith.constant 0 : index
    %5 = vector.load %arg3[%c0_2, %c0_3] : memref<1x128xf32, #tpu.memory_space<vmem>>, vector<1x128xf32>
    %6 = vector.broadcast %5 : vector<1x128xf32> to vector<64x128xf32>
    %7 = arith.mulf %4, %6 : vector<64x128xf32>
    %c0_4 = arith.constant 0 : index
    %c0_5 = arith.constant 0 : index
    %8 = vector.load %arg4[%c0_4, %c0_5] : memref<1x128xf32, #tpu.memory_space<vmem>>, vector<1x128xf32>
    %9 = vector.broadcast %8 : vector<1x128xf32> to vector<64x128xf32>
    %10 = arith.addf %7, %9 : vector<64x128xf32>
    %cst = arith.constant 0.000000e+00 : f32
    %11 = vector.broadcast %cst : f32 to vector<64x128xf32>
    %12 = arith.maximumf %10, %11 : vector<64x128xf32>
    %13 = arith.truncf %12 : vector<64x128xf32> to vector<64x128xbf16>
    %c0_6 = arith.constant 0 : index
    %c0_7 = arith.constant 0 : index
    %14 = vector.load %arg2[%c0_6, %c0_7] : memref<128x128xbf16, #tpu.memory_space<vmem>>, vector<128x128xbf16>
    %cst_8 = arith.constant dense<0.000000e+00> : vector<64x128xf32>
    %15 = tpu.matmul %13, %14, %cst_8 {dimension_numbers = #tpu.dot_dimension_numbers<[1], [0], [0], [1], [0, 0, 1, 1], [], []>} : vector<64x128xbf16>, vector<128x128xbf16>, vector<64x128xf32> -> vector<64x128xf32>
    %c0_9 = arith.constant 0 : index
    %c0_10 = arith.constant 0 : index
    %16 = vector.load %arg5[%c0_9, %c0_10] : memref<64x128xbf16, #tpu.memory_space<vmem>>, vector<64x128xbf16>
    %c0_11 = arith.constant 0 : index
    %c0_12 = arith.constant 0 : index
    %17 = vector.load %arg6[%c0_11, %c0_12] : memref<128x128xbf16, #tpu.memory_space<vmem>>, vector<128x128xbf16>
    %cst_13 = arith.constant dense<0.000000e+00> : vector<64x128xf32>
    %18 = tpu.matmul %16, %17, %cst_13 {dimension_numbers = #tpu.dot_dimension_numbers<[1], [0], [0], [1], [0, 0, 1, 1], [], []>} : vector<64x128xbf16>, vector<128x128xbf16>, vector<64x128xf32> -> vector<64x128xf32>
    %19 = arith.truncf %15 : vector<64x128xf32> to vector<64x128xbf16>
    %c0_14 = arith.constant 0 : index
    %c0_15 = arith.constant 0 : index
    %20 = vector.load %arg7[%c0_14, %c0_15] : memref<64x128xbf16, #tpu.memory_space<vmem>>, vector<64x128xbf16>
    tpu.vector_store %arg7[%c0_14, %c0_15], %19 {strides = array<i32>} : memref<64x128xbf16, #tpu.memory_space<vmem>>, vector<64x128xbf16>,
    %21 = arith.truncf %18 : vector<64x128xf32> to vector<64x128xbf16>
    %c0_16 = arith.constant 0 : index
    %c0_17 = arith.constant 0 : index
    %22 = vector.load %arg8[%c0_16, %c0_17] : memref<64x128xbf16, #tpu.memory_space<vmem>>, vector<64x128xbf16>
    tpu.vector_store %arg8[%c0_16, %c0_17], %21 {strides = array<i32>} : memref<64x128xbf16, #tpu.memory_space<vmem>>, vector<64x128xbf16>,
    %cst_18 = arith.constant dense<0.000000e+00> : vector<128xf32>
    %23 = vector.multi_reduction <add>, %15, %cst_18 [0] : vector<64x128xf32> to vector<128xf32>
    %24 = vector.shape_cast %23 : vector<128xf32> to vector<1x128xf32>
    %c0_19 = arith.constant 0 : index
    %c0_20 = arith.constant 0 : index
    %c0_21 = arith.constant 0 : index
    %25 = vector.load %arg9[%c0_19, %c0_20, %c0_21] : memref<1x1x128xf32, #tpu.memory_space<vmem>>, vector<1x1x128xf32>
    %26 = vector.shape_cast %25 : vector<1x1x128xf32> to vector<1x128xf32>
    %27 = vector.shape_cast %24 : vector<1x128xf32> to vector<1x1x128xf32>
    tpu.vector_store %arg9[%c0_19, %c0_20, %c0_21], %27 {strides = array<i32>} : memref<1x1x128xf32, #tpu.memory_space<vmem>>, vector<1x1x128xf32>,
    %c0_22 = arith.constant 0 : index
    %c0_23 = arith.constant 0 : index
    %28 = vector.load %arg10[%c0_22, %c0_23] : memref<1x128xf32, #tpu.memory_space<vmem>>, vector<1x128xf32>
    %cst_24 = arith.constant dense<0.000000e+00> : vector<128xf32>
    %29 = vector.multi_reduction <add>, %15, %cst_24 [0] : vector<64x128xf32> to vector<128xf32>
    %30 = vector.shape_cast %29 : vector<128xf32> to vector<1x128xf32>
    %31 = arith.addf %28, %30 : vector<1x128xf32>
    %c0_25 = arith.constant 0 : index
    %c0_26 = arith.constant 0 : index
    %32 = vector.load %arg10[%c0_25, %c0_26] : memref<1x128xf32, #tpu.memory_space<vmem>>, vector<1x128xf32>
    tpu.vector_store %arg10[%c0_25, %c0_26], %31 {strides = array<i32>} : memref<1x128xf32, #tpu.memory_space<vmem>>, vector<1x128xf32>,
    %c0_27 = arith.constant 0 : index
    %c0_28 = arith.constant 0 : index
    %33 = vector.load %arg11[%c0_27, %c0_28] : memref<1x128xf32, #tpu.memory_space<vmem>>, vector<1x128xf32>
    %34 = arith.mulf %15, %15 : vector<64x128xf32>
    %cst_29 = arith.constant dense<0.000000e+00> : vector<128xf32>
    %35 = vector.multi_reduction <add>, %34, %cst_29 [0] : vector<64x128xf32> to vector<128xf32>
    %36 = vector.shape_cast %35 : vector<128xf32> to vector<1x128xf32>
    %37 = arith.addf %33, %36 : vector<1x128xf32>
    %c0_30 = arith.constant 0 : index
    %c0_31 = arith.constant 0 : index
    %38 = vector.load %arg11[%c0_30, %c0_31] : memref<1x128xf32, #tpu.memory_space<vmem>>, vector<1x128xf32>
    tpu.vector_store %arg11[%c0_30, %c0_31], %37 {strides = array<i32>} : memref<1x128xf32, #tpu.memory_space<vmem>>, vector<1x128xf32>,
    %c0_32 = arith.constant 0 : index
    %c0_33 = arith.constant 0 : index
    %39 = vector.load %arg12[%c0_32, %c0_33] : memref<1x128xf32, #tpu.memory_space<vmem>>, vector<1x128xf32>
    %cst_34 = arith.constant dense<0.000000e+00> : vector<128xf32>
    %40 = vector.multi_reduction <add>, %18, %cst_34 [0] : vector<64x128xf32> to vector<128xf32>
    %41 = vector.shape_cast %40 : vector<128xf32> to vector<1x128xf32>
    %42 = arith.addf %39, %41 : vector<1x128xf32>
    %c0_35 = arith.constant 0 : index
    %c0_36 = arith.constant 0 : index
    %43 = vector.load %arg12[%c0_35, %c0_36] : memref<1x128xf32, #tpu.memory_space<vmem>>, vector<1x128xf32>
    tpu.vector_store %arg12[%c0_35, %c0_36], %42 {strides = array<i32>} : memref<1x128xf32, #tpu.memory_space<vmem>>, vector<1x128xf32>,
    %c0_37 = arith.constant 0 : index
    %c0_38 = arith.constant 0 : index
    %44 = vector.load %arg13[%c0_37, %c0_38] : memref<1x128xf32, #tpu.memory_space<vmem>>, vector<1x128xf32>
    %45 = arith.mulf %18, %18 : vector<64x128xf32>
    %cst_39 = arith.constant dense<0.000000e+00> : vector<128xf32>
    %46 = vector.multi_reduction <add>, %45, %cst_39 [0] : vector<64x128xf32> to vector<128xf32>
    %47 = vector.shape_cast %46 : vector<128xf32> to vector<1x128xf32>
    %48 = arith.addf %44, %47 : vector<1x128xf32>
    %c0_40 = arith.constant 0 : index
    %c0_41 = arith.constant 0 : index
    %49 = vector.load %arg13[%c0_40, %c0_41] : memref<1x128xf32, #tpu.memory_space<vmem>>, vector<1x128xf32>
    tpu.vector_store %arg13[%c0_40, %c0_41], %48 {strides = array<i32>} : memref<1x128xf32, #tpu.memory_space<vmem>>, vector<1x128xf32>,
    return
  }
  func.func @transform_0(%arg0: i32) -> (i32, i32) {
    %c0_i32 = arith.constant 0 : i32
    %c0_i32_0 = arith.constant 0 : i32
    return %arg0, %c0_i32 : i32, i32
  }
  func.func @transform_1(%arg0: i32) -> (i32, i32) {
    %c0_i32 = arith.constant 0 : i32
    %c0_i32_0 = arith.constant 0 : i32
    %c0_i32_1 = arith.constant 0 : i32
    return %c0_i32, %c0_i32_0 : i32, i32
  }
  func.func @transform_2(%arg0: i32) -> (i32, i32) {
    %c0_i32 = arith.constant 0 : i32
    %c0_i32_0 = arith.constant 0 : i32
    %c0_i32_1 = arith.constant 0 : i32
    return %c0_i32, %c0_i32_0 : i32, i32
  }
  func.func @transform_3(%arg0: i32) -> (i32, i32) {
    %c0_i32 = arith.constant 0 : i32
    %c0_i32_0 = arith.constant 0 : i32
    %c0_i32_1 = arith.constant 0 : i32
    return %c0_i32, %c0_i32_0 : i32, i32
  }
  func.func @transform_4(%arg0: i32) -> (i32, i32) {
    %c0_i32 = arith.constant 0 : i32
    %c0_i32_0 = arith.constant 0 : i32
    return %arg0, %c0_i32 : i32, i32
  }
  func.func @transform_5(%arg0: i32) -> (i32, i32) {
    %c0_i32 = arith.constant 0 : i32
    %c0_i32_0 = arith.constant 0 : i32
    %c0_i32_1 = arith.constant 0 : i32
    return %c0_i32, %c0_i32_0 : i32, i32
  }
  func.func @transform_6(%arg0: i32) -> (i32, i32) {
    %c0_i32 = arith.constant 0 : i32
    %c0_i32_0 = arith.constant 0 : i32
    return %arg0, %c0_i32 : i32, i32
  }
  func.func @transform_7(%arg0: i32) -> (i32, i32) {
    %c0_i32 = arith.constant 0 : i32
    %c0_i32_0 = arith.constant 0 : i32
    return %arg0, %c0_i32 : i32, i32
  }
  func.func @transform_8(%arg0: i32) -> (i32, i32, i32) {
    %c0_i32 = arith.constant 0 : i32
    %c0_i32_0 = arith.constant 0 : i32
    %c0_i32_1 = arith.constant 0 : i32
    return %arg0, %c0_i32, %c0_i32_0 : i32, i32, i32
  }
  func.func @transform_9(%arg0: i32) -> (i32, i32) {
    %c0_i32 = arith.constant 0 : i32
    %c0_i32_0 = arith.constant 0 : i32
    %c0_i32_1 = arith.constant 0 : i32
    return %c0_i32, %c0_i32_0 : i32, i32
  }
  func.func @transform_10(%arg0: i32) -> (i32, i32) {
    %c0_i32 = arith.constant 0 : i32
    %c0_i32_0 = arith.constant 0 : i32
    %c0_i32_1 = arith.constant 0 : i32
    return %c0_i32, %c0_i32_0 : i32, i32
  }
  func.func @transform_11(%arg0: i32) -> (i32, i32) {
    %c0_i32 = arith.constant 0 : i32
    %c0_i32_0 = arith.constant 0 : i32
    %c0_i32_1 = arith.constant 0 : i32
    return %c0_i32, %c0_i32_0 : i32, i32
  }
  func.func @transform_12(%arg0: i32) -> (i32, i32) {
    %c0_i32 = arith.constant 0 : i32
    %c0_i32_0 = arith.constant 0 : i32
    %c0_i32_1 = arith.constant 0 : i32
    return %c0_i32, %c0_i32_0 : i32, i32
  }
}

module attributes {stable_mosaic.version = 11 : i64} {
  func.func @_k_finish(%arg0: i32, %arg1: memref<64x128xbf16, #tpu.memory_space<vmem>>, %arg2: memref<64x128xbf16, #tpu.memory_space<vmem>>, %arg3: memref<1x1x128xf32, #tpu.memory_space<vmem>>, %arg4: memref<1x128xf32, #tpu.memory_space<vmem>>, %arg5: memref<1x128xf32, #tpu.memory_space<vmem>>, %arg6: memref<1x128xf32, #tpu.memory_space<vmem>>, %arg7: memref<1x128xf32, #tpu.memory_space<vmem>>, %arg8: memref<128x128xf32, #tpu.memory_space<vmem>>, %arg9: memref<1x128xf32, #tpu.memory_space<vmem>>, %arg10: memref<128x128xf32, #tpu.memory_space<vmem>>, %arg11: memref<1x128xf32, #tpu.memory_space<vmem>>, %arg12: memref<64x128xf32, #tpu.memory_space<vmem>>) attributes {dimension_semantics = [#tpu.dimension_semantics<parallel>], iteration_bounds = array<i64: 2>, scalar_prefetch = 0 : i64, scratch_operands = 0 : i64, tpu.core_type = #tpu.core_type<tc>, window_params = [{transform_indices = @transform_0, window_bounds = array<i64: 64, 128>}, {transform_indices = @transform_1, window_bounds = array<i64: 64, 128>}, {transform_indices = @transform_2, window_bounds = array<i64: 1, 1, 128>}, {pipeline_mode = #tpu.pipeline_mode<synchronous>, transform_indices = @transform_3, window_bounds = array<i64: 1, 128>}, {pipeline_mode = #tpu.pipeline_mode<synchronous>, transform_indices = @transform_4, window_bounds = array<i64: 1, 128>}, {pipeline_mode = #tpu.pipeline_mode<synchronous>, transform_indices = @transform_5, window_bounds = array<i64: 1, 128>}, {pipeline_mode = #tpu.pipeline_mode<synchronous>, transform_indices = @transform_6, window_bounds = array<i64: 1, 128>}, {pipeline_mode = #tpu.pipeline_mode<synchronous>, transform_indices = @transform_7, window_bounds = array<i64: 128, 128>}, {pipeline_mode = #tpu.pipeline_mode<synchronous>, transform_indices = @transform_8, window_bounds = array<i64: 1, 128>}, {pipeline_mode = #tpu.pipeline_mode<synchronous>, transform_indices = @transform_9, window_bounds = array<i64: 128, 128>}, {pipeline_mode = #tpu.pipeline_mode<synchronous>, transform_indices = @transform_10, window_bounds = array<i64: 1, 128>}, {transform_indices = @transform_11, window_bounds = array<i64: 64, 128>}]} {
    %c0 = arith.constant 0 : index
    %c0_0 = arith.constant 0 : index
    %0 = vector.load %arg1[%c0, %c0_0] : memref<64x128xbf16, #tpu.memory_space<vmem>>, vector<64x128xbf16>
    %1 = arith.extf %0 : vector<64x128xbf16> to vector<64x128xf32>
    %c0_1 = arith.constant 0 : index
    %c0_2 = arith.constant 0 : index
    %2 = vector.load %arg4[%c0_1, %c0_2] : memref<1x128xf32, #tpu.memory_space<vmem>>, vector<1x128xf32>
    %3 = vector.broadcast %2 : vector<1x128xf32> to vector<64x128xf32>
    %4 = arith.mulf %1, %3 : vector<64x128xf32>
    %c0_3 = arith.constant 0 : index
    %c0_4 = arith.constant 0 : index
    %5 = vector.load %arg5[%c0_3, %c0_4] : memref<1x128xf32, #tpu.memory_space<vmem>>, vector<1x128xf32>
    %6 = vector.broadcast %5 : vector<1x128xf32> to vector<64x128xf32>
    %7 = arith.addf %4, %6 : vector<64x128xf32>
    %c0_5 = arith.constant 0 : index
    %c0_6 = arith.constant 0 : index
    %c0_7 = arith.constant 0 : index
    %8 = vector.load %arg3[%c0_5, %c0_6, %c0_7] : memref<1x1x128xf32, #tpu.memory_space<vmem>>, vector<1x1x128xf32>
    %9 = vector.shape_cast %8 : vector<1x1x128xf32> to vector<1x128xf32>
    %cst = arith.constant 1.562500e-02 : f32
    %10 = vector.broadcast %cst : f32 to vector<1x128xf32>
    %11 = arith.mulf %9, %10 : vector<1x128xf32>
    %c0_8 = arith.constant 0 : index
    %c0_9 = arith.constant 0 : index
    %12 = vector.load %arg4[%c0_8, %c0_9] : memref<1x128xf32, #tpu.memory_space<vmem>>, vector<1x128xf32>
    %13 = arith.mulf %11, %12 : vector<1x128xf32>
    %c0_10 = arith.constant 0 : index
    %c0_11 = arith.constant 0 : index
    %14 = vector.load %arg5[%c0_10, %c0_11] : memref<1x128xf32, #tpu.memory_space<vmem>>, vector<1x128xf32>
    %15 = arith.addf %13, %14 : vector<1x128xf32>
    %c0_12 = arith.constant 0 : index
    %c0_13 = arith.constant 0 : index
    %16 = vector.load %arg8[%c0_12, %c0_13] : memref<128x128xf32, #tpu.memory_space<vmem>>, vector<128x128xf32>
    %cst_14 = arith.constant dense<0.000000e+00> : vector<1x128xf32>
    %17 = tpu.matmul %15, %16, %cst_14 {dimension_numbers = #tpu.dot_dimension_numbers<[1], [0], [0], [1], [0, 0, 1, 1], [], []>} : vector<1x128xf32>, vector<128x128xf32>, vector<1x128xf32> -> vector<1x128xf32>
    %c0_15 = arith.constant 0 : index
    %c0_16 = arith.constant 0 : index
    %18 = vector.load %arg9[%c0_15, %c0_16] : memref<1x128xf32, #tpu.memory_space<vmem>>, vector<1x128xf32>
    %19 = arith.addf %17, %18 : vector<1x128xf32>
    %cst_17 = arith.constant 0.000000e+00 : f32
    %20 = vector.broadcast %cst_17 : f32 to vector<1x128xf32>
    %21 = arith.maximumf %19, %20 : vector<1x128xf32>
    %c0_18 = arith.constant 0 : index
    %c0_19 = arith.constant 0 : index
    %22 = vector.load %arg10[%c0_18, %c0_19] : memref<128x128xf32, #tpu.memory_space<vmem>>, vector<128x128xf32>
    %cst_20 = arith.constant dense<0.000000e+00> : vector<1x128xf32>
    %23 = tpu.matmul %21, %22, %cst_20 {dimension_numbers = #tpu.dot_dimension_numbers<[1], [0], [0], [1], [0, 0, 1, 1], [], []>} : vector<1x128xf32>, vector<128x128xf32>, vector<1x128xf32> -> vector<1x128xf32>
    %c0_21 = arith.constant 0 : index
    %c0_22 = arith.constant 0 : index
    %24 = vector.load %arg11[%c0_21, %c0_22] : memref<1x128xf32, #tpu.memory_space<vmem>>, vector<1x128xf32>
    %25 = arith.addf %23, %24 : vector<1x128xf32>
    %cst_23 = arith.constant 0.000000e+00 : f32
    %26 = vector.broadcast %cst_23 : f32 to vector<1x128xf32>
    %27 = arith.subf %26, %25 : vector<1x128xf32>
    %28 = math.exp %27 : vector<1x128xf32>
    %cst_24 = arith.constant 1.000000e+00 : f32
    %29 = vector.broadcast %cst_24 : f32 to vector<1x128xf32>
    %30 = arith.addf %29, %28 : vector<1x128xf32>
    %31 = tpu.reciprocal %30 {approx = true} : vector<1x128xf32> -> vector<1x128xf32>
    %32 = vector.broadcast %31 : vector<1x128xf32> to vector<64x128xf32>
    %33 = arith.mulf %7, %32 : vector<64x128xf32>
    %c0_25 = arith.constant 0 : index
    %c0_26 = arith.constant 0 : index
    %34 = vector.load %arg2[%c0_25, %c0_26] : memref<64x128xbf16, #tpu.memory_space<vmem>>, vector<64x128xbf16>
    %35 = arith.extf %34 : vector<64x128xbf16> to vector<64x128xf32>
    %c0_27 = arith.constant 0 : index
    %c0_28 = arith.constant 0 : index
    %36 = vector.load %arg6[%c0_27, %c0_28] : memref<1x128xf32, #tpu.memory_space<vmem>>, vector<1x128xf32>
    %37 = vector.broadcast %36 : vector<1x128xf32> to vector<64x128xf32>
    %38 = arith.mulf %35, %37 : vector<64x128xf32>
    %c0_29 = arith.constant 0 : index
    %c0_30 = arith.constant 0 : index
    %39 = vector.load %arg7[%c0_29, %c0_30] : memref<1x128xf32, #tpu.memory_space<vmem>>, vector<1x128xf32>
    %40 = vector.broadcast %39 : vector<1x128xf32> to vector<64x128xf32>
    %41 = arith.addf %38, %40 : vector<64x128xf32>
    %42 = arith.addf %33, %41 : vector<64x128xf32>
    %cst_31 = arith.constant 0.000000e+00 : f32
    %43 = vector.broadcast %cst_31 : f32 to vector<64x128xf32>
    %44 = arith.maximumf %42, %43 : vector<64x128xf32>
    %c0_32 = arith.constant 0 : index
    %c0_33 = arith.constant 0 : index
    %45 = vector.load %arg12[%c0_32, %c0_33] : memref<64x128xf32, #tpu.memory_space<vmem>>, vector<64x128xf32>
    tpu.vector_store %arg12[%c0_32, %c0_33], %44 {strides = array<i32>} : memref<64x128xf32, #tpu.memory_space<vmem>>, vector<64x128xf32>,
    return
  }
  func.func @transform_0(%arg0: i32) -> (i32, i32) {
    %c0_i32 = arith.constant 0 : i32
    %c0_i32_0 = arith.constant 0 : i32
    return %arg0, %c0_i32 : i32, i32
  }
  func.func @transform_1(%arg0: i32) -> (i32, i32) {
    %c0_i32 = arith.constant 0 : i32
    %c0_i32_0 = arith.constant 0 : i32
    return %arg0, %c0_i32 : i32, i32
  }
  func.func @transform_2(%arg0: i32) -> (i32, i32, i32) {
    %c0_i32 = arith.constant 0 : i32
    %c0_i32_0 = arith.constant 0 : i32
    %c0_i32_1 = arith.constant 0 : i32
    return %arg0, %c0_i32, %c0_i32_0 : i32, i32, i32
  }
  func.func @transform_3(%arg0: i32) -> (i32, i32) {
    %c0_i32 = arith.constant 0 : i32
    %c0_i32_0 = arith.constant 0 : i32
    %c0_i32_1 = arith.constant 0 : i32
    return %c0_i32, %c0_i32_0 : i32, i32
  }
  func.func @transform_4(%arg0: i32) -> (i32, i32) {
    %c0_i32 = arith.constant 0 : i32
    %c0_i32_0 = arith.constant 0 : i32
    %c0_i32_1 = arith.constant 0 : i32
    return %c0_i32, %c0_i32_0 : i32, i32
  }
  func.func @transform_5(%arg0: i32) -> (i32, i32) {
    %c0_i32 = arith.constant 0 : i32
    %c0_i32_0 = arith.constant 0 : i32
    %c0_i32_1 = arith.constant 0 : i32
    return %c0_i32, %c0_i32_0 : i32, i32
  }
  func.func @transform_6(%arg0: i32) -> (i32, i32) {
    %c0_i32 = arith.constant 0 : i32
    %c0_i32_0 = arith.constant 0 : i32
    %c0_i32_1 = arith.constant 0 : i32
    return %c0_i32, %c0_i32_0 : i32, i32
  }
  func.func @transform_7(%arg0: i32) -> (i32, i32) {
    %c0_i32 = arith.constant 0 : i32
    %c0_i32_0 = arith.constant 0 : i32
    %c0_i32_1 = arith.constant 0 : i32
    return %c0_i32, %c0_i32_0 : i32, i32
  }
  func.func @transform_8(%arg0: i32) -> (i32, i32) {
    %c0_i32 = arith.constant 0 : i32
    %c0_i32_0 = arith.constant 0 : i32
    %c0_i32_1 = arith.constant 0 : i32
    return %c0_i32, %c0_i32_0 : i32, i32
  }
  func.func @transform_9(%arg0: i32) -> (i32, i32) {
    %c0_i32 = arith.constant 0 : i32
    %c0_i32_0 = arith.constant 0 : i32
    %c0_i32_1 = arith.constant 0 : i32
    return %c0_i32, %c0_i32_0 : i32, i32
  }
  func.func @transform_10(%arg0: i32) -> (i32, i32) {
    %c0_i32 = arith.constant 0 : i32
    %c0_i32_0 = arith.constant 0 : i32
    %c0_i32_1 = arith.constant 0 : i32
    return %c0_i32, %c0_i32_0 : i32, i32
  }
  func.func @transform_11(%arg0: i32) -> (i32, i32) {
    %c0_i32 = arith.constant 0 : i32
    %c0_i32_0 = arith.constant 0 : i32
    return %arg0, %c0_i32 : i32, i32
  }
}

</mosaic_0001>

<bundles_post_ra>
// kernel: bottleneck_forward.4
= control target key start
LH: loop header
LB: loop body
LE: loop exit
PB: predicated region body
PF: predicated region fallthrough
CT: control target
= control target key end

     0   :  { %s1021_s15 = smov 0   ;;  %s1230_s0 = inlined_call_operand.vmem [shape: bf16[512,128], index: 0, kind: input, shape index: {}]   ;;  %s1231_s1 = inlined_call_operand.vmem [shape: bf16[128,128], index: 1, kind: input, shape index: {}]   ;;  %s1232_s2 = inlined_call_operand.vmem [shape: bf16[512,128], index: 2, kind: output, shape index: {0}]   ;;  %s1233_s3 = inlined_call_operand.vmem [shape: f32[1,128], index: 3, kind: output, shape index: {1}]   ;;  %s1234_s4 = inlined_call_operand.vmem [shape: f32[1,128], index: 4, kind: output, shape index: {2}]  }
   0x1 LB: > { %s727_s16 = sadd.s32 4294967295, %s993_s15   ;;  %p731_p0 = scmp.ge.s32.totalorder %s993_s15, 1  ;;  %s993_s15 = sphi %s1021_s15, %s15_s15  }
   0x2   : > { %p158_p1 = scmp.lt.s32.totalorder %s993_s15, 3 }
   0x4   : > { %p159_p2 = pnand %p731_p0, %p158_p1 }
   0x5   : > { %s732_s17 = sshll.u32 (!%p159_p2), %s727_s16, 5  ;;  %p736_p4 = scmp.ne.s32.totalorder (!%p159_p2), %s727_s16, 0 }
   0x6   : > { %162 = sbr.rel (%p159_p2) target bundleno = 300 (0x12c), region = 28  ;;  %p185_p3 = scmp.lt.s32.totalorder (!%p159_p2), %s732_s17, 63 }
   0xb   : > { %s1236_s17 = smov (!%p185_p3, %s732_s17), 63  ;;  %199 = sbr.rel (%p736_p4) target bundleno = 19 (0x13), region = 32 }
   0xc   : > { %s733_s18 = sshll.u32 %s1236_s17, 2 }
   0xd   : > { %s1032_s21 = scalar_lea.vmem %s1230_s0, %s733_s18  ;;  %s1037_s24 = scalar_lea.vmem %s1232_s2, %s733_s18 }
  0x10   : > { %v995_v0 = vmov 0.0  }
  0x11   : > { %200 = vst [vmem:[%s1233_s3] sm:$0x1] %v995_v0 }
  0x12   : > { %201 = vst [vmem:[%s1234_s4] sm:$0x1] %v995_v0 }
  0x13 PF: > { %v858_v1 = vld [vmem:[%s1231_s1 + $0x38] sm:$0xff]  ;;  %v857_v2 = vld [vmem:[%s1231_s1 + $0x30] sm:$0xff]  ;;  %v856_v3 = vld [vmem:[%s1231_s1 + $0x28] sm:$0xff] }
  0x14   : > { %394 = vmatpush.bf16.msra.mxu0 %v858_v1  ;;  %954 = vmatpush.bf16.msra.mxu1 %v858_v1  ;;  %v855_v4 = vld [vmem:[%s1231_s1 + $0x20] sm:$0xff]  ;;  %v854_v5 = vld [vmem:[%s1231_s1 + $0x18] sm:$0xff]  ;;  %v853_v6 = vld [vmem:[%s1231_s1 + $0x10] sm:$0xff] }
  0x15   : > { %955 = vmatpush.bf16.msra.mxu2 %v858_v1  ;;  %956 = vmatpush.bf16.msra.mxu3 %v858_v1  ;;  %v852_v7 = vld [vmem:[%s1231_s1 + $0x8] sm:$0xff]  ;;  %v851_v8 = vld [vmem:[%s1231_s1] sm:$0xff]  ;;  %v837_v17 = vld [vmem:[%s1032_s21 + $0x10] sm:$0xff] }
  0x16   : > { %v835_v9 = vld [vmem:[%s1032_s21] sm:$0xff]  ;;  %v836_v13 = vld [vmem:[%s1032_s21 + $0x8] sm:$0xff]  ;;  %v841_v18 = vld [vmem:[%s1032_s21 + $0x30] sm:$0xff] }
  0x17   : > { %v839_v10 = vld [vmem:[%s1032_s21 + $0x20] sm:$0xff]  ;;  %v840_v14 = vld [vmem:[%s1032_s21 + $0x28] sm:$0xff]  ;;  %v845_v19 = vld [vmem:[%s1032_s21 + $0x50] sm:$0xff] }
  0x18   : > { %395 = vmatpush.bf16.msra.mxu0 %v857_v2  ;;  %957 = vmatpush.bf16.msra.mxu1 %v857_v2  ;;  %v843_v11 = vld [vmem:[%s1032_s21 + $0x40] sm:$0xff]  ;;  %v844_v15 = vld [vmem:[%s1032_s21 + $0x48] sm:$0xff]  ;;  %v849_v20 = vld [vmem:[%s1032_s21 + $0x70] sm:$0xff] }
  0x19   : > { %958 = vmatpush.bf16.msra.mxu2 %v857_v2  ;;  %959 = vmatpush.bf16.msra.mxu3 %v857_v2  ;;  %v847_v12 = vld [vmem:[%s1032_s21 + $0x60] sm:$0xff]  ;;  %v848_v16 = vld [vmem:[%s1032_s21 + $0x68] sm:$0xff]  ;;  %v838_v21 = vld [vmem:[%s1032_s21 + $0x18] sm:$0xff] }
  0x1a   : > { %v842_v22 = vld [vmem:[%s1032_s21 + $0x38] sm:$0xff] }
  0x1b   : > { %v846_v23 = vld [vmem:[%s1032_s21 + $0x58] sm:$0xff] }
  0x1c   : > { %396 = vmatpush.bf16.msra.mxu0 %v856_v3  ;;  %960 = vmatpush.bf16.msra.mxu1 %v856_v3  ;;  %v850_v24 = vld [vmem:[%s1032_s21 + $0x78] sm:$0xff] }
  0x1d   : > { %961 = vmatpush.bf16.msra.mxu2 %v856_v3  ;;  %962 = vmatpush.bf16.msra.mxu3 %v856_v3 }
  0x20   : > { %397 = vmatpush.bf16.msra.mxu0 %v855_v4  ;;  %963 = vmatpush.bf16.msra.mxu1 %v855_v4 }
  0x21   : > { %964 = vmatpush.bf16.msra.mxu2 %v855_v4  ;;  %965 = vmatpush.bf16.msra.mxu3 %v855_v4 }
  0x24   : > { %398 = vmatpush.bf16.msra.mxu0 %v854_v5  ;;  %966 = vmatpush.bf16.msra.mxu1 %v854_v5 }
  0x25   : > { %967 = vmatpush.bf16.msra.mxu2 %v854_v5  ;;  %968 = vmatpush.bf16.msra.mxu3 %v854_v5 }
  0x28   : > { %399 = vmatpush.bf16.msra.mxu0 %v853_v6  ;;  %969 = vmatpush.bf16.msra.mxu1 %v853_v6 }
  0x29   : > { %970 = vmatpush.bf16.msra.mxu2 %v853_v6  ;;  %971 = vmatpush.bf16.msra.mxu3 %v853_v6 }
  0x2c   : > { %400 = vmatpush.bf16.msra.mxu0 %v852_v7  ;;  %972 = vmatpush.bf16.msra.mxu1 %v852_v7 }
  0x2d   : > { %973 = vmatpush.bf16.msra.mxu2 %v852_v7  ;;  %974 = vmatpush.bf16.msra.mxu3 %v852_v7 }
  0x30   : > { %401 = vmatpush.bf16.msra.mxu0 %v851_v8  ;;  %975 = vmatpush.bf16.msra.mxu1 %v851_v8 }
  0x31   : > { %976 = vmatpush.bf16.msra.mxu2 %v851_v8  ;;  %977 = vmatpush.bf16.msra.mxu3 %v851_v8 }
  0x33   : > { %402 = vmatmul.bf16.vlgmr.msra.gmra.mxu0 %v835_v9  ;;  %422 = vmatmul.bf16.vlgmr.msra.gmra.mxu1 %v839_v10 }
  0x34   : > { %442 = vmatmul.bf16.vlgmr.msra.gmra.mxu2 %v843_v11  ;;  %462 = vmatmul.bf16.vlgmr.msra.gmra.mxu3 %v847_v12 }
  0x43   : > { %407 = vmatmul.bf16.gmra.mxu0 %v836_v13  ;;  %427 = vmatmul.bf16.gmra.mxu1 %v840_v14 }
  0x44   : > { %447 = vmatmul.bf16.gmra.mxu2 %v844_v15  ;;  %467 = vmatmul.bf16.gmra.mxu3 %v848_v16 }
  0x53   : > { %412 = vmatmul.bf16.gmra.mxu0 %v837_v17  ;;  %432 = vmatmul.bf16.gmra.mxu1 %v841_v18 }
  0x54   : > { %452 = vmatmul.bf16.gmra.mxu2 %v845_v19  ;;  %472 = vmatmul.bf16.gmra.mxu3 %v849_v20 }
  0x63   : > { %417 = vmatmul.bf16.gmra.mxu0 %v838_v21  ;;  %437 = vmatmul.bf16.gmra.mxu1 %v842_v22 }
  0x64   : > { %457 = vmatmul.bf16.gmra.mxu2 %v846_v23  ;;  %477 = vmatmul.bf16.gmra.mxu3 %v850_v24 }
  0xb0   : > { %v403_v25 = vpop.f32.mrf.mxu0  ;;  %v1085_v26 = vpop.f32.mrf.mxu1 }
  0xb1   : > { %v588_v58 = vmul.f32 %v403_v25, %v403_v25 }
  0xb7   : > { %v1087_v27 = vpop.f32.mrf.mxu2  ;;  %v1093_v32 = vpop.f32.mrf.mxu3 }
  0xb8   : > { %v405_v28 = vpop.f32.mrf.mxu0  ;;  %v1089_v29 = vpop.f32.mrf.mxu1 }
  0xb9   : > { %v862_v30 = vpack.c.bf16 %v405_v28, %v403_v25  ;;  %v882_v31 = vpack.c.bf16 %v1089_v29, %v1085_v26  ;;  %v589_v57 = vmul.f32 %v405_v28, %v405_v28  ;;  %v548_v60 = vadd.f32 %v405_v28, %v403_v25 }
  0xba   : > { %v596_v28 = vmul.f32 %v1085_v26, %v1085_v26 }
  0xbb   : > { %863 = vst [vmem:[%s1037_s24] sm:$0xff] %v862_v30   ;;  %v620_v61 = vadd.f32 %v589_v57, %v588_v58 }
  0xbc   : > { %942 = vst [vmem:[%s1037_s24 + $0x20] sm:$0xff] %v882_v31  }
  0xbf   : > { %v1097_v33 = vpop.f32.mrf.mxu2  ;;  %v1103_v37 = vpop.f32.mrf.mxu3 }
  0xc0   : > { %v408_v34 = vpop.f32.mrf.mxu0  ;;  %v1099_v35 = vpop.f32.mrf.mxu1  ;;  %v902_v36 = vpack.c.bf16 %v1097_v33, %v1087_v27  ;;  %v922_v38 = vpack.c.bf16 %v1103_v37, %v1093_v32 }
  0xc1   : > { %v590_v59 = vmul.f32 %v408_v34, %v408_v34  ;;  %v549_v63 = vadd.f32 %v548_v60, %v408_v34 }
  0xc2   : > { %946 = vst [vmem:[%s1037_s24 + $0x40] sm:$0xff] %v902_v36  }
  0xc3   : > { %950 = vst [vmem:[%s1037_s24 + $0x60] sm:$0xff] %v922_v38   ;;  %v621_v1 = vadd.f32 %v620_v61, %v590_v59 }
  0xc7   : > { %v1109_v39 = vpop.f32.mrf.mxu2  ;;  %v1115_v44 = vpop.f32.mrf.mxu3 }
  0xc8   : > { %v410_v40 = vpop.f32.mrf.mxu0  ;;  %v1111_v41 = vpop.f32.mrf.mxu1 }
  0xc9   : > { %v867_v42 = vpack.c.bf16 %v410_v40, %v408_v34  ;;  %v887_v43 = vpack.c.bf16 %v1111_v41, %v1099_v35  ;;  %v591_v62 = vmul.f32 %v410_v40, %v410_v40  ;;  %v550_v6 = vadd.f32 %v549_v63, %v410_v40 }
  0xca   : > { %v597_v34 = vmul.f32 %v1089_v29, %v1089_v29  ;;  %v598_v40 = vmul.f32 %v1099_v35, %v1099_v35 }
  0xcb   : > { %939 = vst [vmem:[%s1037_s24 + $0x8] sm:$0xff] %v867_v42   ;;  %v622_v8 = vadd.f32 %v621_v1, %v591_v62 }
  0xcc   : > { %943 = vst [vmem:[%s1037_s24 + $0x28] sm:$0xff] %v887_v43  }
  0xcf   : > { %v1119_v45 = vpop.f32.mrf.mxu2  ;;  %v1125_v49 = vpop.f32.mrf.mxu3 }
  0xd0   : > { %v413_v46 = vpop.f32.mrf.mxu0  ;;  %v1121_v47 = vpop.f32.mrf.mxu1  ;;  %v907_v48 = vpack.c.bf16 %v1119_v45, %v1109_v39  ;;  %v927_v50 = vpack.c.bf16 %v1125_v49, %v1115_v44 }
  0xd1   : > { %v592_v2 = vmul.f32 %v413_v46, %v413_v46  ;;  %v551_v11 = vadd.f32 %v550_v6, %v413_v46  ;;  %v605_v6 = vmul.f32 %v1097_v33, %v1097_v33 }
  0xd2   : > { %947 = vst [vmem:[%s1037_s24 + $0x48] sm:$0xff] %v907_v48  }
  0xd3   : > { %951 = vst [vmem:[%s1037_s24 + $0x68] sm:$0xff] %v927_v50   ;;  %v623_v12 = vadd.f32 %v622_v8, %v592_v2 }
  0xd7   : > { %v1131_v51 = vpop.f32.mrf.mxu2  ;;  %v1137_v56 = vpop.f32.mrf.mxu3 }
  0xd8   : > { %v415_v52 = vpop.f32.mrf.mxu0  ;;  %v1133_v53 = vpop.f32.mrf.mxu1 }
  0xd9   : > { %v872_v54 = vpack.c.bf16 %v415_v52, %v413_v46  ;;  %v892_v55 = vpack.c.bf16 %v1133_v53, %v1121_v47  ;;  %v593_v9 = vmul.f32 %v415_v52, %v415_v52  ;;  %v552_v14 = vadd.f32 %v551_v11, %v415_v52 }
  0xda   : > { %v607_v11 = vmul.f32 %v1119_v45, %v1119_v45 }
  0xdb   : > { %940 = vst [vmem:[%s1037_s24 + $0x10] sm:$0xff] %v872_v54   ;;  %v624_v15 = vadd.f32 %v623_v12, %v593_v9 }
  0xdc   : > { %944 = vst [vmem:[%s1037_s24 + $0x30] sm:$0xff] %v892_v55   ;;  %v600_v55 = vmul.f32 %v1121_v47, %v1121_v47 }
  0xdf   : > { %v1141_v0 = vpop.f32.mrf.mxu2  ;;  %v1145_v7 = vpop.f32.mrf.mxu3 }
  0xe0   : > { %v418_v3 = vpop.f32.mrf.mxu0  ;;  %v438_v4 = vpop.f32.mrf.mxu1  ;;  %v912_v5 = vpack.c.bf16 %v1141_v0, %v1131_v51  ;;  %v932_v10 = vpack.c.bf16 %v1145_v7, %v1137_v56 }
  0xe1   : > { %v594_v13 = vmul.f32 %v418_v3, %v418_v3  ;;  %v553_v16 = vadd.f32 %v552_v14, %v418_v3  ;;  %v602_v62 = vmul.f32 %v438_v4, %v438_v4 }
  0xe2   : > { %948 = vst [vmem:[%s1037_s24 + $0x50] sm:$0xff] %v912_v5  }
  0xe3   : > { %952 = vst [vmem:[%s1037_s24 + $0x70] sm:$0xff] %v932_v10   ;;  %v625_v18 = vadd.f32 %v624_v15, %v594_v13 }
  0xe7   : > { %v458_v17 = vpop.f32.mrf.mxu2  ;;  %v1151_v25 = vpop.f32.mrf.mxu3 }
  0xe8   : > { %v420_v19 = vpop.f32.mrf.mxu0  ;;  %v440_v20 = vpop.f32.mrf.mxu1 }
  0xe9   : > { %v877_v21 = vpack.c.bf16 %v420_v19, %v418_v3  ;;  %v554_v22 = vadd.f32 %v553_v16, %v420_v19  ;;  %v595_v23 = vmul.f32 %v420_v19, %v420_v19  ;;  %v897_v24 = vpack.c.bf16 %v440_v20, %v438_v4 }
  0xea   : > { %v603_v2 = vmul.f32 %v440_v20, %v440_v20  ;;  %v604_v3 = vmul.f32 %v1087_v27, %v1087_v27  ;;  %v609_v16 = vmul.f32 %v1141_v0, %v1141_v0 }
  0xeb   : > { %941 = vst [vmem:[%s1037_s24 + $0x18] sm:$0xff] %v877_v21   ;;  %v555_v30 = vadd.f32 %v554_v22, %v1085_v26  ;;  %v626_v31 = vadd.f32 %v625_v18, %v595_v23  ;;  %v599_v26 = vmul.f32 %v1111_v41, %v1111_v41 }
  0xec   : > { %945 = vst [vmem:[%s1037_s24 + $0x38] sm:$0xff] %v897_v24  }
  0xed   : > { %v556_v36 = vadd.f32 %v555_v30, %v1089_v29  ;;  %v627_v38 = vadd.f32 %v626_v31, %v596_v28 }
  0xef   : > { %v557_v42 = vadd.f32 %v556_v36, %v1099_v35  ;;  %v628_v43 = vadd.f32 %v627_v38, %v597_v34  ;;  %v460_v46 = vpop.f32.mrf.mxu2  ;;  %v480_v54 = vpop.f32.mrf.mxu3  ;;  %v601_v35 = vmul.f32 %v1133_v53, %v1133_v53  ;;  %v615_v36 = vmul.f32 %v1125_v49, %v1125_v49 }
  0xf0   : > { %v917_v48 = vpack.c.bf16 %v460_v46, %v458_v17  ;;  %v937_v29 = vpack.c.bf16 %v480_v54, %v1151_v25  ;;  %v611_v23 = vmul.f32 %v460_v46, %v460_v46 }
  0xf1   : > { %v629_v50 = vadd.f32 %v628_v43, %v598_v40  ;;  %v558_v52 = vadd.f32 %v557_v42, %v1111_v41 }
  0xf2   : > { %949 = vst [vmem:[%s1037_s24 + $0x58] sm:$0xff] %v917_v48  }
  0xf3   : > { %v559_v57 = vadd.f32 %v558_v52, %v1121_v47  ;;  %v630_v58 = vadd.f32 %v629_v50, %v599_v26  ;;  %953 = vst [vmem:[%s1037_s24 + $0x78] sm:$0xff] %v937_v29   ;;  %v618_v50 = vmul.f32 %v1151_v25, %v1151_v25  ;;  %v619_v29 = vmul.f32 %v480_v54, %v480_v54 }
  0xf5   : > { %v560_v59 = vadd.f32 %v559_v57, %v1133_v53  ;;  %v631_v60 = vadd.f32 %v630_v58, %v600_v55  ;;  %v606_v53 = vmul.f32 %v1109_v39, %v1109_v39 }
  0xf7   : > { %v561_v61 = vadd.f32 %v560_v59, %v438_v4  ;;  %v632_v41 = vadd.f32 %v631_v60, %v601_v35 }
  0xf9   : > { %v633_v63 = vadd.f32 %v632_v41, %v602_v62  ;;  %v562_v1 = vadd.f32 %v561_v61, %v440_v20  ;;  %v610_v20 = vmul.f32 %v458_v17, %v458_v17  ;;  %v547_v41 = vld [vmem:[%s1233_s3] sm:$0x1] }
  0xfb   : > { %v563_v5 = vadd.f32 %v562_v1, %v1087_v27  ;;  %v634_v47 = vadd.f32 %v633_v63, %v603_v2  ;;  %v608_v27 = vmul.f32 %v1131_v51, %v1131_v51 }
  0xfd   : > { %v564_v8 = vadd.f32 %v563_v5, %v1097_v33  ;;  %v635_v9 = vadd.f32 %v634_v47, %v604_v3 }
  0xff   : > { %v565_v4 = vadd.f32 %v564_v8, %v1109_v39  ;;  %v636_v10 = vadd.f32 %v635_v9, %v605_v6 }
 0x101   : > { %v637_v12 = vadd.f32 %v636_v10, %v606_v53  ;;  %v566_v13 = vadd.f32 %v565_v4, %v1119_v45  ;;  %v612_v45 = vmul.f32 %v1093_v32, %v1093_v32 }
 0x103   : > { %v567_v14 = vadd.f32 %v566_v13, %v1131_v51  ;;  %v638_v15 = vadd.f32 %v637_v12, %v607_v11  ;;  %v613_v51 = vmul.f32 %v1103_v37, %v1103_v37 }
 0x105   : > { %v568_v33 = vadd.f32 %v567_v14, %v1141_v0  ;;  %v639_v18 = vadd.f32 %v638_v15, %v608_v27  ;;  %v614_v0 = vmul.f32 %v1115_v44, %v1115_v44 }
 0x107   : > { %v640_v39 = vadd.f32 %v639_v18, %v609_v16  ;;  %v569_v19 = vadd.f32 %v568_v33, %v458_v17 }
 0x109   : > { %v641_v21 = vadd.f32 %v640_v39, %v610_v20  ;;  %v570_v22 = vadd.f32 %v569_v19, %v460_v46  ;;  %v617_v46 = vmul.f32 %v1145_v7, %v1145_v7 }
 0x10b   : > { %v571_v24 = vadd.f32 %v570_v22, %v1093_v32  ;;  %v642_v28 = vadd.f32 %v641_v21, %v611_v23  ;;  %v616_v32 = vmul.f32 %v1137_v56, %v1137_v56 }
 0x10d   : > { %v572_v30 = vadd.f32 %v571_v24, %v1103_v37  ;;  %v643_v31 = vadd.f32 %v642_v28, %v612_v45 }
 0x10f   : > { %v573_v17 = vadd.f32 %v572_v30, %v1115_v44  ;;  %v644_v34 = vadd.f32 %v643_v31, %v613_v51 }
 0x111   : > { %v645_v38 = vadd.f32 %v644_v34, %v614_v0  ;;  %v574_v40 = vadd.f32 %v573_v17, %v1125_v49 }
 0x113   : > { %v575_v42 = vadd.f32 %v574_v40, %v1137_v56  ;;  %v646_v43 = vadd.f32 %v645_v38, %v615_v36 }
 0x115   : > { %v576_v37 = vadd.f32 %v575_v42, %v1145_v7  ;;  %v647_v48 = vadd.f32 %v646_v43, %v616_v32 }
 0x117   : > { %v648_v44 = vadd.f32 %v647_v48, %v617_v46  ;;  %v577_v26 = vadd.f32 %v576_v37, %v1151_v25  ;;  %v587_v25 = vld [vmem:[%s1234_s4] sm:$0x1] }
 0x119   : > { %v649_v52 = vadd.f32 %v648_v44, %v618_v50  ;;  %v578_v49 = vadd.f32 %v577_v26, %v480_v54 }
 0x11b   : > { %v579_v55 = vrot.slane %v578_v49, 4  ;;  %v650_v57 = vadd.f32 %v649_v52, %v619_v29 }
 0x11d   : > { %v580_v58 = vadd.f32 %v579_v55, %v578_v49  ;;  %v651_v56 = vrot.slane %v650_v57, 4 }
 0x11f   : > { %v581_v35 = vrot.slane %v580_v58, 2  ;;  %v652_v59 = vadd.f32 %v651_v56, %v650_v57 }
 0x121   : > { %v582_v60 = vadd.f32 %v581_v35, %v580_v58  ;;  %v653_v61 = vrot.slane %v652_v59, 2 }
 0x123   : > { %v583_v62 = vrot.slane %v582_v60, 1  ;;  %v654_v7 = vadd.f32 %v653_v61, %v652_v59 }
 0x125   : > { %v584_v63 = vadd.f32 %v583_v62, %v582_v60  ;;  %v655_v1 = vrot.slane %v654_v7, 1 }
 0x127   : > { %v585_v54 = vadd.f32 %v584_v63, %v547_v41  ;;  %v656_v2 = vadd.f32 %v655_v1, %v654_v7 }
 0x129   : > { %586 = vst [vmem:[%s1233_s3] sm:$0x1] %v585_v54  ;;  %v657_v3 = vadd.f32 %v656_v2, %v587_v25 }
 0x12b   : > { %658 = vst [vmem:[%s1234_s4] sm:$0x1] %v657_v3 }
 0x12c PF: > { %s15_s15 = sadd.s32 1, %s993_s15  }
 0x12d   : > { %p12_p5 = scmp.ge.s32.totalorder %s15_s15, 4  }
 0x12f   :  { %14 = sbr.rel (!%p12_p5) target bundleno = 1 (0x1), region = 78 }

// kernel: bottleneck_forward.5
= control target key start
LH: loop header
LB: loop body
LE: loop exit
PB: predicated region body
PF: predicated region fallthrough
CT: control target
= control target key end

     0   :  { %s2531_s21 = smov 0   ;;  %s3158_s0 = inlined_call_operand.vmem [shape: bf16[8,8,8,128], index: 0, kind: input, shape index: {}]   ;;  %s3159_s1 = inlined_call_operand.vmem [shape: bf16[9,128,128], index: 1, kind: input, shape index: {}]   ;;  %s3160_s2 = inlined_call_operand.vmem [shape: f32[1,128], index: 2, kind: input, shape index: {}]   ;;  %s3161_s3 = inlined_call_operand.vmem [shape: f32[1,128], index: 3, kind: input, shape index: {}]   ;;  %s3162_s4 = inlined_call_operand.vmem [shape: bf16[128,128], index: 4, kind: output, shape index: {0}]   ;;  %s3163_s5 = inlined_call_operand.vmem [shape: f32[1,128], index: 5, kind: output, shape index: {1}]   ;;  %s3164_s6 = inlined_call_operand.vmem [shape: f32[1,128], index: 6, kind: output, shape index: {2}]  }
   0x1 LB: > { %s1854_s22 = sadd.s32 4294967295, %s2492_s21   ;;  %p1858_p0 = scmp.ge.s32.totalorder %s2492_s21, 1  ;;  %s2492_s21 = sphi %s2531_s21, %s17_s21  }
   0x2   : > { %p209_p1 = scmp.lt.s32.totalorder %s2492_s21, 3 }
   0x4   : > { %p210_p2 = pnand %p1858_p0, %p209_p1 }
   0x5   : > { %s1859_s23 = sshll.u32 (!%p210_p2), %s1854_s22, 2  ;;  %s1862_s24 = sshll.u32 (!%p210_p2), %s1854_s22, 3 }
   0x6   : > { %213 = sbr.rel (%p210_p2) target bundleno = 367 (0x16f), region = 36  ;;  %p241_p3 = scmp.lt.s32.totalorder (!%p210_p2), %s1859_s23, 7 }
   0x7   : > { %p248_p4 = scmp.lt.s32.totalorder (!%p210_p2), %s1862_s24, 15  ;;  %p1864_p5 = scmp.ne.s32.totalorder (!%p210_p2), %s1854_s22, 0 }
   0xb   : > { %s3168_s23 = smov (!%p241_p3, %s1859_s23), 7  ;;  %s3170_s24 = smov (!%p248_p4, %s1862_s24), 15 }
   0xc   : > { %s2283_s25 = sshll.u32 %s3168_s23, 5  ;;  %s1863_s29 = sshll.u32 %s3170_s24, 2 }
   0xd   : > { %s2542_s28 = scalar_lea.vmem %s3158_s0, %s2283_s25  ;;  %s2547_s8 = scalar_lea.vmem %s3162_s4, %s1863_s29 }
   0xe   : > { %256 = sbr.rel (%p1864_p5) target bundleno = 22 (0x16), region = 40 }
  0x13   : > { %v2494_v0 = vmov 0.0  }
  0x14   : > { %257 = vst [vmem:[%s3163_s5] sm:$0x1] %v2494_v0 }
  0x15   : > { %258 = vst [vmem:[%s3164_s6] sm:$0x1] %v2494_v0 }
  0x16 PF: > { %v2291_v1 = vld [vmem:[%s3159_s1 + $0x38] sm:$0xff]  ;;  %v2495_v3 = vmov 0.0   ;;  %v2290_v4 = vld [vmem:[%s3159_s1 + $0x30] sm:$0xff]  ;;  %v2289_v7 = vld [vmem:[%s3159_s1 + $0x28] sm:$0xff] }
  0x17   : > { %v2307_v2 = vld [vmem:[%s3159_s1 + $0xb8] sm:$0xff]  ;;  %327 = vst [vmem:[#allocation2 + $0x220] sm:$0xff] %v2495_v3  ;;  %2458 = vmatpush.bf16.msra.mxu1 %v2291_v1  ;;  %633 = vmatpush.bf16.msra.mxu0 %v2291_v1  ;;  %v2306_v5 = vld [vmem:[%s3159_s1 + $0xb0] sm:$0xff]  ;;  %v2305_v8 = vld [vmem:[%s3159_s1 + $0xa8] sm:$0xff] }
  0x18   : > { %328 = vst [vmem:[#allocation2 + $0x228] sm:$0x3] %v2495_v3  ;;  %894 = vmatpush.bf16.msra.mxu2 %v2307_v2  ;;  %v2315_v6 = vld [vmem:[%s3159_s1 + $0xf8] sm:$0xff]  ;;  %v2314_v9 = vld [vmem:[%s3159_s1 + $0xf0] sm:$0xff]  ;;  %v2584_v10 = vld [vmem:[%s2542_s28 + $0x68] sm:$0xff]  }
  0x19   : > { %329 = vst [vmem:[#allocation2 + $0x230] sm:$0xff] %v2495_v3  ;;  %1025 = vmatpush.bf16.msra.mxu3 %v2315_v6  ;;  %v2411_v11 = vunpack.c.h.bf16 %v2584_v10  ;;  %v2588_v12 = vld [vmem:[%s2542_s28 + $0x70] sm:$0xff]   ;;  %v2593_v13 = vld [vmem:[%s3160_s2] ss:$0 sm:$0xff]  ;;  %v2313_v17 = vld [vmem:[%s3159_s1 + $0xe8] sm:$0xff]  ;;  %v2410_v61 = vunpack.c.l.bf16 %v2584_v10 }
  0x1a   : > { %330 = vst [vmem:[#allocation2 + $0x238] sm:$0x3] %v2495_v3  ;;  %v2414_v14 = vunpack.c.l.bf16 %v2588_v12  ;;  %v2599_v15 = vld [vmem:[%s3161_s3] ss:$0 sm:$0xff]  ;;  %v2287_v25 = vld [vmem:[%s3159_s1 + $0x18] sm:$0xff]  ;;  %v2286_v27 = vld [vmem:[%s3159_s1 + $0x10] sm:$0xff]  ;;  %v2415_v53 = vunpack.c.h.bf16 %v2588_v12 }
  0x1b   : > { %2459 = vmatpush.bf16.msra.mxu1 %v2290_v4  ;;  %634 = vmatpush.bf16.msra.mxu0 %v2290_v4  ;;  %v434_v16 = vmul.f32 %v2593_v13, %v2411_v11  ;;  %v2288_v19 = vld [vmem:[%s3159_s1 + $0x20] sm:$0xff]  ;;  %v2303_v26 = vld [vmem:[%s3159_s1 + $0x98] sm:$0xff]  ;;  %v2302_v28 = vld [vmem:[%s3159_s1 + $0x90] sm:$0xff]  ;;  %281 = vst [vmem:[#allocation2 + $0xb0] sm:$0xff] %v2495_v3 }
  0x1c   : > { %895 = vmatpush.bf16.msra.mxu2 %v2306_v5  ;;  %v435_v18 = vmul.f32 %v2593_v13, %v2414_v14  ;;  %v2304_v21 = vld [vmem:[%s3159_s1 + $0xa0] sm:$0xff]  ;;  %v2285_v29 = vld [vmem:[%s3159_s1 + $0x8] sm:$0xff]  ;;  %283 = vst [vmem:[#allocation2 + $0xc0] sm:$0xff] %v2495_v3  ;;  %v2299_v34 = vld [vmem:[%s3159_s1 + $0x78] sm:$0xff]  ;;  %v436_v62 = vmul.f32 %v2593_v13, %v2415_v53 }
  0x1d   : > { %1026 = vmatpush.bf16.msra.mxu3 %v2314_v9  ;;  %v2610_v20 = vadd.f32 %v2599_v15, %v434_v16  ;;  %v2284_v30 = vld [vmem:[%s3159_s1] sm:$0xff]  ;;  %285 = vst [vmem:[#allocation2 + $0xd0] sm:$0xff] %v2495_v3  ;;  %v2301_v35 = vld [vmem:[%s3159_s1 + $0x88] sm:$0xff]  ;;  %v2298_v37 = vld [vmem:[%s3159_s1 + $0x70] sm:$0xff] }
  0x1e   : > { %v2616_v22 = vadd.f32 %v2599_v15, %v435_v18  ;;  %287 = vst [vmem:[#allocation2 + $0xe0] sm:$0xff] %v2495_v3  ;;  %v2312_v36 = vld [vmem:[%s3159_s1 + $0xe0] sm:$0xff]  ;;  %v2311_v40 = vld [vmem:[%s3159_s1 + $0xd8] sm:$0xff]  ;;  %v2297_v42 = vld [vmem:[%s3159_s1 + $0x68] sm:$0xff]  ;;  %v472_v10 = vadd.f32 %v2599_v15, %v436_v62 }
  0x1f   : > { %2460 = vmatpush.bf16.msra.mxu1 %v2289_v7  ;;  %635 = vmatpush.bf16.msra.mxu0 %v2289_v7  ;;  %v502_v23 = vmax.f32 %v2610_v20, 0.0  ;;  %289 = vst [vmem:[#allocation2 + $0xf0] sm:$0xff] %v2495_v3  ;;  %v2300_v38 = vld [vmem:[%s3159_s1 + $0x80] sm:$0xff]  ;;  %v2323_v41 = vld [vmem:[%s3159_s1 + $0x138] sm:$0xff]  ;;  %v2310_v44 = vld [vmem:[%s3159_s1 + $0xd0] sm:$0xff]  ;;  %v433_v7 = vmul.f32 %v2593_v13, %v2410_v61 }
  0x20   : > { %896 = vmatpush.bf16.msra.mxu2 %v2305_v8  ;;  %v503_v24 = vmax.f32 %v2616_v22, 0.0  ;;  %291 = vst [vmem:[#allocation2 + $0x100] sm:$0xff] %v2495_v3  ;;  %v2451_v39 = vld [vmem:[%s2542_s28 + $0x60] sm:$0xff]   ;;  %v2322_v45 = vld [vmem:[%s3159_s1 + $0x130] sm:$0xff]  ;;  %v2339_v47 = vld [vmem:[%s3159_s1 + $0x1b8] sm:$0xff] }
  0x21   : > { %1027 = vmatpush.bf16.msra.mxu3 %v2313_v17  ;;  %535 = vst [vmem:[#allocation2 + $0x221] sm:$0xff] %v502_v23  ;;  %v2406_v43 = vunpack.c.l.bf16 %v2451_v39  ;;  %v2296_v46 = vld [vmem:[%s3159_s1 + $0x60] sm:$0xff]  ;;  %v2309_v49 = vld [vmem:[%s3159_s1 + $0xc8] sm:$0xff]  ;;  %v2697_v51 = vld [vmem:[%s2542_s28 + $0x78] sm:$0xff]   ;;  %v2407_v59 = vunpack.c.h.bf16 %v2451_v39 }
  0x22   : > { %536 = vst [vmem:[#allocation2 + $0x231] sm:$0xff] %v503_v24  ;;  %v2321_v50 = vld [vmem:[%s3159_s1 + $0x128] sm:$0xff]  ;;  %v2295_v52 = vld [vmem:[%s3159_s1 + $0x58] sm:$0xff]  ;;  %v2418_v54 = vunpack.c.l.bf16 %v2697_v51  ;;  %v2443_v55 = vld [vmem:[%s2542_s28 + $0x20] sm:$0xff]  }
  0x23   : > { %2461 = vmatpush.bf16.msra.mxu1 %v2288_v19  ;;  %636 = vmatpush.bf16.msra.mxu0 %v2288_v19  ;;  %293 = vst [vmem:[#allocation2 + $0x110] sm:$0xff] %v2495_v3  ;;  %v431_v48 = vmul.f32 %v2593_v13, %v2406_v43  ;;  %v2308_v57 = vld [vmem:[%s3159_s1 + $0xc0] sm:$0xff]  ;;  %v2294_v60 = vld [vmem:[%s3159_s1 + $0x50] sm:$0xff]  ;;  %v2374_v63 = vunpack.c.l.bf16 %v2443_v55  ;;  %v2375_v1 = vunpack.c.h.bf16 %v2443_v55  ;;  %v432_v4 = vmul.f32 %v2593_v13, %v2407_v59  ;;  %v2444_v5 = vld [vmem:[%s2542_s28 + $0x28] sm:$0xff]  }
  0x24   : > { %897 = vmatpush.bf16.msra.mxu2 %v2304_v21  ;;  %295 = vst [vmem:[#allocation2 + $0x120] sm:$0xff] %v2495_v3  ;;  %v2320_v58 = vld [vmem:[%s3159_s1 + $0x120] sm:$0xff]  ;;  %v437_v0 = vmul.f32 %v2593_v13, %v2418_v54  ;;  %v2378_v8 = vunpack.c.l.bf16 %v2444_v5  ;;  %v2319_v12 = vld [vmem:[%s3159_s1 + $0x118] sm:$0xff]  ;;  %v2379_v16 = vunpack.c.h.bf16 %v2444_v5  ;;  %v2293_v19 = vld [vmem:[%s3159_s1 + $0x48] sm:$0xff] }
  0x25   : > { %1028 = vmatpush.bf16.msra.mxu3 %v2312_v36  ;;  %299 = vst [vmem:[#allocation2 + $0x140] sm:$0xff] %v2495_v3  ;;  %v467_v56 = vadd.f32 %v2599_v15, %v431_v48  ;;  %v415_v11 = vmul.f32 %v2593_v13, %v2374_v63  ;;  %v2736_v14 = vld [vmem:[%s2542_s28 + $0x40] sm:$0xff]   ;;  %v416_v18 = vmul.f32 %v2593_v13, %v2375_v1  ;;  %v2338_v21 = vld [vmem:[%s3159_s1 + $0x1b0] sm:$0xff]  ;;  %v2331_v36 = vld [vmem:[%s3159_s1 + $0x178] sm:$0xff] }
  0x26   : > { %300 = vst [vmem:[#allocation2 + $0x148] sm:$0x3] %v2495_v3  ;;  %v473_v17 = vadd.f32 %v2599_v15, %v437_v0  ;;  %v2316_v54 = vld [vmem:[%s3159_s1 + $0x100] sm:$0xff]  ;;  %v2445_v62 = vld [vmem:[%s2542_s28 + $0x30] sm:$0xff]  }
  0x27   : > { %2462 = vmatpush.bf16.msra.mxu1 %v2287_v25  ;;  %637 = vmatpush.bf16.msra.mxu0 %v2287_v25  ;;  %319 = vst [vmem:[#allocation2 + $0x1e0] sm:$0xff] %v2495_v3  ;;  %v2723_v2 = vmax.f32 %v467_v56, 0.0  ;;  %v2390_v25 = vunpack.c.l.bf16 %v2736_v14  ;;  %v2777_v39 = vadd.f32 %v2599_v15, %v416_v18  ;;  %v2383_v5 = vunpack.c.h.bf16 %v2445_v62  ;;  %v2344_v20 = vld [vmem:[%s3159_s1 + $0x1e0] sm:$0xff] }
  0x28   : > { %898 = vmatpush.bf16.msra.mxu2 %v2303_v26  ;;  %v553_v31 = vld [vmem:[#allocation2 + $0x220] sm:$0xff]  ;;  %320 = vst [vmem:[#allocation2 + $0x1e8] sm:$0x3] %v2495_v3  ;;  %v468_v26 = vadd.f32 %v2599_v15, %v432_v4  ;;  %v2382_v4 = vunpack.c.l.bf16 %v2445_v62 }
  0x29   : > { %v554_v32 = vld [vmem:[#allocation2 + $0x230] sm:$0xff]  ;;  %1029 = vmatpush.bf16.msra.mxu3 %v2311_v40  ;;  %321 = vst [vmem:[#allocation2 + $0x1f0] sm:$0xff] %v2495_v3  ;;  %v420_v18 = vmul.f32 %v2593_v13, %v2383_v5  ;;  %v2328_v22 = vld [vmem:[%s3159_s1 + $0x160] sm:$0xff] }
  0x2a   : > { %v559_v33 = vpack.c.bf16 %v554_v32, %v553_v31  ;;  %323 = vst [vmem:[#allocation2 + $0x200] sm:$0xff] %v2495_v3  ;;  %v2337_v31 = vld [vmem:[%s3159_s1 + $0x1a8] sm:$0xff]  ;;  %v417_v32 = vmul.f32 %v2593_v13, %v2378_v8  ;;  %v2779_v40 = vmax.f32 %v468_v26, 0.0 }
  0x2b   : > { %2463 = vmatpush.bf16.msra.mxu1 %v2286_v27  ;;  %638 = vmatpush.bf16.msra.mxu0 %v2286_v27  ;;  %325 = vst [vmem:[#allocation2 + $0x210] sm:$0xff] %v2495_v3  ;;  %v2318_v27 = vld [vmem:[%s3159_s1 + $0x110] sm:$0xff]  ;;  %v2839_v8 = vld [vmem:[%s2542_s28 + $0x48] sm:$0xff]  }
  0x2c   : > { %899 = vmatpush.bf16.msra.mxu2 %v2302_v28  ;;  %331 = vst [vmem:[#allocation2 + $0x240] sm:$0xff] %v2495_v3  ;;  %v2347_v28 = vld [vmem:[%s3159_s1 + $0x1f8] sm:$0xff] }
  0x2d   : > { %1030 = vmatpush.bf16.msra.mxu3 %v2310_v44  ;;  %333 = vst [vmem:[#allocation2 + $0x250] sm:$0xff] %v2495_v3  ;;  %v2789_v44 = vadd.f32 %v2599_v15, %v417_v32 }
  0x2e   : > { %335 = vst [vmem:[#allocation2 + $0x260] sm:$0xff] %v2495_v3 }
  0x2f   : > { %2464 = vmatpush.bf16.msra.mxu1 %v2285_v29  ;;  %639 = vmatpush.bf16.msra.mxu0 %v2285_v29  ;;  %v809_v6 = vld [vmem:[#allocation2 + $0x1e1] sm:$0xff]  ;;  %v469_v29 = vadd.f32 %v2599_v15, %v433_v7  ;;  %532 = vst [vmem:[#allocation2 + $0x1f1] sm:$0xff] %v2723_v2  ;;  %v485_v55 = vmax.f32 %v2789_v44, 0.0 }
  0x30   : > { %900 = vmatpush.bf16.msra.mxu2 %v2301_v35  ;;  %v817_v9 = vpack.c.bf16 %v2723_v2, %v809_v6  ;;  %v423_v35 = vmul.f32 %v2593_v13, %v2390_v25  ;;  %533 = vst [vmem:[#allocation2 + $0x201] sm:$0xff] %v2779_v40 }
  0x31   : > { %1031 = vmatpush.bf16.msra.mxu3 %v2309_v49  ;;  %v2786_v43 = vmax.f32 %v469_v29, 0.0  ;;  %518 = vst [vmem:[#allocation2 + $0xd1] sm:$0xff] %v485_v55 }
  0x32   : > { %v2794_v48 = vadd.f32 %v2599_v15, %v423_v35 }
  0x33   : > { %2465 = vmatpush.bf16.msra.mxu1 %v2284_v30  ;;  %640 = vmatpush.bf16.msra.mxu0 %v2284_v30  ;;  %v2292_v30 = vld [vmem:[%s3159_s1 + $0x40] sm:$0xff]  ;;  %534 = vst [vmem:[#allocation2 + $0x211] sm:$0xff] %v2786_v43  ;;  %v818_v61 = vpack.c.bf16 %v2786_v43, %v2779_v40 }
  0x34   : > { %901 = vmatpush.bf16.msra.mxu2 %v2300_v38  ;;  %v2774_v38 = vmax.f32 %v473_v17, 0.0  ;;  %v419_v17 = vmul.f32 %v2593_v13, %v2382_v4 }
  0x35   : > { %1032 = vmatpush.bf16.msra.mxu3 %v2308_v57  ;;  %v491_v57 = vmax.f32 %v2794_v48, 0.0 }
  0x36   : > { %651 = vmatmul.bf16.vlgmr.msra.gmra.mxu1 %v559_v33  ;;  %v2764_v33 = vmax.f32 %v472_v10, 0.0  ;;  %538 = vst [vmem:[#allocation2 + $0x251] sm:$0xff] %v2774_v38  ;;  %v2330_v10 = vld [vmem:[%s3159_s1 + $0x170] sm:$0xff]  ;;  %v2870_v29 = vadd.f32 %v2599_v15, %v419_v17 }
  0x37   : > { %764 = vmatpush.bf16.msrb.mxu1 %v2299_v34  ;;  %1155 = vmatpush.bf16.msrb.mxu0 %v2323_v41  ;;  %v2767_v34 = vadd.f32 %v2599_v15, %v415_v11  ;;  %v2317_v41 = vld [vmem:[%s3159_s1 + $0x108] sm:$0xff]  ;;  %v2391_v11 = vunpack.c.h.bf16 %v2736_v14  ;;  %v2894_v62 = vld [vmem:[#allocation2 + $0x200] sm:$0xff] }
  0x38   : > { %1416 = vmatpush.bf16.msrb.mxu2 %v2339_v47  ;;  %537 = vst [vmem:[#allocation2 + $0x241] sm:$0xff] %v2764_v33 }
  0x39   : > { %902 = vmatmul.bf16.vlgmr.msra.gmra.mxu2 %v817_v9  ;;  %1547 = vmatpush.bf16.msrb.mxu3 %v2347_v28  ;;  %v483_v47 = vmax.f32 %v2767_v34, 0.0  ;;  %v2346_v9 = vld [vmem:[%s3159_s1 + $0x1f0] sm:$0xff]  ;;  %v424_v14 = vmul.f32 %v2593_v13, %v2391_v11  ;;  %v2867_v28 = vld [vmem:[%s3159_s1 + $0x238] sm:$0xff]  ;;  %v819_v11 = vpack.c.bf16 %v503_v24, %v502_v23  ;;  %v2395_v24 = vunpack.c.h.bf16 %v2839_v8  ;;  %v2348_v34 = vld [vmem:[%s3159_s1 + $0x200] sm:$0xff] }
  0x3a   : > { %v2334_v23 = vld [vmem:[%s3159_s1 + $0x190] sm:$0xff] }
  0x3b   : > { %765 = vmatpush.bf16.msrb.mxu1 %v2298_v37  ;;  %1156 = vmatpush.bf16.msrb.mxu0 %v2322_v45  ;;  %v418_v37 = vmul.f32 %v2593_v13, %v2379_v16  ;;  %516 = vst [vmem:[#allocation2 + $0xb1] sm:$0xff] %v483_v47  ;;  %v2336_v16 = vld [vmem:[%s3159_s1 + $0x1a0] sm:$0xff]  ;;  %v2876_v32 = vadd.f32 %v2599_v15, %v424_v14 }
  0x3c   : > { %1417 = vmatpush.bf16.msrb.mxu2 %v2338_v21  ;;  %v2345_v21 = vld [vmem:[%s3159_s1 + $0x1e8] sm:$0xff] }
  0x3d   : > { %v2797_v49 = vadd.f32 %v2599_v15, %v418_v37  ;;  %v2833_v6 = vld [vmem:[#allocation2 + $0x250] sm:$0xff]  ;;  %1548 = vmatpush.bf16.msrb.mxu3 %v2346_v9  ;;  %v487_v37 = vmax.f32 %v2870_v29, 0.0 }
  0x3f   : > { %766 = vmatpush.bf16.msrb.mxu1 %v2297_v42  ;;  %1157 = vmatpush.bf16.msrb.mxu0 %v2321_v50  ;;  %v2357_v42 = vld [vmem:[%s2542_s28] sm:$0xff]   ;;  %v484_v50 = vmax.f32 %v2777_v39, 0.0  ;;  %520 = vst [vmem:[#allocation2 + $0xf1] sm:$0xff] %v487_v37 }
  0x40   : > { %1418 = vmatpush.bf16.msrb.mxu2 %v2337_v31  ;;  %v2358_v45 = vunpack.c.l.bf16 %v2357_v42  ;;  %v2828_v0 = vld [vmem:[#allocation2 + $0x240] sm:$0xff] }
  0x41   : > { %517 = vst [vmem:[#allocation2 + $0xc1] sm:$0xff] %v484_v50  ;;  %1549 = vmatpush.bf16.msrb.mxu3 %v2345_v21  ;;  %v942_v21 = vld [vmem:[#allocation2 + $0xd0] sm:$0xff]  ;;  %v1334_v39 = vld [vmem:[#allocation2 + $0x220] sm:$0xff] }
  0x43   : > { %767 = vmatpush.bf16.msrb.mxu1 %v2296_v46  ;;  %1158 = vmatpush.bf16.msrb.mxu0 %v2320_v58  ;;  %v2359_v46 = vunpack.c.h.bf16 %v2357_v42  ;;  %v486_v58 = vmax.f32 %v2797_v49, 0.0  ;;  %v492_v42 = vmax.f32 %v2876_v32, 0.0 }
  0x44   : > { %1419 = vmatpush.bf16.msrb.mxu2 %v2336_v16  ;;  %v2446_v16 = vld [vmem:[%s2542_s28 + $0x38] sm:$0xff]  }
  0x45   : > { %v408_v53 = vmul.f32 %v2593_v13, %v2359_v46  ;;  %519 = vst [vmem:[#allocation2 + $0xe1] sm:$0xff] %v486_v58  ;;  %1550 = vmatpush.bf16.msrb.mxu3 %v2344_v20 }
  0x47   : > { %768 = vmatpush.bf16.msrb.mxu1 %v2295_v52  ;;  %1159 = vmatpush.bf16.msrb.mxu0 %v2319_v12  ;;  %v407_v52 = vmul.f32 %v2593_v13, %v2358_v45  ;;  %v2817_v59 = vadd.f32 %v2599_v15, %v408_v53  ;;  %v2394_v12 = vunpack.c.l.bf16 %v2839_v8 }
  0x48   : > { %v941_v26 = vld [vmem:[#allocation2 + $0xc0] sm:$0xff] }
  0x49   : > { %v2810_v56 = vadd.f32 %v2599_v15, %v407_v52  ;;  %v476_v7 = vmax.f32 %v2817_v59, 0.0  ;;  %907 = vmatmul.bf16.gmra.mxu2 %v818_v61  ;;  %v425_v25 = vmul.f32 %v2593_v13, %v2394_v12  ;;  %v2342_v59 = vld [vmem:[%s3159_s1 + $0x1d0] sm:$0xff] }
  0x4b   : > { %769 = vmatpush.bf16.msrb.mxu1 %v2294_v60  ;;  %1160 = vmatpush.bf16.msrb.mxu0 %v2318_v27  ;;  %v2821_v60 = vld [vmem:[#allocation2 + $0x1f0] sm:$0xff]  ;;  %v475_v1 = vmax.f32 %v2810_v56, 0.0  ;;  %v2329_v27 = vld [vmem:[%s3159_s1 + $0x168] sm:$0xff]  ;;  %v2879_v35 = vadd.f32 %v2599_v15, %v425_v25 }
  0x4c   : > { %v557_v63 = vpack.c.bf16 %v2821_v60, %v2495_v3  ;;  %v560_v3 = vpack.c.bf16 %v2833_v6, %v2828_v0  ;;  %v943_v14 = vld [vmem:[#allocation2 + $0xe0] sm:$0xff]  ;;  %v2918_v25 = vld [vmem:[%s2542_s28 + $0x50] sm:$0xff]  }
  0x4d   : > { %v493_v53 = vmax.f32 %v2879_v35, 0.0  ;;  %v1209_v35 = vpack.c.bf16 %v486_v58, %v485_v55 }
  0x4e   : > { %641 = vmatmul.bf16.vlgmr.msra.gmra.mxu0 %v557_v63  ;;  %656 = vmatmul.bf16.gmra.mxu1 %v560_v3  ;;  %v2896_v63 = vld [vmem:[#allocation2 + $0x210] sm:$0xff]  ;;  %v679_v3 = vld [vmem:[#allocation2 + $0x141] sm:$0xff] }
  0x4f   : > { %770 = vmatpush.bf16.msrb.mxu1 %v2293_v19  ;;  %1161 = vmatpush.bf16.msrb.mxu0 %v2317_v41  ;;  %v940_v19 = vld [vmem:[#allocation2 + $0xb0] sm:$0xff]  ;;  %v2440_v41 = vld [vmem:[%s2542_s28 + $0x8] sm:$0xff]   ;;  %v558_v9 = vpack.c.bf16 %v2896_v63, %v2894_v62  ;;  %v687_v17 = vpack.c.bf16 %v491_v57, %v679_v3 }
  0x50   : > { %v948_v31 = vpack.c.bf16 %v941_v26, %v940_v19  ;;  %v2362_v46 = vunpack.c.l.bf16 %v2440_v41  ;;  %v2363_v52 = vunpack.c.h.bf16 %v2440_v41  ;;  %v2387_v19 = vunpack.c.h.bf16 %v2446_v16 }
  0x51   : > { %v2398_v26 = vunpack.c.l.bf16 %v2918_v25  ;;  %v949_v41 = vpack.c.bf16 %v943_v14, %v942_v21 }
  0x52   : > { %1033 = vmatmul.bf16.vlgmr.msra.gmra.mxu3 %v948_v31  ;;  %v410_v61 = vmul.f32 %v2593_v13, %v2363_v52  ;;  %v2935_v31 = vld [vmem:[%s3159_s1 + $0x230] sm:$0xff]  ;;  %v2343_v52 = vld [vmem:[%s3159_s1 + $0x1d8] sm:$0xff] }
  0x53   : > { %771 = vmatpush.bf16.msrb.mxu1 %v2292_v30  ;;  %1162 = vmatpush.bf16.msrb.mxu0 %v2316_v54  ;;  %v2873_v30 = vadd.f32 %v2599_v15, %v420_v18  ;;  %v409_v54 = vmul.f32 %v2593_v13, %v2362_v46  ;;  %v2386_v18 = vunpack.c.l.bf16 %v2446_v16  ;;  %v426_v46 = vmul.f32 %v2593_v13, %v2395_v24  ;;  %v2333_v16 = vld [vmem:[%s3159_s1 + $0x188] sm:$0xff]  ;;  %v2332_v24 = vld [vmem:[%s3159_s1 + $0x180] sm:$0xff] }
  0x54   : > { %v2904_v5 = vadd.f32 %v2599_v15, %v410_v61  ;;  %v427_v8 = vmul.f32 %v2593_v13, %v2398_v26  ;;  %1551 = vmatpush.bf16.msrb.mxu3 %v2343_v52  ;;  %v820_v52 = vpack.c.bf16 %v2774_v38, %v2764_v33 }
  0x55   : > { %v488_v45 = vmax.f32 %v2873_v30, 0.0  ;;  %v2901_v4 = vadd.f32 %v2599_v15, %v409_v54  ;;  %v2327_v54 = vld [vmem:[%s3159_s1 + $0x158] sm:$0xff] }
  0x56   : > { %v478_v12 = vmax.f32 %v2904_v5, 0.0  ;;  %v2349_v5 = vld [vmem:[%s3159_s1 + $0x208] sm:$0xff] }
  0x57   : > { %1285 = vmatpush.bf16.msra.mxu1 %v2331_v36  ;;  %v2335_v36 = vld [vmem:[%s3159_s1 + $0x198] sm:$0xff]  ;;  %1677 = vmatpush.bf16.msra.mxu0 %v2867_v28  ;;  %521 = vst [vmem:[#allocation2 + $0x101] sm:$0xff] %v488_v45  ;;  %v1210_v44 = vpack.c.bf16 %v488_v45, %v487_v37 }
  0x58   : > { %1420 = vmatpush.bf16.msrb.mxu2 %v2335_v36  ;;  %v422_v36 = vmul.f32 %v2593_v13, %v2387_v19  ;;  %v2441_v19 = vld [vmem:[%s2542_s28 + $0x10] sm:$0xff]   ;;  %1552 = vmatpush.bf16.msrb.mxu3 %v2342_v59 }
  0x59   : > { %912 = vmatmul.bf16.gmra.mxu2 %v819_v11  ;;  %v2957_v11 = vadd.f32 %v2599_v15, %v427_v8  ;;  %v2366_v20 = vunpack.c.l.bf16 %v2441_v19 }
  0x5a   : > { %v2950_v3 = vadd.f32 %v2599_v15, %v422_v36 }
  0x5b   : > { %1286 = vmatpush.bf16.msra.mxu1 %v2330_v10  ;;  %v477_v10 = vmax.f32 %v2901_v4, 0.0  ;;  %1678 = vmatpush.bf16.msra.mxu0 %v2935_v31  ;;  %v411_v26 = vmul.f32 %v2593_v13, %v2366_v20  ;;  %v3002_v20 = vld [vmem:[%s2542_s28 + $0x58] sm:$0xff]   ;;  %v2350_v4 = vld [vmem:[%s3159_s1 + $0x210] sm:$0xff] }
  0x5c   : > { %1421 = vmatpush.bf16.msrb.mxu2 %v2334_v23  ;;  %v3165_v14 = vmax.f32 %v2950_v3, 0.0  ;;  %v495_v23 = vmax.f32 %v2957_v11, 0.0  ;;  %v2403_v48 = vunpack.c.h.bf16 %v3002_v20 }
  0x5d   : > { %v2983_v36 = vadd.f32 %v2599_v15, %v411_v26 }
  0x5e   : > { %646 = vmatmul.bf16.gmra.mxu0 %v558_v9  ;;  %772 = vmatmul.bf16.vlgmr.msrb.gmra.mxu1 %v687_v17  ;;  %v2954_v9 = vadd.f32 %v2599_v15, %v426_v46  ;;  %v2965_v17 = vld [vmem:[%s3159_s1 + $0x228] sm:$0xff]  ;;  %523 = vst [vmem:[#allocation2 + $0x121] sm:$0xff] %v3165_v14  ;;  %v1078_v46 = vpack.c.bf16 %v476_v7, %v475_v1  ;;  %v945_v56 = vld [vmem:[#allocation2 + $0x100] sm:$0xff]  ;;  %v2326_v1 = vld [vmem:[%s3159_s1 + $0x150] sm:$0xff] }
  0x5f   : > { %1287 = vmatpush.bf16.msra.mxu1 %v2329_v27  ;;  %v421_v27 = vmul.f32 %v2593_v13, %v2386_v18  ;;  %1679 = vmatpush.bf16.msra.mxu0 %v2965_v17  ;;  %v479_v8 = vmax.f32 %v2983_v36, 0.0  ;;  %v2352_v7 = vld [vmem:[%s3159_s1 + $0x220] sm:$0xff]  ;;  %v2442_v14 = vld [vmem:[%s2542_s28 + $0x18] sm:$0xff]   ;;  %v1470_v36 = vpack.c.bf16 %v492_v42, %v491_v57  ;;  %v430_v57 = vmul.f32 %v2593_v13, %v2403_v48 }
  0x60   : > { %v494_v21 = vmax.f32 %v2954_v9, 0.0  ;;  %1422 = vmatpush.bf16.msrb.mxu2 %v2333_v16  ;;  %v688_v16 = vpack.c.bf16 %v493_v53, %v492_v42  ;;  %v2371_v59 = vunpack.c.h.bf16 %v2442_v14 }
  0x61   : > { %v2947_v61 = vadd.f32 %v2599_v15, %v421_v27  ;;  %v466_v42 = vadd.f32 %v2599_v15, %v430_v57 }
  0x62   : > { %1038 = vmatmul.bf16.gmra.mxu3 %v949_v41 }
  0x63   : > { %1288 = vmatpush.bf16.msra.mxu1 %v2328_v22  ;;  %v489_v18 = vmax.f32 %v2947_v61, 0.0  ;;  %v2367_v22 = vunpack.c.h.bf16 %v2441_v19  ;;  %v944_v19 = vld [vmem:[#allocation2 + $0xf0] sm:$0xff]  ;;  %1680 = vmatpush.bf16.msra.mxu0 %v2352_v7 }
  0x64   : > { %1423 = vmatpush.bf16.msrb.mxu2 %v2332_v24  ;;  %v950_v24 = vpack.c.bf16 %v945_v56, %v944_v19  ;;  %v2351_v19 = vld [vmem:[%s3159_s1 + $0x218] sm:$0xff]  ;;  %v2370_v56 = vunpack.c.l.bf16 %v2442_v14 }
  0x65   : > { %522 = vst [vmem:[#allocation2 + $0x111] sm:$0xff] %v489_v18  ;;  %v412_v27 = vmul.f32 %v2593_v13, %v2367_v22  ;;  %v2402_v22 = vunpack.c.l.bf16 %v3002_v20 }
  0x67   : > { %1289 = vmatpush.bf16.msra.mxu1 %v2327_v54  ;;  %v2986_v41 = vadd.f32 %v2599_v15, %v412_v27  ;;  %v429_v27 = vmul.f32 %v2593_v13, %v2402_v22  ;;  %v414_v22 = vmul.f32 %v2593_v13, %v2371_v59  ;;  %1681 = vmatpush.bf16.msra.mxu0 %v2351_v19 }
  0x68   : > { %2466 = vmatpush.bf16.msra.mxu2 %v2867_v28  ;;  %v2399_v28 = vunpack.c.h.bf16 %v2918_v25  ;;  %v2325_v25 = vld [vmem:[%s3159_s1 + $0x148] sm:$0xff]  ;;  %v689_v59 = vpack.c.bf16 %v495_v23, %v494_v21 }
  0x69   : > { %v480_v54 = vmax.f32 %v2986_v41, 0.0  ;;  %917 = vmatmul.bf16.gmra.mxu2 %v820_v52 }
  0x6a   : > { %v428_v26 = vmul.f32 %v2593_v13, %v2399_v28  ;;  %v413_v28 = vmul.f32 %v2593_v13, %v2370_v56 }
  0x6b   : > { %1290 = vmatpush.bf16.msra.mxu1 %v2326_v1  ;;  %1682 = vmatpush.bf16.msra.mxu0 %v2350_v4 }
  0x6c   : > { %v3025_v52 = vadd.f32 %v2599_v15, %v428_v26  ;;  %2467 = vmatpush.bf16.msra.mxu2 %v2935_v31  ;;  %v449_v14 = vadd.f32 %v2599_v15, %v413_v28  ;;  %v450_v31 = vadd.f32 %v2599_v15, %v414_v22  ;;  %v946_v28 = vld [vmem:[#allocation2 + $0x110] sm:$0xff]  ;;  %v947_v22 = vld [vmem:[#allocation2 + $0x120] sm:$0xff] }
  0x6e   : > { %1163 = vmatmul.bf16.vlgmr.msrb.gmra.mxu0 %v1078_v46  ;;  %777 = vmatmul.bf16.gmra.mxu1 %v688_v16  ;;  %v2341_v46 = vld [vmem:[%s3159_s1 + $0x1c8] sm:$0xff]  ;;  %v3028_v16 = vadd.f32 %v2599_v15, %v429_v27  ;;  %v496_v1 = vmax.f32 %v3025_v52, 0.0  ;;  %v2340_v27 = vld [vmem:[%s3159_s1 + $0x1c0] sm:$0xff]  ;;  %v482_v56 = vmax.f32 %v450_v31, 0.0 }
  0x6f   : > { %1553 = vmatpush.bf16.msrb.mxu3 %v2341_v46  ;;  %1291 = vmatpush.bf16.msra.mxu1 %v2325_v25  ;;  %v1079_v46 = vpack.c.bf16 %v478_v12, %v477_v10  ;;  %v1339_v25 = vpack.c.bf16 %v2894_v62, %v2821_v60  ;;  %v1208_v60 = vpack.c.bf16 %v484_v50, %v483_v47  ;;  %v2419_v12 = vunpack.c.h.bf16 %v2697_v51 }
  0x70   : > { %v497_v26 = vmax.f32 %v3028_v16, 0.0  ;;  %2468 = vmatpush.bf16.msra.mxu2 %v2965_v17  ;;  %v2324_v17 = vld [vmem:[%s3159_s1 + $0x140] sm:$0xff]  ;;  %v951_v62 = vpack.c.bf16 %v947_v22, %v946_v28  ;;  %1683 = vmatpush.bf16.msra.mxu0 %v2349_v5  ;;  %v1080_v47 = vpack.c.bf16 %v480_v54, %v479_v8  ;;  %v1340_v50 = vpack.c.bf16 %v1334_v39, %v2896_v63  ;;  %v1335_v54 = vld [vmem:[#allocation2 + $0x230] sm:$0xff] }
  0x71   : > { %v438_v41 = vmul.f32 %v2593_v13, %v2419_v12  ;;  %v1471_v51 = vpack.c.bf16 %v494_v21, %v493_v53  ;;  %v1472_v13 = vpack.c.bf16 %v496_v1, %v495_v23 }
  0x72   : > { %1043 = vmatmul.bf16.gmra.mxu3 %v950_v24  ;;  %v481_v24 = vmax.f32 %v449_v14, 0.0  ;;  %v690_v10 = vpack.c.bf16 %v497_v26, %v496_v1 }
  0x73   : > { %1554 = vmatpush.bf16.msrb.mxu3 %v2340_v27  ;;  %1292 = vmatpush.bf16.msra.mxu1 %v2324_v17  ;;  %v474_v8 = vadd.f32 %v2599_v15, %v438_v41  ;;  %v1600_v27 = vpack.c.bf16 %v2779_v40, %v2723_v2  ;;  %v1595_v15 = vld [vmem:[#allocation2 + $0x221] sm:$0xff] }
  0x74   : > { %2469 = vmatpush.bf16.msra.mxu2 %v2352_v7  ;;  %1684 = vmatpush.bf16.msra.mxu0 %v2348_v34  ;;  %v1081_v7 = vpack.c.bf16 %v482_v56, %v481_v24  ;;  %v1601_v2 = vpack.c.bf16 %v1595_v15, %v2786_v43 }
  0x75   : > { %v506_v63 = vmax.f32 %v474_v8, 0.0 }
  0x77   : > { %539 = vst [vmem:[#allocation2 + $0x261] sm:$0xff] %v506_v63  ;;  %v1603_v40 = vpack.c.bf16 %v506_v63, %v2774_v38  ;;  %v3166_v38 = vmax.f32 %v2950_v3, 0.0 }
  0x78   : > { %2470 = vmatpush.bf16.msra.mxu2 %v2351_v19  ;;  %v1341_v19 = vpack.c.bf16 %v2828_v0, %v1335_v54  ;;  %v498_v0 = vmax.f32 %v466_v42, 0.0 }
  0x79   : > { %1424 = vmatmul.bf16.vlgmr.msrb.gmra.mxu2 %v1339_v25  ;;  %v1211_v29 = vpack.c.bf16 %v3166_v38, %v489_v18 }
  0x7a   : > { %v1473_v49 = vpack.c.bf16 %v498_v0, %v497_v26 }
  0x7c   : > { %2471 = vmatpush.bf16.msra.mxu2 %v2350_v4 }
  0x7e   : > { %1168 = vmatmul.bf16.gmra.mxu0 %v1079_v46  ;;  %782 = vmatmul.bf16.gmra.mxu1 %v689_v59  ;;  %v1338_v32 = vld [vmem:[#allocation2 + $0x260] sm:$0xff] }
  0x7f   : > { %v1342_v14 = vpack.c.bf16 %v1338_v32, %v2833_v6  ;;  %v1596_v6 = vld [vmem:[#allocation2 + $0x231] sm:$0xff] }
  0x80   : > { %2472 = vmatpush.bf16.msra.mxu2 %v2349_v5  ;;  %v1602_v9 = vpack.c.bf16 %v2764_v33, %v1596_v6 }
  0x82   : > { %1048 = vmatmul.bf16.gmra.mxu3 %v951_v62 }
  0x84   : > { %2473 = vmatpush.bf16.msra.mxu2 %v2348_v34 }
  0x89   : > { %1429 = vmatmul.bf16.gmra.mxu2 %v1340_v50 }
  0x8e   : > { %1173 = vmatmul.bf16.gmra.mxu0 %v1080_v47  ;;  %787 = vmatmul.bf16.gmra.mxu1 %v690_v10 }
  0x92   : > { %1555 = vmatmul.bf16.vlgmr.msrb.gmra.mxu3 %v1470_v36 }
  0x99   : > { %1434 = vmatmul.bf16.gmra.mxu2 %v1341_v19 }
  0x9e   : > { %1178 = vmatmul.bf16.gmra.mxu0 %v1081_v7  ;;  %1293 = vmatmul.bf16.vlgmr.msra.gmra.mxu1 %v1208_v60 }
  0xa2   : > { %1560 = vmatmul.bf16.gmra.mxu3 %v1471_v51 }
  0xa9   : > { %1439 = vmatmul.bf16.gmra.mxu2 %v1342_v14 }
  0xae   : > { %1685 = vmatmul.bf16.vlgmr.msra.gmra.mxu0 %v1600_v27  ;;  %1298 = vmatmul.bf16.gmra.mxu1 %v1209_v35 }
  0xb2   : > { %1565 = vmatmul.bf16.gmra.mxu3 %v1472_v13 }
  0xb3   : > { %v652_v53 = vpop.f32.mrf.mxu1 }
  0xb9   : > { %1700 = vmatmul.bf16.vlgmr.msra.gmra.mxu2 %v1603_v40 }
  0xbb   : > { %v654_v58 = vpop.f32.mrf.mxu1 }
  0xbc   : > { %v903_v55 = vpop.f32.mrf.mxu2 }
  0xbe   : > { %1690 = vmatmul.bf16.gmra.mxu0 %v1601_v2  ;;  %1303 = vmatmul.bf16.gmra.mxu1 %v1210_v44 }
  0xc2   : > { %1570 = vmatmul.bf16.gmra.mxu3 %v1473_v49 }
  0xc4   : > { %v905_v43 = vpop.f32.mrf.mxu2 }
  0xcb   : > { %v642_v11 = vpop.f32.mrf.mxu0  ;;  %v657_v30 = vpop.f32.mrf.mxu1 }
  0xcc   : > { %v908_v37 = vpop.f32.mrf.mxu2 }
  0xce   : > { %1695 = vmatmul.bf16.gmra.mxu0 %v1602_v9  ;;  %1308 = vmatmul.bf16.gmra.mxu1 %v1211_v29 }
  0xd3   : > { %v644_v45 = vpop.f32.mrf.mxu0  ;;  %v659_v21 = vpop.f32.mrf.mxu1 }
  0xd4   : > { %v910_v20 = vpop.f32.mrf.mxu2 }
  0xd5   : > { %v1034_v23 = vpop.f32.mrf.mxu3 }
  0xdb   : > { %v647_v52 = vpop.f32.mrf.mxu0  ;;  %v773_v16 = vpop.f32.mrf.mxu1 }
  0xdc   : > { %v793_v1 = vadd.f32 %v773_v16, %v642_v11  ;;  %v913_v24 = vpop.f32.mrf.mxu2 }
  0xdd   : > { %v1036_v26 = vpop.f32.mrf.mxu3 }
  0xde   : > { %v923_v33 = vadd.f32 %v903_v55, %v793_v1 }
  0xe0   : > { %v1054_v31 = vadd.f32 %v1034_v23, %v923_v33 }
  0xe3   : > { %v649_v56 = vpop.f32.mrf.mxu0  ;;  %v775_v61 = vpop.f32.mrf.mxu1 }
  0xe4   : > { %v794_v46 = vadd.f32 %v775_v61, %v644_v45  ;;  %v915_v25 = vpop.f32.mrf.mxu2 }
  0xe5   : > { %v1039_v3 = vpop.f32.mrf.mxu3 }
  0xe6   : > { %v924_v18 = vadd.f32 %v905_v43, %v794_v46 }
  0xe8   : > { %v1055_v29 = vadd.f32 %v1036_v26, %v924_v18 }
  0xeb   : > { %v1164_v59 = vpop.f32.mrf.mxu0  ;;  %v778_v22 = vpop.f32.mrf.mxu1 }
  0xec   : > { %v1184_v28 = vadd.f32 %v1164_v59, %v1054_v31  ;;  %v795_v17 = vadd.f32 %v778_v22, %v647_v52  ;;  %v918_v5 = vpop.f32.mrf.mxu2 }
  0xed   : > { %v1041_v4 = vpop.f32.mrf.mxu3 }
  0xee   : > { %v925_v60 = vadd.f32 %v908_v37, %v795_v17 }
  0xf0   : > { %v1056_v62 = vadd.f32 %v1039_v3, %v925_v60 }
  0xf3   : > { %v1166_v34 = vpop.f32.mrf.mxu0  ;;  %v780_v39 = vpop.f32.mrf.mxu1 }
  0xf4   : > { %v796_v47 = vadd.f32 %v780_v39, %v649_v56  ;;  %v920_v12 = vpop.f32.mrf.mxu2  ;;  %v1185_v45 = vadd.f32 %v1166_v34, %v1055_v29 }
  0xf5   : > { %v1044_v50 = vpop.f32.mrf.mxu3 }
  0xf6   : > { %v926_v10 = vadd.f32 %v910_v20, %v796_v47 }
  0xf8   : > { %v1057_v46 = vadd.f32 %v1041_v4, %v926_v10 }
  0xfb   : > { %v1169_v36 = vpop.f32.mrf.mxu0  ;;  %v783_v8 = vpop.f32.mrf.mxu1 }
  0xfc   : > { %v1186_v41 = vadd.f32 %v1169_v36, %v1056_v62  ;;  %v797_v63 = vadd.f32 %v783_v8, %v652_v53  ;;  %v1425_v51 = vpop.f32.mrf.mxu2 }
  0xfd   : > { %v3118_v54 = vpop.f32.mrf.mxu3 }
  0xfe   : > { %v927_v7 = vadd.f32 %v913_v24, %v797_v63 }
 0x100   : > { %v1058_v19 = vadd.f32 %v1044_v50, %v927_v7 }
 0x103   : > { %v1171_v48 = vpop.f32.mrf.mxu0  ;;  %v785_v57 = vpop.f32.mrf.mxu1 }
 0x104   : > { %v798_v32 = vadd.f32 %v785_v57, %v654_v58  ;;  %v1427_v35 = vpop.f32.mrf.mxu2  ;;  %v1187_v17 = vadd.f32 %v1171_v48, %v1057_v46 }
 0x105   : > { %v3120_v42 = vpop.f32.mrf.mxu3 }
 0x106   : > { %v928_v27 = vadd.f32 %v915_v25, %v798_v32 }
 0x108   : > { %v1059_v57 = vadd.f32 %v3118_v54, %v928_v27 }
 0x10b   : > { %v1174_v0 = vpop.f32.mrf.mxu0  ;;  %v788_v13 = vpop.f32.mrf.mxu1 }
 0x10c   : > { %v1188_v14 = vadd.f32 %v1174_v0, %v1058_v19  ;;  %v799_v15 = vadd.f32 %v788_v13, %v657_v30  ;;  %v1430_v55 = vpop.f32.mrf.mxu2 }
 0x10d   : > { %v3122_v2 = vpop.f32.mrf.mxu3 }
 0x10e   : > { %v3124_v40 = vadd.f32 %v918_v5, %v799_v15 }
 0x113   : > { %v1176_v53 = vpop.f32.mrf.mxu0  ;;  %v790_v44 = vpop.f32.mrf.mxu1 }
 0x114   : > { %v800_v49 = vadd.f32 %v790_v44, %v659_v21  ;;  %v1432_v38 = vpop.f32.mrf.mxu2  ;;  %v1189_v15 = vadd.f32 %v1176_v53, %v1059_v57  ;;  %v1762_v57 = vld [vmem:[%s3164_s6] sm:$0x1] }
 0x115   : > { %v1556_v6 = vpop.f32.mrf.mxu3 }
 0x116   : > { %v3126_v9 = vadd.f32 %v920_v12, %v800_v49 }
 0x11b   : > { %v3128_v58 = vpop.f32.mrf.mxu0  ;;  %v1294_v43 = vpop.f32.mrf.mxu1 }
 0x11c   : > { %v1314_v23 = vadd.f32 %v1294_v43, %v1184_v28  ;;  %v1435_v1 = vpop.f32.mrf.mxu2  ;;  %v1060_v43 = vadd.f32 %v3120_v42, %v3124_v40  ;;  %v1061_v42 = vadd.f32 %v3122_v2, %v3126_v9 }
 0x11d   : > { %v1558_v11 = vpop.f32.mrf.mxu3 }
 0x11e   : > { %v1445_v16 = vadd.f32 %v1425_v51, %v1314_v23  ;;  %v1190_v54 = vadd.f32 %v3128_v58, %v1060_v43 }
 0x120   : > { %v1576_v24 = vadd.f32 %v1556_v6, %v1445_v16 }
 0x123   : > { %v3130_v37 = vpop.f32.mrf.mxu0  ;;  %v1296_v30 = vpop.f32.mrf.mxu1 }
 0x124   : > { %v1315_v20 = vadd.f32 %v1296_v30, %v1185_v45  ;;  %v1437_v22 = vpop.f32.mrf.mxu2  ;;  %v1191_v58 = vadd.f32 %v3130_v37, %v1061_v42 }
 0x125   : > { %v1561_v52 = vpop.f32.mrf.mxu3 }
 0x126   : > { %v1446_v33 = vadd.f32 %v1427_v35, %v1315_v20 }
 0x128   : > { %v1577_v56 = vadd.f32 %v1558_v11, %v1446_v33 }
 0x12b   : > { %v1686_v21 = vpop.f32.mrf.mxu0  ;;  %v1299_v31 = vpop.f32.mrf.mxu1 }
 0x12c   : > { %v1316_v61 = vadd.f32 %v1299_v31, %v1186_v41  ;;  %v1706_v3 = vadd.f32 %v1686_v21, %v1576_v24  ;;  %v1440_v7 = vpop.f32.mrf.mxu2 }
 0x12d   : > { %v1563_v25 = vpop.f32.mrf.mxu3 }
 0x12e   : > { %v1447_v59 = vadd.f32 %v1430_v55, %v1316_v61  ;;  %v1763_v60 = vmul.f32 %v1706_v3, %v1706_v3 }
 0x130   : > { %v1578_v47 = vadd.f32 %v1561_v52, %v1447_v59 }
 0x133   : > { %v1688_v26 = vpop.f32.mrf.mxu0  ;;  %v1301_v28 = vpop.f32.mrf.mxu1 }
 0x134   : > { %v1707_v18 = vadd.f32 %v1688_v26, %v1577_v56  ;;  %v1317_v50 = vadd.f32 %v1301_v28, %v1187_v17 }
 0x135   : > { %v1566_v4 = vpop.f32.mrf.mxu3 }
 0x136   : > { %v2423_v62 = vpack.c.bf16 %v1707_v18, %v1706_v3  ;;  %v1747_v5 = vadd.f32 %v1707_v18, %v1706_v3  ;;  %v1764_v34 = vmul.f32 %v1707_v18, %v1707_v18  ;;  %v1448_v41 = vadd.f32 %v1432_v38, %v1317_v50  ;;  %v1442_v38 = vpop.f32.mrf.mxu2 }
 0x138   : > { %2424 = vst [vmem:[%s2547_s8] sm:$0xff] %v2423_v62   ;;  %v1771_v39 = vadd.f32 %v1764_v34, %v1763_v60  ;;  %v1579_v51 = vadd.f32 %v1563_v25, %v1448_v41 }
 0x13b   : > { %v1691_v12 = vpop.f32.mrf.mxu0  ;;  %v1304_v10 = vpop.f32.mrf.mxu1 }
 0x13c   : > { %v1708_v36 = vadd.f32 %v1691_v12, %v1578_v47  ;;  %v1318_v48 = vadd.f32 %v1304_v10, %v1188_v14 }
 0x13d   : > { %v1568_v6 = vpop.f32.mrf.mxu3 }
 0x13e   : > { %v1748_v8 = vadd.f32 %v1747_v5, %v1708_v36  ;;  %v1765_v63 = vmul.f32 %v1708_v36, %v1708_v36  ;;  %v1449_v35 = vadd.f32 %v1435_v1, %v1318_v48  ;;  %v1701_v40 = vpop.f32.mrf.mxu2 }
 0x140   : > { %v1772_v19 = vadd.f32 %v1771_v39, %v1765_v63  ;;  %v1580_v29 = vadd.f32 %v1566_v4, %v1449_v35 }
 0x143   : > { %v1693_v32 = vpop.f32.mrf.mxu0  ;;  %v1306_v13 = vpop.f32.mrf.mxu1 }
 0x144   : > { %v1709_v0 = vadd.f32 %v1693_v32, %v1579_v51  ;;  %v1319_v30 = vadd.f32 %v1306_v13, %v1189_v15 }
 0x145   : > { %v1571_v1 = vpop.f32.mrf.mxu3 }
 0x146   : > { %v2428_v44 = vpack.c.bf16 %v1709_v0, %v1708_v36  ;;  %v1749_v49 = vadd.f32 %v1748_v8, %v1709_v0  ;;  %v1766_v55 = vmul.f32 %v1709_v0, %v1709_v0  ;;  %v1450_v45 = vadd.f32 %v1437_v22, %v1319_v30  ;;  %v1703_v62 = vpop.f32.mrf.mxu2 }
 0x148   : > { %2455 = vst [vmem:[%s2547_s8 + $0x8] sm:$0xff] %v2428_v44   ;;  %v1773_v11 = vadd.f32 %v1772_v19, %v1766_v55  ;;  %v1581_v21 = vadd.f32 %v1568_v6, %v1450_v45  ;;  %v1746_v19 = vld [vmem:[%s3163_s5] sm:$0x1] }
 0x14b   : > { %v1696_v14 = vpop.f32.mrf.mxu0  ;;  %v1309_v23 = vpop.f32.mrf.mxu1 }
 0x14c   : > { %v1710_v27 = vadd.f32 %v1696_v14, %v1580_v29  ;;  %v1320_v52 = vadd.f32 %v1309_v23, %v1190_v54 }
 0x14d   : > { %v1573_v2 = vpop.f32.mrf.mxu3 }
 0x14e   : > { %v1750_v20 = vadd.f32 %v1749_v49, %v1710_v27  ;;  %v1767_v53 = vmul.f32 %v1710_v27, %v1710_v27  ;;  %v1451_v33 = vadd.f32 %v1440_v7, %v1320_v52 }
 0x150   : > { %v1774_v16 = vadd.f32 %v1773_v11, %v1767_v53  ;;  %v1582_v31 = vadd.f32 %v1571_v1, %v1451_v33 }
 0x152   : > { %v1712_v61 = vadd.f32 %v1701_v40, %v1582_v31 }
 0x153   : > { %v1698_v24 = vpop.f32.mrf.mxu0  ;;  %v1311_v46 = vpop.f32.mrf.mxu1 }
 0x154   : > { %v1711_v56 = vadd.f32 %v1698_v24, %v1581_v21  ;;  %v1769_v18 = vmul.f32 %v1712_v61, %v1712_v61  ;;  %v1321_v59 = vadd.f32 %v1311_v46, %v1191_v58 }
 0x156   : > { %v2433_v3 = vpack.c.bf16 %v1711_v56, %v1710_v27  ;;  %v1751_v25 = vadd.f32 %v1750_v20, %v1711_v56  ;;  %v1768_v26 = vmul.f32 %v1711_v56, %v1711_v56  ;;  %v1452_v28 = vadd.f32 %v1442_v38, %v1321_v59 }
 0x158   : > { %2456 = vst [vmem:[%s2547_s8 + $0x10] sm:$0xff] %v2433_v3   ;;  %v1775_v22 = vadd.f32 %v1774_v16, %v1768_v26  ;;  %v1752_v17 = vadd.f32 %v1751_v25, %v1712_v61  ;;  %v1583_v9 = vadd.f32 %v1573_v2, %v1452_v28 }
 0x15a   : > { %v1776_v60 = vadd.f32 %v1775_v22, %v1769_v18  ;;  %v1713_v5 = vadd.f32 %v1703_v62, %v1583_v9 }
 0x15c   : > { %v2438_v34 = vpack.c.bf16 %v1713_v5, %v1712_v61  ;;  %v1753_v39 = vadd.f32 %v1752_v17, %v1713_v5  ;;  %v1770_v47 = vmul.f32 %v1713_v5, %v1713_v5 }
 0x15e   : > { %2457 = vst [vmem:[%s2547_s8 + $0x18] sm:$0xff] %v2438_v34   ;;  %v1754_v37 = vrot.slane %v1753_v39, 4  ;;  %v1777_v50 = vadd.f32 %v1776_v60, %v1770_v47 }
 0x160   : > { %v1755_v12 = vadd.f32 %v1754_v37, %v1753_v39  ;;  %v1778_v36 = vrot.slane %v1777_v50, 4 }
 0x162   : > { %v1756_v41 = vrot.slane %v1755_v12, 2  ;;  %v1779_v4 = vadd.f32 %v1778_v36, %v1777_v50 }
 0x164   : > { %v1757_v10 = vadd.f32 %v1756_v41, %v1755_v12  ;;  %v1780_v8 = vrot.slane %v1779_v4, 2 }
 0x166   : > { %v1758_v63 = vrot.slane %v1757_v10, 1  ;;  %v1781_v7 = vadd.f32 %v1780_v8, %v1779_v4 }
 0x168   : > { %v1759_v51 = vadd.f32 %v1758_v63, %v1757_v10  ;;  %v1782_v48 = vrot.slane %v1781_v7, 1 }
 0x16a   : > { %v1760_v32 = vadd.f32 %v1759_v51, %v1746_v19  ;;  %v1783_v0 = vadd.f32 %v1782_v48, %v1781_v7 }
 0x16c   : > { %1761 = vst [vmem:[%s3163_s5] sm:$0x1] %v1760_v32  ;;  %v1784_v35 = vadd.f32 %v1783_v0, %v1762_v57 }
 0x16e   : > { %1785 = vst [vmem:[%s3164_s6] sm:$0x1] %v1784_v35 }
 0x16f PF: > { %s17_s21 = sadd.s32 1, %s2492_s21  }
 0x170   : > { %p14_p6 = scmp.ge.s32.totalorder %s17_s21, 4  }
 0x172   :  { %16 = sbr.rel (!%p14_p6) target bundleno = 1 (0x1), region = 100 }

// kernel: bottleneck_forward.6
= control target key start
LH: loop header
LB: loop body
LE: loop exit
PB: predicated region body
PF: predicated region fallthrough
CT: control target
= control target key end

     0   :  { %s1273_s21 = smov 0   ;;  %s1421_s0 = inlined_call_operand.vmem [shape: bf16[128,128], index: 0, kind: input, shape index: {}]   ;;  %s1422_s1 = inlined_call_operand.vmem [shape: bf16[128,128], index: 1, kind: input, shape index: {}]   ;;  %s1423_s2 = inlined_call_operand.vmem [shape: f32[1,128], index: 2, kind: input, shape index: {}]   ;;  %s1424_s3 = inlined_call_operand.vmem [shape: f32[1,128], index: 3, kind: input, shape index: {}]   ;;  %s1425_s4 = inlined_call_operand.vmem [shape: bf16[128,128], index: 4, kind: input, shape index: {}]   ;;  %s1426_s5 = inlined_call_operand.vmem [shape: bf16[128,128], index: 5, kind: input, shape index: {}]   ;;  %s1427_s6 = inlined_call_operand.vmem [shape: bf16[128,128], index: 6, kind: output, shape index: {0}]   ;;  %s1428_s7 = inlined_call_operand.vmem [shape: bf16[128,128], index: 7, kind: output, shape index: {1}]   ;;  %s1429_s8 = inlined_call_operand.vmem [shape: f32[2,1,128], index: 8, kind: output, shape index: {2}]   ;;  %s1430_s9 = inlined_call_operand.vmem [shape: f32[1,128], index: 9, kind: output, shape index: {3}]   ;;  %s1431_s10 = inlined_call_operand.vmem [shape: f32[1,128], index: 10, kind: output, shape index: {4}]   ;;  %s1432_s11 = inlined_call_operand.vmem [shape: f32[1,128], index: 11, kind: output, shape index: {5}]   ;;  %s1433_s12 = inlined_call_operand.vmem [shape: f32[1,128], index: 12, kind: output, shape index: {6}]  }
   0x1 LB: > { %1435 = sst [smem:[#allocation2_spill]] %s1205_s21  ;;  %s991_s22 = sadd.s32 4294967295, %s1205_s21   ;;  %s1205_s21 = sphi %s1273_s21, %s23_s21  }
   0x2   : > { %p995_p0 = scmp.ge.s32.totalorder %s1205_s21, 1  ;;  %p367_p1 = scmp.lt.s32.totalorder %s1205_s21, 3 }
   0x4   : > { %p368_p2 = pnand %p995_p0, %p367_p1 }
   0x5   : > { %s996_s23 = sshll.u32 (!%p368_p2), %s991_s22, 3  ;;  %p446_p3 = scmp.lt.s32.totalorder (!%p368_p2), %s991_s22, 1 }
   0x6   : > { %371 = sbr.rel (%p368_p2) target bundleno = 232 (0xe8), region = 44  ;;  %p423_p4 = scmp.lt.s32.totalorder (!%p368_p2), %s996_s23, 15 }
   0x7   : > { %p1004_p5 = scmp.ne.s32.totalorder (!%p368_p2), %s991_s22, 0 }
   0xb   : > { %s1281_s24 = scalar_select %p446_p3, %s991_s22, 1 }
   0xc   : > { %s1438_s23 = smov (!%p423_p4, %s996_s23), 15  ;;  %452 = sbr.rel (%p1004_p5) target bundleno = 22 (0x16), region = 48 }
   0xd   : > { %s448_s27 = scalar_lea.vmem %s1429_s8, %s1281_s24  ;;  %s997_s28 = sshll.u32 %s1438_s23, 2 }
   0xe   : > { %s1290_s13 = scalar_lea.vmem %s1421_s0, %s997_s28  ;;  %s1295_s16 = scalar_lea.vmem %s1425_s4, %s997_s28 }
   0xf   : > { %s1300_s19 = scalar_lea.vmem %s1427_s6, %s997_s28  ;;  %s1305_s25 = scalar_lea.vmem %s1428_s7, %s997_s28 }
  0x11   : > { %v1207_v0 = vmov 0.0  }
  0x12   : > { %453 = vst [vmem:[%s1430_s9] sm:$0x1] %v1207_v0 }
  0x13   : > { %454 = vst [vmem:[%s1431_s10] sm:$0x1] %v1207_v0 }
  0x14   : > { %455 = vst [vmem:[%s1432_s11] sm:$0x1] %v1207_v0 }
  0x15   : > { %456 = vst [vmem:[%s1433_s12] sm:$0x1] %v1207_v0 }
  0x16 PF: > { %v1094_v1 = vld [vmem:[%s1422_s1 + $0x38] sm:$0xff]  ;;  %v1093_v3 = vld [vmem:[%s1422_s1 + $0x30] sm:$0xff]  ;;  %v1092_v5 = vld [vmem:[%s1422_s1 + $0x28] sm:$0xff] }
  0x17   : > { %v1106_v2 = vld [vmem:[%s1426_s5 + $0x38] sm:$0xff]  ;;  %573 = vmatpush.bf16.msra.mxu0 %v1094_v1  ;;  %1172 = vmatpush.bf16.msra.mxu2 %v1094_v1  ;;  %v1105_v4 = vld [vmem:[%s1426_s5 + $0x30] sm:$0xff]  ;;  %v1104_v6 = vld [vmem:[%s1426_s5 + $0x28] sm:$0xff] }
  0x18   : > { %698 = vmatpush.bf16.msra.mxu1 %v1106_v2  ;;  %1180 = vmatpush.bf16.msra.mxu3 %v1106_v2  ;;  %v1091_v7 = vld [vmem:[%s1422_s1 + $0x20] sm:$0xff]  ;;  %v1164_v9 = vld [vmem:[%s1290_s13 + $0x10] sm:$0xff]   ;;  %v1090_v16 = vld [vmem:[%s1422_s1 + $0x18] sm:$0xff] }
  0x19   : > { %v1108_v8 = vld [vmem:[%s1290_s13] sm:$0xff]   ;;  %v1117_v14 = vunpack.c.l.bf16 %v1164_v9  ;;  %v1118_v15 = vunpack.c.h.bf16 %v1164_v9  ;;  %v1102_v17 = vld [vmem:[%s1426_s5 + $0x18] sm:$0xff]  ;;  %v1089_v23 = vld [vmem:[%s1422_s1 + $0x10] sm:$0xff] }
  0x1a   : > { %v1103_v10 = vld [vmem:[%s1426_s5 + $0x20] sm:$0xff]  ;;  %v1109_v11 = vunpack.c.l.bf16 %v1108_v8  ;;  %v1110_v12 = vunpack.c.h.bf16 %v1108_v8  ;;  %v1101_v24 = vld [vmem:[%s1426_s5 + $0x10] sm:$0xff]  ;;  %v1088_v29 = vld [vmem:[%s1422_s1 + $0x8] sm:$0xff] }
  0x1b   : > { %574 = vmatpush.bf16.msra.mxu0 %v1093_v3  ;;  %1173 = vmatpush.bf16.msra.mxu2 %v1093_v3  ;;  %v1197_v13 = vld [vmem:[%s1423_s2] ss:$0 sm:$0xff]  ;;  %v1100_v30 = vld [vmem:[%s1426_s5 + $0x8] sm:$0xff]  ;;  %v1165_v37 = vld [vmem:[%s1290_s13 + $0x18] sm:$0xff]  }
  0x1c   : > { %699 = vmatpush.bf16.msra.mxu1 %v1105_v4  ;;  %1181 = vmatpush.bf16.msra.mxu3 %v1105_v4  ;;  %v477_v18 = vmul.f32 %v1197_v13, %v1109_v11  ;;  %v478_v19 = vmul.f32 %v1197_v13, %v1110_v12  ;;  %v1198_v20 = vld [vmem:[%s1424_s3] ss:$0 sm:$0xff]  ;;  %v481_v21 = vmul.f32 %v1197_v13, %v1117_v14  ;;  %v1163_v35 = vld [vmem:[%s1290_s13 + $0x8] sm:$0xff]   ;;  %v1121_v43 = vunpack.c.l.bf16 %v1165_v37  ;;  %v1097_v46 = vld [vmem:[%s1295_s16 + $0x10] sm:$0xff] }
  0x1d   : > { %v482_v22 = vmul.f32 %v1197_v13, %v1118_v15  ;;  %v1087_v36 = vld [vmem:[%s1422_s1] sm:$0xff]  ;;  %v1113_v39 = vunpack.c.l.bf16 %v1163_v35  ;;  %v1114_v40 = vunpack.c.h.bf16 %v1163_v35  ;;  %v1122_v44 = vunpack.c.h.bf16 %v1165_v37  ;;  %v1096_v61 = vld [vmem:[%s1295_s16 + $0x8] sm:$0xff]  ;;  %v1098_v62 = vld [vmem:[%s1295_s16 + $0x18] sm:$0xff] }
  0x1e   : > { %v489_v25 = vadd.f32 %v1198_v20, %v477_v18  ;;  %v490_v26 = vadd.f32 %v1198_v20, %v478_v19  ;;  %v493_v27 = vadd.f32 %v1198_v20, %v481_v21  ;;  %v1099_v38 = vld [vmem:[%s1426_s5] sm:$0xff]  ;;  %v483_v49 = vmul.f32 %v1197_v13, %v1121_v43 }
  0x1f   : > { %575 = vmatpush.bf16.msra.mxu0 %v1092_v5  ;;  %1174 = vmatpush.bf16.msra.mxu2 %v1092_v5  ;;  %v494_v28 = vadd.f32 %v1198_v20, %v482_v22  ;;  %v1095_v45 = vld [vmem:[%s1295_s16] sm:$0xff]  ;;  %v479_v47 = vmul.f32 %v1197_v13, %v1113_v39  ;;  %v480_v48 = vmul.f32 %v1197_v13, %v1114_v40 }
  0x20   : > { %700 = vmatpush.bf16.msra.mxu1 %v1104_v6  ;;  %1182 = vmatpush.bf16.msra.mxu3 %v1104_v6  ;;  %v497_v31 = vmax.f32 %v489_v25, 0.0  ;;  %v498_v32 = vmax.f32 %v490_v26, 0.0  ;;  %v501_v33 = vmax.f32 %v493_v27, 0.0  ;;  %v484_v50 = vmul.f32 %v1197_v13, %v1122_v44 }
  0x21   : > { %v502_v34 = vmax.f32 %v494_v28, 0.0  ;;  %v491_v51 = vadd.f32 %v1198_v20, %v479_v47  ;;  %v492_v52 = vadd.f32 %v1198_v20, %v480_v48  ;;  %v495_v53 = vadd.f32 %v1198_v20, %v483_v49 }
  0x22   : > { %v505_v41 = vpack.c.bf16 %v498_v32, %v497_v31  ;;  %v496_v54 = vadd.f32 %v1198_v20, %v484_v50 }
  0x23   : > { %576 = vmatpush.bf16.msra.mxu0 %v1091_v7  ;;  %1175 = vmatpush.bf16.msra.mxu2 %v1091_v7  ;;  %v507_v42 = vpack.c.bf16 %v502_v34, %v501_v33  ;;  %v499_v55 = vmax.f32 %v491_v51, 0.0  ;;  %v500_v56 = vmax.f32 %v492_v52, 0.0  ;;  %v503_v57 = vmax.f32 %v495_v53, 0.0 }
  0x24   : > { %701 = vmatpush.bf16.msra.mxu1 %v1103_v10  ;;  %1183 = vmatpush.bf16.msra.mxu3 %v1103_v10  ;;  %v504_v58 = vmax.f32 %v496_v54, 0.0 }
  0x25   : > { %v506_v59 = vpack.c.bf16 %v500_v56, %v499_v55 }
  0x26   : > { %v508_v60 = vpack.c.bf16 %v504_v58, %v503_v57 }
  0x27   : > { %577 = vmatpush.bf16.msra.mxu0 %v1090_v16  ;;  %1176 = vmatpush.bf16.msra.mxu2 %v1090_v16 }
  0x28   : > { %702 = vmatpush.bf16.msra.mxu1 %v1102_v17  ;;  %1184 = vmatpush.bf16.msra.mxu3 %v1102_v17 }
  0x2b   : > { %578 = vmatpush.bf16.msra.mxu0 %v1089_v23  ;;  %1177 = vmatpush.bf16.msra.mxu2 %v1089_v23 }
  0x2c   : > { %703 = vmatpush.bf16.msra.mxu1 %v1101_v24  ;;  %1185 = vmatpush.bf16.msra.mxu3 %v1101_v24 }
  0x2f   : > { %579 = vmatpush.bf16.msra.mxu0 %v1088_v29  ;;  %1178 = vmatpush.bf16.msra.mxu2 %v1088_v29 }
  0x30   : > { %704 = vmatpush.bf16.msra.mxu1 %v1100_v30  ;;  %1186 = vmatpush.bf16.msra.mxu3 %v1100_v30 }
  0x33   : > { %580 = vmatpush.bf16.msra.mxu0 %v1087_v36  ;;  %1179 = vmatpush.bf16.msra.mxu2 %v1087_v36 }
  0x34   : > { %705 = vmatpush.bf16.msra.mxu1 %v1099_v38  ;;  %1187 = vmatpush.bf16.msra.mxu3 %v1099_v38 }
  0x36   : > { %581 = vmatmul.bf16.vlgmr.msra.gmra.mxu0 %v505_v41  ;;  %591 = vmatmul.bf16.vlgmr.msra.gmra.mxu2 %v507_v42 }
  0x37   : > { %706 = vmatmul.bf16.vlgmr.msra.gmra.mxu1 %v1095_v45  ;;  %716 = vmatmul.bf16.vlgmr.msra.gmra.mxu3 %v1097_v46 }
  0x46   : > { %586 = vmatmul.bf16.gmra.mxu0 %v506_v59  ;;  %596 = vmatmul.bf16.gmra.mxu2 %v508_v60 }
  0x47   : > { %711 = vmatmul.bf16.gmra.mxu1 %v1096_v61  ;;  %721 = vmatmul.bf16.gmra.mxu3 %v1098_v62 }
  0xb3   : > { %v582_v63 = vpop.f32.mrf.mxu0 }
  0xb4   : > { %v707_v0 = vpop.f32.mrf.mxu1  ;;  %v777_v15 = vmul.f32 %v582_v63, %v582_v63 }
  0xb5   : > { %v817_v18 = vmul.f32 %v707_v0, %v707_v0 }
  0xb9   : > { %v592_v1 = vpop.f32.mrf.mxu2 }
  0xba   : > { %v717_v2 = vpop.f32.mrf.mxu3  ;;  %v781_v37 = vmul.f32 %v592_v1, %v592_v1 }
  0xbb   : > { %v584_v3 = vpop.f32.mrf.mxu0  ;;  %v821_v40 = vmul.f32 %v717_v2, %v717_v2 }
  0xbc   : > { %v1126_v4 = vpack.c.bf16 %v584_v3, %v582_v63  ;;  %v709_v5 = vpop.f32.mrf.mxu1  ;;  %v778_v13 = vmul.f32 %v584_v3, %v584_v3  ;;  %v759_v16 = vadd.f32 %v584_v3, %v582_v63 }
  0xbd   : > { %v1146_v6 = vpack.c.bf16 %v709_v5, %v707_v0  ;;  %v818_v14 = vmul.f32 %v709_v5, %v709_v5  ;;  %v801_v19 = vadd.f32 %v709_v5, %v707_v0 }
  0xbe   : > { %1127 = vst [vmem:[%s1300_s19] sm:$0xff] %v1126_v4   ;;  %v785_v22 = vadd.f32 %v778_v13, %v777_v15 }
  0xbf   : > { %1147 = vst [vmem:[%s1305_s25] sm:$0xff] %v1146_v6   ;;  %v825_v25 = vadd.f32 %v818_v14, %v817_v18 }
  0xc1   : > { %v594_v7 = vpop.f32.mrf.mxu2 }
  0xc2   : > { %v1136_v8 = vpack.c.bf16 %v594_v7, %v592_v1  ;;  %v719_v9 = vpop.f32.mrf.mxu3  ;;  %v782_v43 = vmul.f32 %v594_v7, %v594_v7 }
  0xc3   : > { %v1156_v10 = vpack.c.bf16 %v719_v9, %v717_v2  ;;  %v587_v11 = vpop.f32.mrf.mxu0  ;;  %v822_v46 = vmul.f32 %v719_v9, %v719_v9 }
  0xc4   : > { %1167 = vst [vmem:[%s1300_s19 + $0x10] sm:$0xff] %v1136_v8   ;;  %v712_v12 = vpop.f32.mrf.mxu1  ;;  %v779_v17 = vmul.f32 %v587_v11, %v587_v11  ;;  %v760_v23 = vadd.f32 %v759_v16, %v587_v11 }
  0xc5   : > { %1170 = vst [vmem:[%s1305_s25 + $0x10] sm:$0xff] %v1156_v10   ;;  %v819_v20 = vmul.f32 %v712_v12, %v712_v12  ;;  %v802_v26 = vadd.f32 %v801_v19, %v712_v12  ;;  %v773_v19 = vld [vmem:[%s1430_s9] sm:$0x1] }
  0xc6   : > { %v786_v28 = vadd.f32 %v785_v22, %v779_v17 }
  0xc7   : > { %v826_v33 = vadd.f32 %v825_v25, %v819_v20  ;;  %v776_v25 = vld [vmem:[%s1431_s10] sm:$0x1] }
  0xc9   : > { %v597_v21 = vpop.f32.mrf.mxu2 }
  0xca   : > { %v722_v24 = vpop.f32.mrf.mxu3  ;;  %v783_v50 = vmul.f32 %v597_v21, %v597_v21 }
  0xcb   : > { %v589_v27 = vpop.f32.mrf.mxu0  ;;  %v823_v55 = vmul.f32 %v722_v24, %v722_v24 }
  0xcc   : > { %v1131_v29 = vpack.c.bf16 %v589_v27, %v587_v11  ;;  %v761_v30 = vadd.f32 %v760_v23, %v589_v27  ;;  %v780_v31 = vmul.f32 %v589_v27, %v589_v27  ;;  %v714_v32 = vpop.f32.mrf.mxu1 }
  0xcd   : > { %v1151_v34 = vpack.c.bf16 %v714_v32, %v712_v12  ;;  %v803_v35 = vadd.f32 %v802_v26, %v714_v32  ;;  %v820_v36 = vmul.f32 %v714_v32, %v714_v32 }
  0xce   : > { %1166 = vst [vmem:[%s1300_s19 + $0x8] sm:$0xff] %v1131_v29   ;;  %v762_v38 = vadd.f32 %v761_v30, %v592_v1  ;;  %v787_v39 = vadd.f32 %v786_v28, %v780_v31  ;;  %v816_v30 = vld [vmem:[%s1433_s12] sm:$0x1] }
  0xcf   : > { %1169 = vst [vmem:[%s1305_s25 + $0x8] sm:$0xff] %v1151_v34   ;;  %v804_v41 = vadd.f32 %v803_v35, %v717_v2  ;;  %v827_v42 = vadd.f32 %v826_v33, %v820_v36 }
  0xd0   : > { %v788_v44 = vadd.f32 %v787_v39, %v781_v37  ;;  %v763_v45 = vadd.f32 %v762_v38, %v594_v7 }
  0xd1   : > { %v828_v47 = vadd.f32 %v827_v42, %v821_v40  ;;  %v599_v48 = vpop.f32.mrf.mxu2  ;;  %v805_v49 = vadd.f32 %v804_v41, %v719_v9 }
  0xd2   : > { %v1141_v51 = vpack.c.bf16 %v599_v48, %v597_v21  ;;  %v764_v52 = vadd.f32 %v763_v45, %v597_v21  ;;  %v789_v53 = vadd.f32 %v788_v44, %v782_v43  ;;  %v724_v54 = vpop.f32.mrf.mxu3  ;;  %v784_v60 = vmul.f32 %v599_v48, %v599_v48 }
  0xd3   : > { %v1161_v56 = vpack.c.bf16 %v724_v54, %v722_v24  ;;  %v806_v57 = vadd.f32 %v805_v49, %v722_v24  ;;  %v829_v58 = vadd.f32 %v828_v47, %v822_v46  ;;  %v824_v63 = vmul.f32 %v724_v54, %v724_v54  ;;  %v800_v24 = vld [vmem:[%s1432_s11] sm:$0x1] }
  0xd4   : > { %1168 = vst [vmem:[%s1300_s19 + $0x18] sm:$0xff] %v1141_v51   ;;  %v765_v59 = vadd.f32 %v764_v52, %v599_v48  ;;  %v790_v61 = vadd.f32 %v789_v53, %v783_v50 }
  0xd5   : > { %1171 = vst [vmem:[%s1305_s25 + $0x18] sm:$0xff] %v1161_v56   ;;  %v807_v62 = vadd.f32 %v806_v57, %v724_v54  ;;  %v830_v0 = vadd.f32 %v829_v58, %v823_v55 }
  0xd6   : > { %v766_v1 = vrot.slane %v765_v59, 4  ;;  %v791_v2 = vadd.f32 %v790_v61, %v784_v60 }
  0xd7   : > { %v808_v3 = vrot.slane %v807_v62, 4  ;;  %v831_v4 = vadd.f32 %v830_v0, %v824_v63 }
  0xd8   : > { %v767_v5 = vadd.f32 %v766_v1, %v765_v59  ;;  %v792_v6 = vrot.slane %v791_v2, 4 }
  0xd9   : > { %v809_v7 = vadd.f32 %v808_v3, %v807_v62  ;;  %v832_v8 = vrot.slane %v831_v4, 4 }
  0xda   : > { %v768_v9 = vrot.slane %v767_v5, 2  ;;  %v793_v10 = vadd.f32 %v792_v6, %v791_v2 }
  0xdb   : > { %v810_v11 = vrot.slane %v809_v7, 2  ;;  %v833_v12 = vadd.f32 %v832_v8, %v831_v4 }
  0xdc   : > { %v769_v13 = vadd.f32 %v768_v9, %v767_v5  ;;  %v794_v14 = vrot.slane %v793_v10, 2 }
  0xdd   : > { %v811_v15 = vadd.f32 %v810_v11, %v809_v7  ;;  %v834_v16 = vrot.slane %v833_v12, 2 }
  0xde   : > { %v770_v17 = vrot.slane %v769_v13, 1  ;;  %v795_v18 = vadd.f32 %v794_v14, %v793_v10 }
  0xdf   : > { %v812_v20 = vrot.slane %v811_v15, 1  ;;  %v835_v21 = vadd.f32 %v834_v16, %v833_v12 }
  0xe0   : > { %v771_v22 = vadd.f32 %v770_v17, %v769_v13  ;;  %v796_v23 = vrot.slane %v795_v18, 1 }
  0xe1   : > { %v813_v26 = vadd.f32 %v812_v20, %v811_v15  ;;  %v836_v27 = vrot.slane %v835_v21, 1 }
  0xe2   : > { %772 = vst [vmem:[%s448_s27] sm:$0x1] %v771_v22  ;;  %v774_v28 = vadd.f32 %v773_v19, %v771_v22  ;;  %v797_v29 = vadd.f32 %v796_v23, %v795_v18 }
  0xe3   : > { %v814_v31 = vadd.f32 %v813_v26, %v800_v24  ;;  %v837_v32 = vadd.f32 %v836_v27, %v835_v21 }
  0xe4   : > { %775 = vst [vmem:[%s1430_s9] sm:$0x1] %v774_v28  ;;  %v798_v33 = vadd.f32 %v797_v29, %v776_v25 }
  0xe5   : > { %815 = vst [vmem:[%s1432_s11] sm:$0x1] %v814_v31  ;;  %v838_v34 = vadd.f32 %v837_v32, %v816_v30 }
  0xe6   : > { %799 = vst [vmem:[%s1431_s10] sm:$0x1] %v798_v33 }
  0xe7   : > { %839 = vst [vmem:[%s1433_s12] sm:$0x1] %v838_v34 }
  0xe8 PF: > { %s1436_s13 = sld [smem:[#allocation2_spill]] }
  0xee   : > { %s23_s21 = sadd.s32 1, %s1436_s13  }
  0xef   : > { %p20_p6 = scmp.ge.s32.totalorder %s23_s21, 4  }
  0xf1   :  { %22 = sbr.rel (!%p20_p6) target bundleno = 1 (0x1), region = 137 }

// kernel: bottleneck_forward.7
= control target key start
LH: loop header
LB: loop body
LE: loop exit
PB: predicated region body
PF: predicated region fallthrough
CT: control target
= control target key end

     0   :  { %s835_s17 = smov 0   ;;  %s987_s0 = inlined_call_operand.vmem [shape: bf16[128,128], index: 0, kind: input, shape index: {}]   ;;  %s988_s1 = inlined_call_operand.vmem [shape: bf16[128,128], index: 1, kind: input, shape index: {}]   ;;  %s989_s2 = inlined_call_operand.vmem [shape: f32[2,1,128], index: 2, kind: input, shape index: {}]   ;;  %s990_s3 = inlined_call_operand.vmem [shape: f32[1,128], index: 3, kind: input, shape index: {}]   ;;  %s991_s4 = inlined_call_operand.vmem [shape: f32[1,128], index: 4, kind: input, shape index: {}]   ;;  %s992_s5 = inlined_call_operand.vmem [shape: f32[1,128], index: 5, kind: input, shape index: {}]   ;;  %s993_s6 = inlined_call_operand.vmem [shape: f32[1,128], index: 6, kind: input, shape index: {}]   ;;  %s994_s7 = inlined_call_operand.vmem [shape: f32[128,128], index: 7, kind: input, shape index: {}]   ;;  %s995_s8 = inlined_call_operand.vmem [shape: f32[1,128], index: 8, kind: input, shape index: {}]   ;;  %s996_s9 = inlined_call_operand.vmem [shape: f32[128,128], index: 9, kind: input, shape index: {}]   ;;  %s997_s10 = inlined_call_operand.vmem [shape: f32[1,128], index: 10, kind: input, shape index: {}]   ;;  %s998_s11 = inlined_call_operand.vmem [shape: f32[128,128], index: 11, kind: output, shape index: {}]  }
   0x1 LB: > { %s841_s18 = sadd.s32 4294967295, %s773_s17   ;;  %p704_p0 = scmp.ge.s32.totalorder %s773_s17, 1  ;;  %s773_s17 = sphi %s835_s17, %s21_s17  }
   0x2   : > { %p357_p1 = scmp.lt.s32.totalorder %s773_s17, 3 }
   0x4   : > { %p358_p2 = pnand %p704_p0, %p357_p1 }
   0x5   : > { %p417_p3 = scmp.lt.s32.totalorder (!%p358_p2), %s841_s18, 1 }
   0x6   : > { %361 = sbr.rel (%p358_p2) target bundleno = 337 (0x151), region = 64 }
   0xb   : > { %v485_v0 = vld [vmem:[%s994_s7 + $0x78] sm:$0xff]  ;;  %v484_v1 = vld [vmem:[%s994_s7 + $0x70] sm:$0xff]  ;;  %v483_v2 = vld [vmem:[%s994_s7 + $0x68] sm:$0xff]  ;;  %s418_s22 = scalar_select %p417_p3, %s841_s18, 1 }
   0xc   : > { %487 = vmatpush.msra.mxu0 %v485_v0  ;;  %v482_v3 = vld [vmem:[%s994_s7 + $0x60] sm:$0xff]  ;;  %v523_v4 = vld [vmem:[%s996_s9 + $0x78] sm:$0xff]  ;;  %v480_v6 = vld [vmem:[%s994_s7 + $0x50] sm:$0xff] }
   0xd   : > { %v481_v5 = vld [vmem:[%s994_s7 + $0x58] sm:$0xff]  ;;  %525 = vmatpush.msra.mxu1 %v523_v4  ;;  %v522_v7 = vld [vmem:[%s996_s9 + $0x70] sm:$0xff]  ;;  %v521_v8 = vld [vmem:[%s996_s9 + $0x68] sm:$0xff]  ;;  %s419_s14 = scalar_lea.vmem %s989_s2, %s418_s22  ;;  %s705_s22 = sshll.u32 %s841_s18, 3 }
   0xe   : > { %488 = vmatpush.msra.mxu0 %v484_v1  ;;  %v479_v9 = vld [vmem:[%s994_s7 + $0x48] sm:$0xff]  ;;  %v520_v10 = vld [vmem:[%s996_s9 + $0x60] sm:$0xff]  ;;  %v519_v12 = vld [vmem:[%s996_s9 + $0x58] sm:$0xff]  ;;  %p406_p4 = scmp.lt.s32.totalorder %s705_s22, 15 }
   0xf   : > { %526 = vmatpush.msra.mxu1 %v522_v7  ;;  %v478_v11 = vld [vmem:[%s994_s7 + $0x40] sm:$0xff]  ;;  %v477_v13 = vld [vmem:[%s994_s7 + $0x38] sm:$0xff]  ;;  %v518_v14 = vld [vmem:[%s996_s9 + $0x50] sm:$0xff] }
  0x10   : > { %489 = vmatpush.msra.mxu0 %v483_v2  ;;  %v476_v15 = vld [vmem:[%s994_s7 + $0x30] sm:$0xff]  ;;  %v466_v16 = vld [vmem:[%s419_s14] sm:$0x1]  ;;  %v517_v17 = vld [vmem:[%s996_s9 + $0x48] sm:$0xff]  ;;  %s1000_s22 = smov (!%p406_p4, %s705_s22), 15 }
  0x11   : > { %527 = vmatpush.msra.mxu1 %v521_v8  ;;  %v475_v18 = vld [vmem:[%s994_s7 + $0x28] sm:$0xff]  ;;  %v516_v19 = vld [vmem:[%s996_s9 + $0x40] sm:$0xff]  ;;  %v467_v21 = vmul.f32 0.015625, %v466_v16  ;;  %v515_v23 = vld [vmem:[%s996_s9 + $0x38] sm:$0xff]  ;;  %s706_s28 = sshll.u32 %s1000_s22, 2  ;;  %s710_s26 = sshll.u32 %s1000_s22, 3 }
  0x12   : > { %490 = vmatpush.msra.mxu0 %v482_v3  ;;  %v474_v20 = vld [vmem:[%s994_s7 + $0x20] sm:$0xff]  ;;  %v473_v24 = vld [vmem:[%s994_s7 + $0x18] sm:$0xff]  ;;  %v514_v25 = vld [vmem:[%s996_s9 + $0x30] sm:$0xff]  ;;  %s409_s12 = scalar_lea.vmem %s987_s0, %s706_s28  ;;  %s415_s14 = scalar_lea.vmem %s988_s1, %s706_s28 }
  0x13   : > { %528 = vmatpush.msra.mxu1 %v520_v10  ;;  %v442_v22 = vld [vmem:[%s990_s3] sm:$0x1]  ;;  %v472_v26 = vld [vmem:[%s994_s7 + $0x10] sm:$0xff]  ;;  %v513_v29 = vld [vmem:[%s996_s9 + $0x28] sm:$0xff]  ;;  %s424_s29 = scalar_lea.vmem %s998_s11, %s710_s26 }
  0x14   : > { %491 = vmatpush.msra.mxu0 %v481_v5  ;;  %v468_v27 = vmul.f32 %v467_v21, %v442_v22  ;;  %v454_v28 = vld [vmem:[%s991_s4] sm:$0x1]  ;;  %v471_v30 = vld [vmem:[%s994_s7 + $0x8] sm:$0xff]  ;;  %v511_v34 = vld [vmem:[%s996_s9 + $0x18] sm:$0xff] }
  0x15   : > { %529 = vmatpush.msra.mxu1 %v519_v12  ;;  %v512_v31 = vld [vmem:[%s996_s9 + $0x20] sm:$0xff]  ;;  %v510_v35 = vld [vmem:[%s996_s9 + $0x10] sm:$0xff]  ;;  %v509_v36 = vld [vmem:[%s996_s9 + $0x8] sm:$0xff] }
  0x16   : > { %492 = vmatpush.msra.mxu0 %v480_v6  ;;  %v470_v32 = vld [vmem:[%s994_s7] sm:$0xff]  ;;  %v469_v33 = vadd.f32 %v468_v27, %v454_v28  ;;  %v745_v48 = vld [vmem:[%s409_s12 + $0x8] sm:$0xff]   ;;  %v746_v50 = vld [vmem:[%s409_s12 + $0x10] sm:$0xff]  }
  0x17   : > { %530 = vmatpush.msra.mxu1 %v518_v14  ;;  %v508_v37 = vld [vmem:[%s996_s9] sm:$0xff]  ;;  %v747_v51 = vld [vmem:[%s409_s12 + $0x18] sm:$0xff]   ;;  %v719_v55 = vunpack.c.l.bf16 %v745_v48  ;;  %v748_v56 = vld [vmem:[%s415_s14 + $0x8] sm:$0xff]   ;;  %v720_v59 = vunpack.c.h.bf16 %v745_v48  ;;  %v723_v60 = vunpack.c.l.bf16 %v746_v50  ;;  %v724_v61 = vunpack.c.h.bf16 %v746_v50 }
  0x18   : > { %493 = vmatpush.msra.mxu0 %v479_v9  ;;  %v486_v38 = vld [vmem:[%s995_s8] sm:$0x1]  ;;  %v749_v57 = vld [vmem:[%s415_s14 + $0x10] sm:$0xff]   ;;  %v727_v62 = vunpack.c.l.bf16 %v747_v51  ;;  %v750_v63 = vld [vmem:[%s415_s14 + $0x18] sm:$0xff]   ;;  %v728_v0 = vunpack.c.h.bf16 %v747_v51  ;;  %v735_v7 = vunpack.c.l.bf16 %v748_v56  ;;  %v736_v8 = vunpack.c.h.bf16 %v748_v56 }
  0x19   : > { %531 = vmatpush.msra.mxu1 %v517_v17  ;;  %v524_v42 = vld [vmem:[%s997_s10] sm:$0x1]  ;;  %v739_v9 = vunpack.c.l.bf16 %v749_v57  ;;  %v740_v10 = vunpack.c.h.bf16 %v749_v57  ;;  %v744_v12 = vunpack.c.h.bf16 %v750_v63 }
  0x1a   : > { %494 = vmatpush.msra.mxu0 %v478_v11  ;;  %v714_v47 = vld [vmem:[%s409_s12] sm:$0xff]   ;;  %v743_v11 = vunpack.c.l.bf16 %v750_v63 }
  0x1b   : > { %532 = vmatpush.msra.mxu1 %v516_v19  ;;  %v715_v49 = vunpack.c.l.bf16 %v714_v47  ;;  %v759_v52 = vld [vmem:[%s990_s3] ss:$0 sm:$0xff]  ;;  %v716_v54 = vunpack.c.h.bf16 %v714_v47 }
  0x1c   : > { %495 = vmatpush.msra.mxu0 %v477_v13  ;;  %v730_v53 = vld [vmem:[%s415_s14] sm:$0xff]   ;;  %v448_v14 = vmul.f32 %v759_v52, %v719_v55  ;;  %v450_v16 = vmul.f32 %v759_v52, %v723_v60  ;;  %v451_v17 = vmul.f32 %v759_v52, %v724_v61  ;;  %v453_v19 = vmul.f32 %v759_v52, %v728_v0 }
  0x1d   : > { %533 = vmatpush.msra.mxu1 %v515_v23  ;;  %v446_v1 = vmul.f32 %v759_v52, %v715_v49  ;;  %v731_v3 = vunpack.c.l.bf16 %v730_v53  ;;  %v761_v4 = vld [vmem:[%s992_s5] ss:$0 sm:$0xff]  ;;  %v732_v6 = vunpack.c.h.bf16 %v730_v53  ;;  %v447_v13 = vmul.f32 %v759_v52, %v716_v54 }
  0x1e   : > { %496 = vmatpush.msra.mxu0 %v476_v15  ;;  %v760_v5 = vld [vmem:[%s991_s4] ss:$0 sm:$0xff]  ;;  %v449_v15 = vmul.f32 %v759_v52, %v720_v59  ;;  %v584_v27 = vmul.f32 %v761_v4, %v740_v10  ;;  %v585_v28 = vmul.f32 %v761_v4, %v743_v11 }
  0x1f   : > { %534 = vmatpush.msra.mxu1 %v514_v25  ;;  %v762_v21 = vld [vmem:[%s993_s6] ss:$0 sm:$0xff]  ;;  %v458_v22 = vadd.f32 %v760_v5, %v446_v1  ;;  %v580_v23 = vmul.f32 %v761_v4, %v732_v6  ;;  %v582_v25 = vmul.f32 %v761_v4, %v736_v8 }
  0x20   : > { %497 = vmatpush.msra.mxu0 %v475_v18  ;;  %v452_v18 = vmul.f32 %v759_v52, %v727_v62 }
  0x21   : > { %535 = vmatpush.msra.mxu1 %v513_v29  ;;  %v586_v29 = vmul.f32 %v761_v4, %v744_v12 }
  0x22   : > { %498 = vmatpush.msra.mxu0 %v474_v20  ;;  %v579_v20 = vmul.f32 %v761_v4, %v731_v3 }
  0x23   : > { %536 = vmatpush.msra.mxu1 %v512_v31  ;;  %v460_v31 = vadd.f32 %v760_v5, %v448_v14 }
  0x24   : > { %499 = vmatpush.msra.mxu0 %v473_v24  ;;  %v581_v24 = vmul.f32 %v761_v4, %v735_v7 }
  0x25   : > { %537 = vmatpush.msra.mxu1 %v511_v34 }
  0x26   : > { %500 = vmatpush.msra.mxu0 %v472_v26  ;;  %v583_v26 = vmul.f32 %v761_v4, %v739_v9 }
  0x27   : > { %538 = vmatpush.msra.mxu1 %v510_v35  ;;  %v463_v35 = vadd.f32 %v760_v5, %v451_v17 }
  0x28   : > { %501 = vmatpush.msra.mxu0 %v471_v30  ;;  %v459_v30 = vadd.f32 %v760_v5, %v447_v13 }
  0x29   : > { %539 = vmatpush.msra.mxu1 %v509_v36  ;;  %v464_v36 = vadd.f32 %v760_v5, %v452_v18 }
  0x2a   : > { %502 = vmatpush.msra.mxu0 %v470_v32  ;;  %v461_v32 = vadd.f32 %v760_v5, %v449_v15 }
  0x2b   : > { %503 = vmatmul.f32.vlgmr.msra.gmra.mxu0 %v469_v33  ;;  %540 = vmatpush.msra.mxu1 %v508_v37  ;;  %v462_v33 = vadd.f32 %v760_v5, %v450_v16  ;;  %v465_v37 = vadd.f32 %v760_v5, %v453_v19 }
  0xa8   : > { %v504_v39 = vpop.f32.mrf.mxu0 }
  0xa9   : > { %v505_v40 = vadd.f32 %v504_v39, %v486_v38  ;;  %v591_v38 = vadd.f32 %v762_v21, %v579_v20 }
  0xab   : > { %v507_v41 = vmax.f32 %v505_v40, 0.0  ;;  %v592_v40 = vadd.f32 %v762_v21, %v580_v23 }
  0xad   : > { %541 = vmatmul.f32.vlgmr.msra.gmra.mxu1 %v507_v41  ;;  %v593_v41 = vadd.f32 %v762_v21, %v581_v24 }
 0x12a   : > { %v542_v43 = vpop.f32.mrf.mxu1 }
 0x12b   : > { %v543_v44 = vadd.f32 %v542_v43, %v524_v42  ;;  %v594_v42 = vadd.f32 %v762_v21, %v582_v25  ;;  %v595_v43 = vadd.f32 %v762_v21, %v583_v26 }
 0x12d   : > { %v545_v45 = vsub.f32 0.0, %v543_v44  ;;  %v596_v44 = vadd.f32 %v762_v21, %v584_v27 }
 0x12f   : > { %v546_v46 = vmul.f32 1.442695, %v545_v45  ;;  %v597_v45 = vadd.f32 %v762_v21, %v585_v28 }
 0x131   : > { %763 = vpow2.f32 %v546_v46  ;;  %v598_v46 = vadd.f32 %v762_v21, %v586_v29 }
 0x137   : > { %v764_v58 = vpop.eup %763 }
 0x138   : > { %v548_v2 = vadd.f32 1.0, %v764_v58 }
 0x13a   : > { %765 = vrcp.f32 %v548_v2 }
 0x140   : > { %v766_v34 = vpop.eup %765 }
 0x141   : > { %v550_v39 = vperm.slane %v766_v34, 0 }
 0x143   : > { %v551_v47 = vmul.f32 %v550_v39, %v458_v22  ;;  %v552_v48 = vmul.f32 %v550_v39, %v459_v30  ;;  %v553_v49 = vmul.f32 %v550_v39, %v460_v31  ;;  %v554_v50 = vmul.f32 %v550_v39, %v461_v32 }
 0x144   : > { %v555_v51 = vmul.f32 %v550_v39, %v462_v33  ;;  %v556_v52 = vmul.f32 %v550_v39, %v463_v35  ;;  %v557_v53 = vmul.f32 %v550_v39, %v464_v36  ;;  %v558_v54 = vmul.f32 %v550_v39, %v465_v37 }
 0x145   : > { %v599_v55 = vadd.f32 %v591_v38, %v551_v47  ;;  %v600_v56 = vadd.f32 %v592_v40, %v552_v48  ;;  %v601_v57 = vadd.f32 %v593_v41, %v553_v49  ;;  %v602_v58 = vadd.f32 %v594_v42, %v554_v50 }
 0x146   : > { %v603_v59 = vadd.f32 %v595_v43, %v555_v51  ;;  %v604_v60 = vadd.f32 %v596_v44, %v556_v52  ;;  %v605_v61 = vadd.f32 %v597_v45, %v557_v53  ;;  %v606_v1 = vadd.f32 %v598_v46, %v558_v54 }
 0x147   : > { %v607_v62 = vmax.f32 %v599_v55, 0.0  ;;  %v608_v63 = vmax.f32 %v600_v56, 0.0  ;;  %v609_v0 = vmax.f32 %v601_v57, 0.0  ;;  %v610_v2 = vmax.f32 %v602_v58, 0.0 }
 0x148   : > { %v611_v3 = vmax.f32 %v603_v59, 0.0  ;;  %v612_v4 = vmax.f32 %v604_v60, 0.0  ;;  %v613_v5 = vmax.f32 %v605_v61, 0.0  ;;  %v614_v6 = vmax.f32 %v606_v1, 0.0 }
 0x149   : > { %615 = vst [vmem:[%s424_s29] sm:$0xff] %v607_v62 }
 0x14a   : > { %616 = vst [vmem:[%s424_s29 + $0x8] sm:$0xff] %v608_v63 }
 0x14b   : > { %617 = vst [vmem:[%s424_s29 + $0x10] sm:$0xff] %v609_v0 }
 0x14c   : > { %618 = vst [vmem:[%s424_s29 + $0x18] sm:$0xff] %v610_v2 }
 0x14d   : > { %619 = vst [vmem:[%s424_s29 + $0x20] sm:$0xff] %v611_v3 }
 0x14e   : > { %620 = vst [vmem:[%s424_s29 + $0x28] sm:$0xff] %v612_v4 }
 0x14f   : > { %621 = vst [vmem:[%s424_s29 + $0x30] sm:$0xff] %v613_v5 }
 0x150   : > { %622 = vst [vmem:[%s424_s29 + $0x38] sm:$0xff] %v614_v6 }
 0x151 PF: > { %s21_s17 = sadd.s32 1, %s773_s17  }
 0x152   : > { %p18_p5 = scmp.ge.s32.totalorder %s21_s17, 4  }
 0x154   :  { %20 = sbr.rel (!%p18_p5) target bundleno = 1 (0x1), region = 100 }

</bundles_post_ra>
